<compile_context>
chip_gen: v7x
topology: tpu7x:2x2x1
jax: 0.10.0
libtpu: 0.0.40
codegen_flags: <defaults>
</compile_context>

<pallas_src>
import jax
import jax.numpy as jnp
from jax import lax
from jax.experimental import pallas as pl
from jax.experimental.pallas import tpu as pltpu

_LANE = 128
_TAPS = tuple((dy, dx) for dy in range(3) for dx in range(3))


def _round_up(n, m):
    return ((n + m - 1) // m) * m


def xception_block_kernel(
    x_ref,       # (1, H, W, Cin_p)      channel-padded input
    w1_ref,      # (9*Cin_p, Cout_p)     fused dw1*pw1 weights
    b1_ref,      # (1, Cout_p)           fused sep_conv1 bias
    w2_ref,      # (9*Cout_p, Cout_p)    fused dw2*pw2 weights
    b2_ref,      # (1, Cout_p)           fused sep_conv2 bias
    skw_ref,     # (Cin_p, Cout_p)       skip 1x1 weights
    skb_ref,     # (1, Cout_p)           skip bias
    out_ref,     # (1, Ho, Wo, Cout_p)
    xpad_sc,     # VMEM (H+2, W+2, Cin_p)   zero-halo input
    y1pad_sc,    # VMEM (H+2, W+2, Cout_p)  zero-halo relu(sep_conv1)
    y2pad_sc,    # VMEM (H+1, W+1, Cout_p)  (-inf top/left) sep_conv2 out for pool
    rowmax_sc,   # VMEM (Ho, W+1, Cout_p)   pool row pass
    acc_sc,      # VMEM (H*W, Cout_p)       matmul accumulator
):
    _, H, W, Cin_p = x_ref.shape
    _, Ho, Wo, Cout_p = out_ref.shape
    M = H * W
    f32 = jnp.float32
    NEG = -jnp.inf

    # ---- halo borders: thin slice writes, redone every step (no cross-step state) ----
    xpad_sc[0:1, :, :] = jnp.zeros((1, W + 2, Cin_p), f32)
    xpad_sc[H + 1:H + 2, :, :] = jnp.zeros((1, W + 2, Cin_p), f32)
    xpad_sc[:, 0:1, :] = jnp.zeros((H + 2, 1, Cin_p), f32)
    xpad_sc[:, W + 1:W + 2, :] = jnp.zeros((H + 2, 1, Cin_p), f32)

    y1pad_sc[0:1, :, :] = jnp.zeros((1, W + 2, Cout_p), f32)
    y1pad_sc[H + 1:H + 2, :, :] = jnp.zeros((1, W + 2, Cout_p), f32)
    y1pad_sc[:, 0:1, :] = jnp.zeros((H + 2, 1, Cout_p), f32)
    y1pad_sc[:, W + 1:W + 2, :] = jnp.zeros((H + 2, 1, Cout_p), f32)

    y2pad_sc[0:1, :, :] = jnp.full((1, W + 1, Cout_p), NEG, f32)
    y2pad_sc[:, 0:1, :] = jnp.full((H + 1, 1, Cout_p), NEG, f32)

    def fused_sep_conv(src_ref, cp, w_ref, b_ref):
        # depthwise 3x3 (pad=1) fused with pointwise 1x1: 9 shifted-tap MXU
        # matmuls accumulating into acc_sc (fused bias pre-loaded).
        acc_sc[...] = jnp.broadcast_to(b_ref[...], (M, Cout_p))
        for t, (dy, dx) in enumerate(_TAPS):
            tap = src_ref[dy:dy + H, dx:dx + W, :].reshape(M, cp)
            acc_sc[...] += jnp.dot(tap, w_ref[t * cp:(t + 1) * cp, :],
                                   preferred_element_type=jnp.float32)

    # ---- sep_conv1 + ReLU ----
    xpad_sc[1:H + 1, 1:W + 1, :] = x_ref[0]
    fused_sep_conv(xpad_sc, Cin_p, w1_ref, b1_ref)
    y1pad_sc[1:H + 1, 1:W + 1, :] = jnp.maximum(acc_sc[...], 0.0).reshape(H, W, Cout_p)

    # ---- sep_conv2 ----
    fused_sep_conv(y1pad_sc, Cout_p, w2_ref, b2_ref)

    # ---- max-pool 3x3, stride 2, pad 1 (separable, fully vectorized) ----
    y2pad_sc[1:, 1:, :] = acc_sc[...].reshape(H, W, Cout_p)
    # row pass: window rows {2i, 2i+1, 2i+2} in padded coords (major-dim reshape trick)
    a = y2pad_sc[0:H, :, :].reshape(Ho, 2, W + 1, Cout_p)
    b = y2pad_sc[1:H + 1, :, :].reshape(Ho, 2, W + 1, Cout_p)
    rowmax_sc[...] = jnp.maximum(jnp.maximum(a[:, 0], a[:, 1]), b[:, 1])
    # column pass: window cols {2j, 2j+1, 2j+2} via stride-2 sublane reads
    c0 = rowmax_sc[:, pl.ds(0, Wo, stride=2), :]
    c1 = rowmax_sc[:, pl.ds(1, Wo, stride=2), :]
    c2 = rowmax_sc[:, pl.ds(2, Wo, stride=2), :]
    pooled = jnp.maximum(jnp.maximum(c0, c1), c2)          # (Ho, Wo, Cout_p)

    # ---- skip: 1x1 conv, stride 2 (sampled from the resident padded input) ----
    xs = xpad_sc[:, pl.ds(1, Wo, stride=2), :]             # even cols -> (H+2, Wo, Cin_p)
    xs = xs[1:H + 1].reshape(Ho, 2, Wo, Cin_p)[:, 0]       # even rows -> (Ho, Wo, Cin_p)
    res = jnp.dot(xs.reshape(Ho * Wo, Cin_p), skw_ref[...],
                  preferred_element_type=jnp.float32) + skb_ref[...]

    # ---- single lane-dense output store ----
    out_ref[0] = pooled + res.reshape(Ho, Wo, Cout_p)


@jax.jit
def xception_block(x_nchw, params):
    """XceptionBlock forward. x_nchw: (B, Cin, H, W) float32 -> (B, Cout, H//2, W//2)."""
    B, Cin, H, W = x_nchw.shape
    Cout = params["pw1_b"].shape[0]
    assert H % 2 == 0 and W % 8 == 0, "kernel assumes even H and W % 8 == 0"
    Ho, Wo = H // 2, W // 2
    Cin_p = _round_up(Cin, _LANE)
    Cout_p = _round_up(Cout, _LANE)
    f32 = jnp.float32

    # NCHW -> NHWC, channels zero-padded to a lane-dense multiple of 128 (glue).
    x = jnp.transpose(x_nchw, (0, 2, 3, 1)).astype(f32)
    x = jnp.pad(x, ((0, 0), (0, 0), (0, 0), (0, Cin_p - Cin)))

    dw1 = params["dw1_w"][:, 0].astype(f32)            # (Cin, 3, 3)
    pw1 = params["pw1_w"][:, :, 0, 0].astype(f32)      # (Cout, Cin)
    dw2 = params["dw2_w"][:, 0].astype(f32)            # (Cout, 3, 3)
    pw2 = params["pw2_w"][:, :, 0, 0].astype(f32)      # (Cout, Cout)
    skw = params["skip_w"][:, :, 0, 0].astype(f32)     # (Cout, Cin)

    def fuse_dw_pw(dw, pw, cin, cin_p, cout, cout_p):
        # W_eff[(dy*3+dx)*cin_p + c, o] = dw[c, dy, dx] * pw[o, c]
        w = jnp.einsum("cyx,oc->yxco", dw, pw)          # (3, 3, cin, cout)
        w = jnp.pad(w, ((0, 0), (0, 0), (0, cin_p - cin), (0, cout_p - cout)))
        return w.reshape(9 * cin_p, cout_p)

    w1_eff = fuse_dw_pw(dw1, pw1, Cin, Cin_p, Cout, Cout_p)
    w2_eff = fuse_dw_pw(dw2, pw2, Cout, Cout_p, Cout, Cout_p)
    b1_eff = jnp.pad(params["pw1_b"].astype(f32) + pw1 @ params["dw1_b"].astype(f32),
                     (0, Cout_p - Cout)).reshape(1, Cout_p)
    b2_eff = jnp.pad(params["pw2_b"].astype(f32) + pw2 @ params["dw2_b"].astype(f32),
                     (0, Cout_p - Cout)).reshape(1, Cout_p)
    skw_p = jnp.pad(skw.T, ((0, Cin_p - Cin), (0, Cout_p - Cout)))    # (Cin_p, Cout_p)
    skb_p = jnp.pad(params["skip_b"].astype(f32), (0, Cout_p - Cout)).reshape(1, Cout_p)

    grid_spec = pltpu.PrefetchScalarGridSpec(
        num_scalar_prefetch=0,
        grid=(B,),
        in_specs=[
            pl.BlockSpec((1, H, W, Cin_p), lambda i: (i, 0, 0, 0)),
            pl.BlockSpec((9 * Cin_p, Cout_p), lambda i: (0, 0)),
            pl.BlockSpec((1, Cout_p), lambda i: (0, 0)),
            pl.BlockSpec((9 * Cout_p, Cout_p), lambda i: (0, 0)),
            pl.BlockSpec((1, Cout_p), lambda i: (0, 0)),
            pl.BlockSpec((Cin_p, Cout_p), lambda i: (0, 0)),
            pl.BlockSpec((1, Cout_p), lambda i: (0, 0)),
        ],
        out_specs=pl.BlockSpec((1, Ho, Wo, Cout_p), lambda i: (i, 0, 0, 0)),
        scratch_shapes=[
            pltpu.VMEM((H + 2, W + 2, Cin_p), jnp.float32),
            pltpu.VMEM((H + 2, W + 2, Cout_p), jnp.float32),
            pltpu.VMEM((H + 1, W + 1, Cout_p), jnp.float32),
            pltpu.VMEM((Ho, W + 1, Cout_p), jnp.float32),
            pltpu.VMEM((H * W, Cout_p), jnp.float32),
        ],
    )

    out_p = pl.pallas_call(
        xception_block_kernel,
        out_shape=jax.ShapeDtypeStruct((B, Ho, Wo, Cout_p), jnp.float32),
        grid_spec=grid_spec,
        compiler_params=pltpu.CompilerParams(dimension_semantics=("parallel",)),
    )(x, w1_eff, b1_eff, w2_eff, b2_eff, skw_p, skb_p)

    # strip channel padding, NHWC -> NCHW (glue)
    return jnp.transpose(out_p[..., :Cout], (0, 3, 1, 2))


# ---------------------- pure-JAX reference (for checking) ----------------------
def _conv_ref(x, w, b, stride=1, padding=0, groups=1):
    out = lax.conv_general_dilated(
        x, w, window_strides=(stride, stride),
        padding=[(padding, padding), (padding, padding)],
        dimension_numbers=("NCHW", "OIHW", "NCHW"),
        feature_group_count=groups)
    return out + b.reshape(1, -1, 1, 1)


def _maxpool_ref(x):
    return lax.reduce_window(
        x, -jnp.inf, lax.max,
        window_dimensions=(1, 1, 3, 3),
        window_strides=(1, 1, 2, 2),
        padding=((0, 0), (0, 0), (1, 1), (1, 1)))


def xception_block_ref(x, p, cin, cout):
    res = _conv_ref(x, p["skip_w"], p["skip_b"], stride=2)
    h = _conv_ref(x, p["dw1_w"], p["dw1_b"], padding=1, groups=cin)
    h = _conv_ref(h, p["pw1_w"], p["pw1_b"])
    h = jnp.maximum(h, 0.0)
    h = _conv_ref(h, p["dw2_w"], p["dw2_b"], padding=1, groups=cout)
    h = _conv_ref(h, p["pw2_w"], p["pw2_b"])
    h = _maxpool_ref(h)
    return h + res


if __name__ == "__main__":
    B, Cin, Cout, H, W = 2, 4, 8, 16, 16

    key = jax.random.PRNGKey(0)
    ks = jax.random.split(key, 11)
    params = {
        "dw1_w": 0.2 * jax.random.normal(ks[0], (Cin, 1, 3, 3), jnp.float32),
        "dw1_b": 0.1 * jax.random.normal(ks[1], (Cin,), jnp.float32),
        "pw1_w": 0.2 * jax.random.normal(ks[2], (Cout, Cin, 1, 1), jnp.float32),
        "pw1_b": 0.1 * jax.random.normal(ks[3], (Cout,), jnp.float32),
        "dw2_w": 0.2 * jax.random.normal(ks[4], (Cout, 1, 3, 3), jnp.float32),
        "dw2_b": 0.1 * jax.random.normal(ks[5], (Cout,), jnp.float32),
        "pw2_w": 0.2 * jax.random.normal(ks[6], (Cout, Cout, 1, 1), jnp.float32),
        "pw2_b": 0.1 * jax.random.normal(ks[7], (Cout,), jnp.float32),
        "skip_w": 0.2 * jax.random.normal(ks[8], (Cout, Cin, 1, 1), jnp.float32),
        "skip_b": 0.1 * jax.random.normal(ks[9], (Cout,), jnp.float32),
    }
    x = jax.random.normal(ks[10], (B, Cin, H, W), jnp.float32)

    out = jax.block_until_ready(xception_block(x, params))
    assert out.shape == (B, Cout, H // 2, W // 2), out.shape

    ref = jax.block_until_ready(xception_block_ref(x, params, Cin, Cout))
    max_err = float(jnp.max(jnp.abs(out - ref)))
    assert max_err < 2e-3, f"mismatch vs reference: max abs err = {max_err}"

    print("KERNEL_OK")
</pallas_src>

<mosaic_0001>
module attributes {stable_mosaic.version = 11 : i64} {
  func.func @xception_block_kernel(%arg0: i32, %arg1: memref<1x16x16x128xf32, #tpu.memory_space<vmem>>, %arg2: memref<1152x128xf32, #tpu.memory_space<vmem>>, %arg3: memref<1x128xf32, #tpu.memory_space<vmem>>, %arg4: memref<1152x128xf32, #tpu.memory_space<vmem>>, %arg5: memref<1x128xf32, #tpu.memory_space<vmem>>, %arg6: memref<128x128xf32, #tpu.memory_space<vmem>>, %arg7: memref<1x128xf32, #tpu.memory_space<vmem>>, %arg8: memref<1x8x8x128xf32, #tpu.memory_space<vmem>>, %arg9: memref<18x18x128xf32, #tpu.memory_space<vmem>>, %arg10: memref<18x18x128xf32, #tpu.memory_space<vmem>>, %arg11: memref<17x17x128xf32, #tpu.memory_space<vmem>>, %arg12: memref<8x17x128xf32, #tpu.memory_space<vmem>>, %arg13: memref<256x128xf32, #tpu.memory_space<vmem>>) attributes {dimension_semantics = [#tpu.dimension_semantics<parallel>], iteration_bounds = array<i64: 2>, scalar_prefetch = 0 : i64, scratch_operands = 5 : i64, tpu.core_type = #tpu.core_type<tc>, window_params = [{transform_indices = @transform_0, window_bounds = array<i64: 1, 16, 16, 128>}, {pipeline_mode = #tpu.pipeline_mode<synchronous>, transform_indices = @transform_1, window_bounds = array<i64: 1152, 128>}, {pipeline_mode = #tpu.pipeline_mode<synchronous>, transform_indices = @transform_2, window_bounds = array<i64: 1, 128>}, {pipeline_mode = #tpu.pipeline_mode<synchronous>, transform_indices = @transform_3, window_bounds = array<i64: 1152, 128>}, {pipeline_mode = #tpu.pipeline_mode<synchronous>, transform_indices = @transform_4, window_bounds = array<i64: 1, 128>}, {pipeline_mode = #tpu.pipeline_mode<synchronous>, transform_indices = @transform_5, window_bounds = array<i64: 128, 128>}, {pipeline_mode = #tpu.pipeline_mode<synchronous>, transform_indices = @transform_6, window_bounds = array<i64: 1, 128>}, {transform_indices = @transform_7, window_bounds = array<i64: 1, 8, 8, 128>}]} {
    %cst = arith.constant 0.000000e+00 : f32
    %0 = vector.broadcast %cst : f32 to vector<1x18x128xf32>
    %c0 = arith.constant 0 : index
    %c0_0 = arith.constant 0 : index
    %c0_1 = arith.constant 0 : index
    %1 = vector.load %arg9[%c0, %c0_0, %c0_1] : memref<18x18x128xf32, #tpu.memory_space<vmem>>, vector<1x18x128xf32>
    tpu.vector_store %arg9[%c0, %c0_0, %c0_1], %0 {strides = array<i32>} : memref<18x18x128xf32, #tpu.memory_space<vmem>>, vector<1x18x128xf32>,
    %cst_2 = arith.constant 0.000000e+00 : f32
    %2 = vector.broadcast %cst_2 : f32 to vector<1x18x128xf32>
    %c17 = arith.constant 17 : index
    %c0_3 = arith.constant 0 : index
    %c0_4 = arith.constant 0 : index
    %3 = vector.load %arg9[%c17, %c0_3, %c0_4] : memref<18x18x128xf32, #tpu.memory_space<vmem>>, vector<1x18x128xf32>
    tpu.vector_store %arg9[%c17, %c0_3, %c0_4], %2 {strides = array<i32>} : memref<18x18x128xf32, #tpu.memory_space<vmem>>, vector<1x18x128xf32>,
    %cst_5 = arith.constant 0.000000e+00 : f32
    %4 = vector.broadcast %cst_5 : f32 to vector<18x1x128xf32>
    %c0_6 = arith.constant 0 : index
    %c0_7 = arith.constant 0 : index
    %c0_8 = arith.constant 0 : index
    %5 = vector.load %arg9[%c0_6, %c0_7, %c0_8] : memref<18x18x128xf32, #tpu.memory_space<vmem>>, vector<18x1x128xf32>
    tpu.vector_store %arg9[%c0_6, %c0_7, %c0_8], %4 {strides = array<i32>} : memref<18x18x128xf32, #tpu.memory_space<vmem>>, vector<18x1x128xf32>,
    %cst_9 = arith.constant 0.000000e+00 : f32
    %6 = vector.broadcast %cst_9 : f32 to vector<18x1x128xf32>
    %c0_10 = arith.constant 0 : index
    %c17_11 = arith.constant 17 : index
    %c0_12 = arith.constant 0 : index
    %7 = vector.load %arg9[%c0_10, %c17_11, %c0_12] : memref<18x18x128xf32, #tpu.memory_space<vmem>>, vector<18x1x128xf32>
    tpu.vector_store %arg9[%c0_10, %c17_11, %c0_12], %6 {strides = array<i32>} : memref<18x18x128xf32, #tpu.memory_space<vmem>>, vector<18x1x128xf32>,
    %cst_13 = arith.constant 0.000000e+00 : f32
    %8 = vector.broadcast %cst_13 : f32 to vector<1x18x128xf32>
    %c0_14 = arith.constant 0 : index
    %c0_15 = arith.constant 0 : index
    %c0_16 = arith.constant 0 : index
    %9 = vector.load %arg10[%c0_14, %c0_15, %c0_16] : memref<18x18x128xf32, #tpu.memory_space<vmem>>, vector<1x18x128xf32>
    tpu.vector_store %arg10[%c0_14, %c0_15, %c0_16], %8 {strides = array<i32>} : memref<18x18x128xf32, #tpu.memory_space<vmem>>, vector<1x18x128xf32>,
    %cst_17 = arith.constant 0.000000e+00 : f32
    %10 = vector.broadcast %cst_17 : f32 to vector<1x18x128xf32>
    %c17_18 = arith.constant 17 : index
    %c0_19 = arith.constant 0 : index
    %c0_20 = arith.constant 0 : index
    %11 = vector.load %arg10[%c17_18, %c0_19, %c0_20] : memref<18x18x128xf32, #tpu.memory_space<vmem>>, vector<1x18x128xf32>
    tpu.vector_store %arg10[%c17_18, %c0_19, %c0_20], %10 {strides = array<i32>} : memref<18x18x128xf32, #tpu.memory_space<vmem>>, vector<1x18x128xf32>,
    %cst_21 = arith.constant 0.000000e+00 : f32
    %12 = vector.broadcast %cst_21 : f32 to vector<18x1x128xf32>
    %c0_22 = arith.constant 0 : index
    %c0_23 = arith.constant 0 : index
    %c0_24 = arith.constant 0 : index
    %13 = vector.load %arg10[%c0_22, %c0_23, %c0_24] : memref<18x18x128xf32, #tpu.memory_space<vmem>>, vector<18x1x128xf32>
    tpu.vector_store %arg10[%c0_22, %c0_23, %c0_24], %12 {strides = array<i32>} : memref<18x18x128xf32, #tpu.memory_space<vmem>>, vector<18x1x128xf32>,
    %cst_25 = arith.constant 0.000000e+00 : f32
    %14 = vector.broadcast %cst_25 : f32 to vector<18x1x128xf32>
    %c0_26 = arith.constant 0 : index
    %c17_27 = arith.constant 17 : index
    %c0_28 = arith.constant 0 : index
    %15 = vector.load %arg10[%c0_26, %c17_27, %c0_28] : memref<18x18x128xf32, #tpu.memory_space<vmem>>, vector<18x1x128xf32>
    tpu.vector_store %arg10[%c0_26, %c17_27, %c0_28], %14 {strides = array<i32>} : memref<18x18x128xf32, #tpu.memory_space<vmem>>, vector<18x1x128xf32>,
    %cst_29 = arith.constant 0xFF800000 : f32
    %16 = vector.broadcast %cst_29 : f32 to vector<1x17x128xf32>
    %c0_30 = arith.constant 0 : index
    %c0_31 = arith.constant 0 : index
    %c0_32 = arith.constant 0 : index
    %17 = vector.load %arg11[%c0_30, %c0_31, %c0_32] : memref<17x17x128xf32, #tpu.memory_space<vmem>>, vector<1x17x128xf32>
    tpu.vector_store %arg11[%c0_30, %c0_31, %c0_32], %16 {strides = array<i32>} : memref<17x17x128xf32, #tpu.memory_space<vmem>>, vector<1x17x128xf32>,
    %cst_33 = arith.constant 0xFF800000 : f32
    %18 = vector.broadcast %cst_33 : f32 to vector<17x1x128xf32>
    %c0_34 = arith.constant 0 : index
    %c0_35 = arith.constant 0 : index
    %c0_36 = arith.constant 0 : index
    %19 = vector.load %arg11[%c0_34, %c0_35, %c0_36] : memref<17x17x128xf32, #tpu.memory_space<vmem>>, vector<17x1x128xf32>
    tpu.vector_store %arg11[%c0_34, %c0_35, %c0_36], %18 {strides = array<i32>} : memref<17x17x128xf32, #tpu.memory_space<vmem>>, vector<17x1x128xf32>,
    %c0_37 = arith.constant 0 : index
    %c0_38 = arith.constant 0 : index
    %c0_39 = arith.constant 0 : index
    %c0_40 = arith.constant 0 : index
    %20 = vector.load %arg1[%c0_37, %c0_38, %c0_39, %c0_40] : memref<1x16x16x128xf32, #tpu.memory_space<vmem>>, vector<1x16x16x128xf32>
    %21 = vector.shape_cast %20 : vector<1x16x16x128xf32> to vector<16x16x128xf32>
    %c1 = arith.constant 1 : index
    %c1_41 = arith.constant 1 : index
    %c0_42 = arith.constant 0 : index
    %22 = vector.load %arg9[%c1, %c1_41, %c0_42] : memref<18x18x128xf32, #tpu.memory_space<vmem>>, vector<16x16x128xf32>
    tpu.vector_store %arg9[%c1, %c1_41, %c0_42], %21 {strides = array<i32>} : memref<18x18x128xf32, #tpu.memory_space<vmem>>, vector<16x16x128xf32>,
    %c0_43 = arith.constant 0 : index
    %c0_44 = arith.constant 0 : index
    %23 = vector.load %arg3[%c0_43, %c0_44] : memref<1x128xf32, #tpu.memory_space<vmem>>, vector<1x128xf32>
    %24 = vector.shape_cast %23 : vector<1x128xf32> to vector<1x128xf32>
    %25 = vector.broadcast %24 : vector<1x128xf32> to vector<256x128xf32>
    %c0_45 = arith.constant 0 : index
    %c0_46 = arith.constant 0 : index
    %26 = vector.load %arg13[%c0_45, %c0_46] : memref<256x128xf32, #tpu.memory_space<vmem>>, vector<256x128xf32>
    tpu.vector_store %arg13[%c0_45, %c0_46], %25 {strides = array<i32>} : memref<256x128xf32, #tpu.memory_space<vmem>>, vector<256x128xf32>,
    %c0_47 = arith.constant 0 : index
    %c0_48 = arith.constant 0 : index
    %c0_49 = arith.constant 0 : index
    %27 = vector.load %arg9[%c0_47, %c0_48, %c0_49] : memref<18x18x128xf32, #tpu.memory_space<vmem>>, vector<16x16x128xf32>
    %28 = vector.shape_cast %27 : vector<16x16x128xf32> to vector<256x128xf32>
    %c0_50 = arith.constant 0 : index
    %c0_51 = arith.constant 0 : index
    %29 = vector.load %arg13[%c0_50, %c0_51] : memref<256x128xf32, #tpu.memory_space<vmem>>, vector<256x128xf32>
    %c0_52 = arith.constant 0 : index
    %c0_53 = arith.constant 0 : index
    %30 = vector.load %arg2[%c0_52, %c0_53] : memref<1152x128xf32, #tpu.memory_space<vmem>>, vector<128x128xf32>
    %cst_54 = arith.constant dense<0.000000e+00> : vector<256x128xf32>
    %31 = tpu.matmul %28, %30, %cst_54 {dimension_numbers = #tpu.dot_dimension_numbers<[1], [0], [0], [1], [0, 0, 1, 1], [], []>} : vector<256x128xf32>, vector<128x128xf32>, vector<256x128xf32> -> vector<256x128xf32>
    %32 = arith.addf %29, %31 : vector<256x128xf32>
    %c0_55 = arith.constant 0 : index
    %c0_56 = arith.constant 0 : index
    %33 = vector.load %arg13[%c0_55, %c0_56] : memref<256x128xf32, #tpu.memory_space<vmem>>, vector<256x128xf32>
    tpu.vector_store %arg13[%c0_55, %c0_56], %32 {strides = array<i32>} : memref<256x128xf32, #tpu.memory_space<vmem>>, vector<256x128xf32>,
    %c0_57 = arith.constant 0 : index
    %c1_58 = arith.constant 1 : index
    %c0_59 = arith.constant 0 : index
    %34 = vector.load %arg9[%c0_57, %c1_58, %c0_59] : memref<18x18x128xf32, #tpu.memory_space<vmem>>, vector<16x16x128xf32>
    %35 = vector.shape_cast %34 : vector<16x16x128xf32> to vector<256x128xf32>
    %c0_60 = arith.constant 0 : index
    %c0_61 = arith.constant 0 : index
    %36 = vector.load %arg13[%c0_60, %c0_61] : memref<256x128xf32, #tpu.memory_space<vmem>>, vector<256x128xf32>
    %c128 = arith.constant 128 : index
    %c0_62 = arith.constant 0 : index
    %37 = vector.load %arg2[%c128, %c0_62] : memref<1152x128xf32, #tpu.memory_space<vmem>>, vector<128x128xf32>
    %cst_63 = arith.constant dense<0.000000e+00> : vector<256x128xf32>
    %38 = tpu.matmul %35, %37, %cst_63 {dimension_numbers = #tpu.dot_dimension_numbers<[1], [0], [0], [1], [0, 0, 1, 1], [], []>} : vector<256x128xf32>, vector<128x128xf32>, vector<256x128xf32> -> vector<256x128xf32>
    %39 = arith.addf %36, %38 : vector<256x128xf32>
    %c0_64 = arith.constant 0 : index
    %c0_65 = arith.constant 0 : index
    %40 = vector.load %arg13[%c0_64, %c0_65] : memref<256x128xf32, #tpu.memory_space<vmem>>, vector<256x128xf32>
    tpu.vector_store %arg13[%c0_64, %c0_65], %39 {strides = array<i32>} : memref<256x128xf32, #tpu.memory_space<vmem>>, vector<256x128xf32>,
    %c0_66 = arith.constant 0 : index
    %c2 = arith.constant 2 : index
    %c0_67 = arith.constant 0 : index
    %41 = vector.load %arg9[%c0_66, %c2, %c0_67] : memref<18x18x128xf32, #tpu.memory_space<vmem>>, vector<16x16x128xf32>
    %42 = vector.shape_cast %41 : vector<16x16x128xf32> to vector<256x128xf32>
    %c0_68 = arith.constant 0 : index
    %c0_69 = arith.constant 0 : index
    %43 = vector.load %arg13[%c0_68, %c0_69] : memref<256x128xf32, #tpu.memory_space<vmem>>, vector<256x128xf32>
    %c256 = arith.constant 256 : index
    %c0_70 = arith.constant 0 : index
    %44 = vector.load %arg2[%c256, %c0_70] : memref<1152x128xf32, #tpu.memory_space<vmem>>, vector<128x128xf32>
    %cst_71 = arith.constant dense<0.000000e+00> : vector<256x128xf32>
    %45 = tpu.matmul %42, %44, %cst_71 {dimension_numbers = #tpu.dot_dimension_numbers<[1], [0], [0], [1], [0, 0, 1, 1], [], []>} : vector<256x128xf32>, vector<128x128xf32>, vector<256x128xf32> -> vector<256x128xf32>
    %46 = arith.addf %43, %45 : vector<256x128xf32>
    %c0_72 = arith.constant 0 : index
    %c0_73 = arith.constant 0 : index
    %47 = vector.load %arg13[%c0_72, %c0_73] : memref<256x128xf32, #tpu.memory_space<vmem>>, vector<256x128xf32>
    tpu.vector_store %arg13[%c0_72, %c0_73], %46 {strides = array<i32>} : memref<256x128xf32, #tpu.memory_space<vmem>>, vector<256x128xf32>,
    %c1_74 = arith.constant 1 : index
    %c0_75 = arith.constant 0 : index
    %c0_76 = arith.constant 0 : index
    %48 = vector.load %arg9[%c1_74, %c0_75, %c0_76] : memref<18x18x128xf32, #tpu.memory_space<vmem>>, vector<16x16x128xf32>
    %49 = vector.shape_cast %48 : vector<16x16x128xf32> to vector<256x128xf32>
    %c0_77 = arith.constant 0 : index
    %c0_78 = arith.constant 0 : index
    %50 = vector.load %arg13[%c0_77, %c0_78] : memref<256x128xf32, #tpu.memory_space<vmem>>, vector<256x128xf32>
    %c384 = arith.constant 384 : index
    %c0_79 = arith.constant 0 : index
    %51 = vector.load %arg2[%c384, %c0_79] : memref<1152x128xf32, #tpu.memory_space<vmem>>, vector<128x128xf32>
    %cst_80 = arith.constant dense<0.000000e+00> : vector<256x128xf32>
    %52 = tpu.matmul %49, %51, %cst_80 {dimension_numbers = #tpu.dot_dimension_numbers<[1], [0], [0], [1], [0, 0, 1, 1], [], []>} : vector<256x128xf32>, vector<128x128xf32>, vector<256x128xf32> -> vector<256x128xf32>
    %53 = arith.addf %50, %52 : vector<256x128xf32>
    %c0_81 = arith.constant 0 : index
    %c0_82 = arith.constant 0 : index
    %54 = vector.load %arg13[%c0_81, %c0_82] : memref<256x128xf32, #tpu.memory_space<vmem>>, vector<256x128xf32>
    tpu.vector_store %arg13[%c0_81, %c0_82], %53 {strides = array<i32>} : memref<256x128xf32, #tpu.memory_space<vmem>>, vector<256x128xf32>,
    %c1_83 = arith.constant 1 : index
    %c1_84 = arith.constant 1 : index
    %c0_85 = arith.constant 0 : index
    %55 = vector.load %arg9[%c1_83, %c1_84, %c0_85] : memref<18x18x128xf32, #tpu.memory_space<vmem>>, vector<16x16x128xf32>
    %56 = vector.shape_cast %55 : vector<16x16x128xf32> to vector<256x128xf32>
    %c0_86 = arith.constant 0 : index
    %c0_87 = arith.constant 0 : index
    %57 = vector.load %arg13[%c0_86, %c0_87] : memref<256x128xf32, #tpu.memory_space<vmem>>, vector<256x128xf32>
    %c512 = arith.constant 512 : index
    %c0_88 = arith.constant 0 : index
    %58 = vector.load %arg2[%c512, %c0_88] : memref<1152x128xf32, #tpu.memory_space<vmem>>, vector<128x128xf32>
    %cst_89 = arith.constant dense<0.000000e+00> : vector<256x128xf32>
    %59 = tpu.matmul %56, %58, %cst_89 {dimension_numbers = #tpu.dot_dimension_numbers<[1], [0], [0], [1], [0, 0, 1, 1], [], []>} : vector<256x128xf32>, vector<128x128xf32>, vector<256x128xf32> -> vector<256x128xf32>
    %60 = arith.addf %57, %59 : vector<256x128xf32>
    %c0_90 = arith.constant 0 : index
    %c0_91 = arith.constant 0 : index
    %61 = vector.load %arg13[%c0_90, %c0_91] : memref<256x128xf32, #tpu.memory_space<vmem>>, vector<256x128xf32>
    tpu.vector_store %arg13[%c0_90, %c0_91], %60 {strides = array<i32>} : memref<256x128xf32, #tpu.memory_space<vmem>>, vector<256x128xf32>,
    %c1_92 = arith.constant 1 : index
    %c2_93 = arith.constant 2 : index
    %c0_94 = arith.constant 0 : index
    %62 = vector.load %arg9[%c1_92, %c2_93, %c0_94] : memref<18x18x128xf32, #tpu.memory_space<vmem>>, vector<16x16x128xf32>
    %63 = vector.shape_cast %62 : vector<16x16x128xf32> to vector<256x128xf32>
    %c0_95 = arith.constant 0 : index
    %c0_96 = arith.constant 0 : index
    %64 = vector.load %arg13[%c0_95, %c0_96] : memref<256x128xf32, #tpu.memory_space<vmem>>, vector<256x128xf32>
    %c640 = arith.constant 640 : index
    %c0_97 = arith.constant 0 : index
    %65 = vector.load %arg2[%c640, %c0_97] : memref<1152x128xf32, #tpu.memory_space<vmem>>, vector<128x128xf32>
    %cst_98 = arith.constant dense<0.000000e+00> : vector<256x128xf32>
    %66 = tpu.matmul %63, %65, %cst_98 {dimension_numbers = #tpu.dot_dimension_numbers<[1], [0], [0], [1], [0, 0, 1, 1], [], []>} : vector<256x128xf32>, vector<128x128xf32>, vector<256x128xf32> -> vector<256x128xf32>
    %67 = arith.addf %64, %66 : vector<256x128xf32>
    %c0_99 = arith.constant 0 : index
    %c0_100 = arith.constant 0 : index
    %68 = vector.load %arg13[%c0_99, %c0_100] : memref<256x128xf32, #tpu.memory_space<vmem>>, vector<256x128xf32>
    tpu.vector_store %arg13[%c0_99, %c0_100], %67 {strides = array<i32>} : memref<256x128xf32, #tpu.memory_space<vmem>>, vector<256x128xf32>,
    %c2_101 = arith.constant 2 : index
    %c0_102 = arith.constant 0 : index
    %c0_103 = arith.constant 0 : index
    %69 = vector.load %arg9[%c2_101, %c0_102, %c0_103] : memref<18x18x128xf32, #tpu.memory_space<vmem>>, vector<16x16x128xf32>
    %70 = vector.shape_cast %69 : vector<16x16x128xf32> to vector<256x128xf32>
    %c0_104 = arith.constant 0 : index
    %c0_105 = arith.constant 0 : index
    %71 = vector.load %arg13[%c0_104, %c0_105] : memref<256x128xf32, #tpu.memory_space<vmem>>, vector<256x128xf32>
    %c768 = arith.constant 768 : index
    %c0_106 = arith.constant 0 : index
    %72 = vector.load %arg2[%c768, %c0_106] : memref<1152x128xf32, #tpu.memory_space<vmem>>, vector<128x128xf32>
    %cst_107 = arith.constant dense<0.000000e+00> : vector<256x128xf32>
    %73 = tpu.matmul %70, %72, %cst_107 {dimension_numbers = #tpu.dot_dimension_numbers<[1], [0], [0], [1], [0, 0, 1, 1], [], []>} : vector<256x128xf32>, vector<128x128xf32>, vector<256x128xf32> -> vector<256x128xf32>
    %74 = arith.addf %71, %73 : vector<256x128xf32>
    %c0_108 = arith.constant 0 : index
    %c0_109 = arith.constant 0 : index
    %75 = vector.load %arg13[%c0_108, %c0_109] : memref<256x128xf32, #tpu.memory_space<vmem>>, vector<256x128xf32>
    tpu.vector_store %arg13[%c0_108, %c0_109], %74 {strides = array<i32>} : memref<256x128xf32, #tpu.memory_space<vmem>>, vector<256x128xf32>,
    %c2_110 = arith.constant 2 : index
    %c1_111 = arith.constant 1 : index
    %c0_112 = arith.constant 0 : index
    %76 = vector.load %arg9[%c2_110, %c1_111, %c0_112] : memref<18x18x128xf32, #tpu.memory_space<vmem>>, vector<16x16x128xf32>
    %77 = vector.shape_cast %76 : vector<16x16x128xf32> to vector<256x128xf32>
    %c0_113 = arith.constant 0 : index
    %c0_114 = arith.constant 0 : index
    %78 = vector.load %arg13[%c0_113, %c0_114] : memref<256x128xf32, #tpu.memory_space<vmem>>, vector<256x128xf32>
    %c896 = arith.constant 896 : index
    %c0_115 = arith.constant 0 : index
    %79 = vector.load %arg2[%c896, %c0_115] : memref<1152x128xf32, #tpu.memory_space<vmem>>, vector<128x128xf32>
    %cst_116 = arith.constant dense<0.000000e+00> : vector<256x128xf32>
    %80 = tpu.matmul %77, %79, %cst_116 {dimension_numbers = #tpu.dot_dimension_numbers<[1], [0], [0], [1], [0, 0, 1, 1], [], []>} : vector<256x128xf32>, vector<128x128xf32>, vector<256x128xf32> -> vector<256x128xf32>
    %81 = arith.addf %78, %80 : vector<256x128xf32>
    %c0_117 = arith.constant 0 : index
    %c0_118 = arith.constant 0 : index
    %82 = vector.load %arg13[%c0_117, %c0_118] : memref<256x128xf32, #tpu.memory_space<vmem>>, vector<256x128xf32>
    tpu.vector_store %arg13[%c0_117, %c0_118], %81 {strides = array<i32>} : memref<256x128xf32, #tpu.memory_space<vmem>>, vector<256x128xf32>,
    %c2_119 = arith.constant 2 : index
    %c2_120 = arith.constant 2 : index
    %c0_121 = arith.constant 0 : index
    %83 = vector.load %arg9[%c2_119, %c2_120, %c0_121] : memref<18x18x128xf32, #tpu.memory_space<vmem>>, vector<16x16x128xf32>
    %84 = vector.shape_cast %83 : vector<16x16x128xf32> to vector<256x128xf32>
    %c0_122 = arith.constant 0 : index
    %c0_123 = arith.constant 0 : index
    %85 = vector.load %arg13[%c0_122, %c0_123] : memref<256x128xf32, #tpu.memory_space<vmem>>, vector<256x128xf32>
    %c1024 = arith.constant 1024 : index
    %c0_124 = arith.constant 0 : index
    %86 = vector.load %arg2[%c1024, %c0_124] : memref<1152x128xf32, #tpu.memory_space<vmem>>, vector<128x128xf32>
    %cst_125 = arith.constant dense<0.000000e+00> : vector<256x128xf32>
    %87 = tpu.matmul %84, %86, %cst_125 {dimension_numbers = #tpu.dot_dimension_numbers<[1], [0], [0], [1], [0, 0, 1, 1], [], []>} : vector<256x128xf32>, vector<128x128xf32>, vector<256x128xf32> -> vector<256x128xf32>
    %88 = arith.addf %85, %87 : vector<256x128xf32>
    %c0_126 = arith.constant 0 : index
    %c0_127 = arith.constant 0 : index
    %89 = vector.load %arg13[%c0_126, %c0_127] : memref<256x128xf32, #tpu.memory_space<vmem>>, vector<256x128xf32>
    tpu.vector_store %arg13[%c0_126, %c0_127], %88 {strides = array<i32>} : memref<256x128xf32, #tpu.memory_space<vmem>>, vector<256x128xf32>,
    %c0_128 = arith.constant 0 : index
    %c0_129 = arith.constant 0 : index
    %90 = vector.load %arg13[%c0_128, %c0_129] : memref<256x128xf32, #tpu.memory_space<vmem>>, vector<256x128xf32>
    %cst_130 = arith.constant 0.000000e+00 : f32
    %91 = vector.broadcast %cst_130 : f32 to vector<256x128xf32>
    %92 = arith.maximumf %90, %91 : vector<256x128xf32>
    %93 = vector.shape_cast %92 : vector<256x128xf32> to vector<16x16x128xf32>
    %c1_131 = arith.constant 1 : index
    %c1_132 = arith.constant 1 : index
    %c0_133 = arith.constant 0 : index
    %94 = vector.load %arg10[%c1_131, %c1_132, %c0_133] : memref<18x18x128xf32, #tpu.memory_space<vmem>>, vector<16x16x128xf32>
    tpu.vector_store %arg10[%c1_131, %c1_132, %c0_133], %93 {strides = array<i32>} : memref<18x18x128xf32, #tpu.memory_space<vmem>>, vector<16x16x128xf32>,
    %c0_134 = arith.constant 0 : index
    %c0_135 = arith.constant 0 : index
    %95 = vector.load %arg5[%c0_134, %c0_135] : memref<1x128xf32, #tpu.memory_space<vmem>>, vector<1x128xf32>
    %96 = vector.shape_cast %95 : vector<1x128xf32> to vector<1x128xf32>
    %97 = vector.broadcast %96 : vector<1x128xf32> to vector<256x128xf32>
    %c0_136 = arith.constant 0 : index
    %c0_137 = arith.constant 0 : index
    %98 = vector.load %arg13[%c0_136, %c0_137] : memref<256x128xf32, #tpu.memory_space<vmem>>, vector<256x128xf32>
    tpu.vector_store %arg13[%c0_136, %c0_137], %97 {strides = array<i32>} : memref<256x128xf32, #tpu.memory_space<vmem>>, vector<256x128xf32>,
    %c0_138 = arith.constant 0 : index
    %c0_139 = arith.constant 0 : index
    %c0_140 = arith.constant 0 : index
    %99 = vector.load %arg10[%c0_138, %c0_139, %c0_140] : memref<18x18x128xf32, #tpu.memory_space<vmem>>, vector<16x16x128xf32>
    %100 = vector.shape_cast %99 : vector<16x16x128xf32> to vector<256x128xf32>
    %c0_141 = arith.constant 0 : index
    %c0_142 = arith.constant 0 : index
    %101 = vector.load %arg13[%c0_141, %c0_142] : memref<256x128xf32, #tpu.memory_space<vmem>>, vector<256x128xf32>
    %c0_143 = arith.constant 0 : index
    %c0_144 = arith.constant 0 : index
    %102 = vector.load %arg4[%c0_143, %c0_144] : memref<1152x128xf32, #tpu.memory_space<vmem>>, vector<128x128xf32>
    %cst_145 = arith.constant dense<0.000000e+00> : vector<256x128xf32>
    %103 = tpu.matmul %100, %102, %cst_145 {dimension_numbers = #tpu.dot_dimension_numbers<[1], [0], [0], [1], [0, 0, 1, 1], [], []>} : vector<256x128xf32>, vector<128x128xf32>, vector<256x128xf32> -> vector<256x128xf32>
    %104 = arith.addf %101, %103 : vector<256x128xf32>
    %c0_146 = arith.constant 0 : index
    %c0_147 = arith.constant 0 : index
    %105 = vector.load %arg13[%c0_146, %c0_147] : memref<256x128xf32, #tpu.memory_space<vmem>>, vector<256x128xf32>
    tpu.vector_store %arg13[%c0_146, %c0_147], %104 {strides = array<i32>} : memref<256x128xf32, #tpu.memory_space<vmem>>, vector<256x128xf32>,
    %c0_148 = arith.constant 0 : index
    %c1_149 = arith.constant 1 : index
    %c0_150 = arith.constant 0 : index
    %106 = vector.load %arg10[%c0_148, %c1_149, %c0_150] : memref<18x18x128xf32, #tpu.memory_space<vmem>>, vector<16x16x128xf32>
    %107 = vector.shape_cast %106 : vector<16x16x128xf32> to vector<256x128xf32>
    %c0_151 = arith.constant 0 : index
    %c0_152 = arith.constant 0 : index
    %108 = vector.load %arg13[%c0_151, %c0_152] : memref<256x128xf32, #tpu.memory_space<vmem>>, vector<256x128xf32>
    %c128_153 = arith.constant 128 : index
    %c0_154 = arith.constant 0 : index
    %109 = vector.load %arg4[%c128_153, %c0_154] : memref<1152x128xf32, #tpu.memory_space<vmem>>, vector<128x128xf32>
    %cst_155 = arith.constant dense<0.000000e+00> : vector<256x128xf32>
    %110 = tpu.matmul %107, %109, %cst_155 {dimension_numbers = #tpu.dot_dimension_numbers<[1], [0], [0], [1], [0, 0, 1, 1], [], []>} : vector<256x128xf32>, vector<128x128xf32>, vector<256x128xf32> -> vector<256x128xf32>
    %111 = arith.addf %108, %110 : vector<256x128xf32>
    %c0_156 = arith.constant 0 : index
    %c0_157 = arith.constant 0 : index
    %112 = vector.load %arg13[%c0_156, %c0_157] : memref<256x128xf32, #tpu.memory_space<vmem>>, vector<256x128xf32>
    tpu.vector_store %arg13[%c0_156, %c0_157], %111 {strides = array<i32>} : memref<256x128xf32, #tpu.memory_space<vmem>>, vector<256x128xf32>,
    %c0_158 = arith.constant 0 : index
    %c2_159 = arith.constant 2 : index
    %c0_160 = arith.constant 0 : index
    %113 = vector.load %arg10[%c0_158, %c2_159, %c0_160] : memref<18x18x128xf32, #tpu.memory_space<vmem>>, vector<16x16x128xf32>
    %114 = vector.shape_cast %113 : vector<16x16x128xf32> to vector<256x128xf32>
    %c0_161 = arith.constant 0 : index
    %c0_162 = arith.constant 0 : index
    %115 = vector.load %arg13[%c0_161, %c0_162] : memref<256x128xf32, #tpu.memory_space<vmem>>, vector<256x128xf32>
    %c256_163 = arith.constant 256 : index
    %c0_164 = arith.constant 0 : index
    %116 = vector.load %arg4[%c256_163, %c0_164] : memref<1152x128xf32, #tpu.memory_space<vmem>>, vector<128x128xf32>
    %cst_165 = arith.constant dense<0.000000e+00> : vector<256x128xf32>
    %117 = tpu.matmul %114, %116, %cst_165 {dimension_numbers = #tpu.dot_dimension_numbers<[1], [0], [0], [1], [0, 0, 1, 1], [], []>} : vector<256x128xf32>, vector<128x128xf32>, vector<256x128xf32> -> vector<256x128xf32>
    %118 = arith.addf %115, %117 : vector<256x128xf32>
    %c0_166 = arith.constant 0 : index
    %c0_167 = arith.constant 0 : index
    %119 = vector.load %arg13[%c0_166, %c0_167] : memref<256x128xf32, #tpu.memory_space<vmem>>, vector<256x128xf32>
    tpu.vector_store %arg13[%c0_166, %c0_167], %118 {strides = array<i32>} : memref<256x128xf32, #tpu.memory_space<vmem>>, vector<256x128xf32>,
    %c1_168 = arith.constant 1 : index
    %c0_169 = arith.constant 0 : index
    %c0_170 = arith.constant 0 : index
    %120 = vector.load %arg10[%c1_168, %c0_169, %c0_170] : memref<18x18x128xf32, #tpu.memory_space<vmem>>, vector<16x16x128xf32>
    %121 = vector.shape_cast %120 : vector<16x16x128xf32> to vector<256x128xf32>
    %c0_171 = arith.constant 0 : index
    %c0_172 = arith.constant 0 : index
    %122 = vector.load %arg13[%c0_171, %c0_172] : memref<256x128xf32, #tpu.memory_space<vmem>>, vector<256x128xf32>
    %c384_173 = arith.constant 384 : index
    %c0_174 = arith.constant 0 : index
    %123 = vector.load %arg4[%c384_173, %c0_174] : memref<1152x128xf32, #tpu.memory_space<vmem>>, vector<128x128xf32>
    %cst_175 = arith.constant dense<0.000000e+00> : vector<256x128xf32>
    %124 = tpu.matmul %121, %123, %cst_175 {dimension_numbers = #tpu.dot_dimension_numbers<[1], [0], [0], [1], [0, 0, 1, 1], [], []>} : vector<256x128xf32>, vector<128x128xf32>, vector<256x128xf32> -> vector<256x128xf32>
    %125 = arith.addf %122, %124 : vector<256x128xf32>
    %c0_176 = arith.constant 0 : index
    %c0_177 = arith.constant 0 : index
    %126 = vector.load %arg13[%c0_176, %c0_177] : memref<256x128xf32, #tpu.memory_space<vmem>>, vector<256x128xf32>
    tpu.vector_store %arg13[%c0_176, %c0_177], %125 {strides = array<i32>} : memref<256x128xf32, #tpu.memory_space<vmem>>, vector<256x128xf32>,
    %c1_178 = arith.constant 1 : index
    %c1_179 = arith.constant 1 : index
    %c0_180 = arith.constant 0 : index
    %127 = vector.load %arg10[%c1_178, %c1_179, %c0_180] : memref<18x18x128xf32, #tpu.memory_space<vmem>>, vector<16x16x128xf32>
    %128 = vector.shape_cast %127 : vector<16x16x128xf32> to vector<256x128xf32>
    %c0_181 = arith.constant 0 : index
    %c0_182 = arith.constant 0 : index
    %129 = vector.load %arg13[%c0_181, %c0_182] : memref<256x128xf32, #tpu.memory_space<vmem>>, vector<256x128xf32>
    %c512_183 = arith.constant 512 : index
    %c0_184 = arith.constant 0 : index
    %130 = vector.load %arg4[%c512_183, %c0_184] : memref<1152x128xf32, #tpu.memory_space<vmem>>, vector<128x128xf32>
    %cst_185 = arith.constant dense<0.000000e+00> : vector<256x128xf32>
    %131 = tpu.matmul %128, %130, %cst_185 {dimension_numbers = #tpu.dot_dimension_numbers<[1], [0], [0], [1], [0, 0, 1, 1], [], []>} : vector<256x128xf32>, vector<128x128xf32>, vector<256x128xf32> -> vector<256x128xf32>
    %132 = arith.addf %129, %131 : vector<256x128xf32>
    %c0_186 = arith.constant 0 : index
    %c0_187 = arith.constant 0 : index
    %133 = vector.load %arg13[%c0_186, %c0_187] : memref<256x128xf32, #tpu.memory_space<vmem>>, vector<256x128xf32>
    tpu.vector_store %arg13[%c0_186, %c0_187], %132 {strides = array<i32>} : memref<256x128xf32, #tpu.memory_space<vmem>>, vector<256x128xf32>,
    %c1_188 = arith.constant 1 : index
    %c2_189 = arith.constant 2 : index
    %c0_190 = arith.constant 0 : index
    %134 = vector.load %arg10[%c1_188, %c2_189, %c0_190] : memref<18x18x128xf32, #tpu.memory_space<vmem>>, vector<16x16x128xf32>
    %135 = vector.shape_cast %134 : vector<16x16x128xf32> to vector<256x128xf32>
    %c0_191 = arith.constant 0 : index
    %c0_192 = arith.constant 0 : index
    %136 = vector.load %arg13[%c0_191, %c0_192] : memref<256x128xf32, #tpu.memory_space<vmem>>, vector<256x128xf32>
    %c640_193 = arith.constant 640 : index
    %c0_194 = arith.constant 0 : index
    %137 = vector.load %arg4[%c640_193, %c0_194] : memref<1152x128xf32, #tpu.memory_space<vmem>>, vector<128x128xf32>
    %cst_195 = arith.constant dense<0.000000e+00> : vector<256x128xf32>
    %138 = tpu.matmul %135, %137, %cst_195 {dimension_numbers = #tpu.dot_dimension_numbers<[1], [0], [0], [1], [0, 0, 1, 1], [], []>} : vector<256x128xf32>, vector<128x128xf32>, vector<256x128xf32> -> vector<256x128xf32>
    %139 = arith.addf %136, %138 : vector<256x128xf32>
    %c0_196 = arith.constant 0 : index
    %c0_197 = arith.constant 0 : index
    %140 = vector.load %arg13[%c0_196, %c0_197] : memref<256x128xf32, #tpu.memory_space<vmem>>, vector<256x128xf32>
    tpu.vector_store %arg13[%c0_196, %c0_197], %139 {strides = array<i32>} : memref<256x128xf32, #tpu.memory_space<vmem>>, vector<256x128xf32>,
    %c2_198 = arith.constant 2 : index
    %c0_199 = arith.constant 0 : index
    %c0_200 = arith.constant 0 : index
    %141 = vector.load %arg10[%c2_198, %c0_199, %c0_200] : memref<18x18x128xf32, #tpu.memory_space<vmem>>, vector<16x16x128xf32>
    %142 = vector.shape_cast %141 : vector<16x16x128xf32> to vector<256x128xf32>
    %c0_201 = arith.constant 0 : index
    %c0_202 = arith.constant 0 : index
    %143 = vector.load %arg13[%c0_201, %c0_202] : memref<256x128xf32, #tpu.memory_space<vmem>>, vector<256x128xf32>
    %c768_203 = arith.constant 768 : index
    %c0_204 = arith.constant 0 : index
    %144 = vector.load %arg4[%c768_203, %c0_204] : memref<1152x128xf32, #tpu.memory_space<vmem>>, vector<128x128xf32>
    %cst_205 = arith.constant dense<0.000000e+00> : vector<256x128xf32>
    %145 = tpu.matmul %142, %144, %cst_205 {dimension_numbers = #tpu.dot_dimension_numbers<[1], [0], [0], [1], [0, 0, 1, 1], [], []>} : vector<256x128xf32>, vector<128x128xf32>, vector<256x128xf32> -> vector<256x128xf32>
    %146 = arith.addf %143, %145 : vector<256x128xf32>
    %c0_206 = arith.constant 0 : index
    %c0_207 = arith.constant 0 : index
    %147 = vector.load %arg13[%c0_206, %c0_207] : memref<256x128xf32, #tpu.memory_space<vmem>>, vector<256x128xf32>
    tpu.vector_store %arg13[%c0_206, %c0_207], %146 {strides = array<i32>} : memref<256x128xf32, #tpu.memory_space<vmem>>, vector<256x128xf32>,
    %c2_208 = arith.constant 2 : index
    %c1_209 = arith.constant 1 : index
    %c0_210 = arith.constant 0 : index
    %148 = vector.load %arg10[%c2_208, %c1_209, %c0_210] : memref<18x18x128xf32, #tpu.memory_space<vmem>>, vector<16x16x128xf32>
    %149 = vector.shape_cast %148 : vector<16x16x128xf32> to vector<256x128xf32>
    %c0_211 = arith.constant 0 : index
    %c0_212 = arith.constant 0 : index
    %150 = vector.load %arg13[%c0_211, %c0_212] : memref<256x128xf32, #tpu.memory_space<vmem>>, vector<256x128xf32>
    %c896_213 = arith.constant 896 : index
    %c0_214 = arith.constant 0 : index
    %151 = vector.load %arg4[%c896_213, %c0_214] : memref<1152x128xf32, #tpu.memory_space<vmem>>, vector<128x128xf32>
    %cst_215 = arith.constant dense<0.000000e+00> : vector<256x128xf32>
    %152 = tpu.matmul %149, %151, %cst_215 {dimension_numbers = #tpu.dot_dimension_numbers<[1], [0], [0], [1], [0, 0, 1, 1], [], []>} : vector<256x128xf32>, vector<128x128xf32>, vector<256x128xf32> -> vector<256x128xf32>
    %153 = arith.addf %150, %152 : vector<256x128xf32>
    %c0_216 = arith.constant 0 : index
    %c0_217 = arith.constant 0 : index
    %154 = vector.load %arg13[%c0_216, %c0_217] : memref<256x128xf32, #tpu.memory_space<vmem>>, vector<256x128xf32>
    tpu.vector_store %arg13[%c0_216, %c0_217], %153 {strides = array<i32>} : memref<256x128xf32, #tpu.memory_space<vmem>>, vector<256x128xf32>,
    %c2_218 = arith.constant 2 : index
    %c2_219 = arith.constant 2 : index
    %c0_220 = arith.constant 0 : index
    %155 = vector.load %arg10[%c2_218, %c2_219, %c0_220] : memref<18x18x128xf32, #tpu.memory_space<vmem>>, vector<16x16x128xf32>
    %156 = vector.shape_cast %155 : vector<16x16x128xf32> to vector<256x128xf32>
    %c0_221 = arith.constant 0 : index
    %c0_222 = arith.constant 0 : index
    %157 = vector.load %arg13[%c0_221, %c0_222] : memref<256x128xf32, #tpu.memory_space<vmem>>, vector<256x128xf32>
    %c1024_223 = arith.constant 1024 : index
    %c0_224 = arith.constant 0 : index
    %158 = vector.load %arg4[%c1024_223, %c0_224] : memref<1152x128xf32, #tpu.memory_space<vmem>>, vector<128x128xf32>
    %cst_225 = arith.constant dense<0.000000e+00> : vector<256x128xf32>
    %159 = tpu.matmul %156, %158, %cst_225 {dimension_numbers = #tpu.dot_dimension_numbers<[1], [0], [0], [1], [0, 0, 1, 1], [], []>} : vector<256x128xf32>, vector<128x128xf32>, vector<256x128xf32> -> vector<256x128xf32>
    %160 = arith.addf %157, %159 : vector<256x128xf32>
    %c0_226 = arith.constant 0 : index
    %c0_227 = arith.constant 0 : index
    %161 = vector.load %arg13[%c0_226, %c0_227] : memref<256x128xf32, #tpu.memory_space<vmem>>, vector<256x128xf32>
    tpu.vector_store %arg13[%c0_226, %c0_227], %160 {strides = array<i32>} : memref<256x128xf32, #tpu.memory_space<vmem>>, vector<256x128xf32>,
    %c0_228 = arith.constant 0 : index
    %c0_229 = arith.constant 0 : index
    %162 = vector.load %arg13[%c0_228, %c0_229] : memref<256x128xf32, #tpu.memory_space<vmem>>, vector<256x128xf32>
    %163 = vector.shape_cast %162 : vector<256x128xf32> to vector<16x16x128xf32>
    %c1_230 = arith.constant 1 : index
    %c1_231 = arith.constant 1 : index
    %c0_232 = arith.constant 0 : index
    %164 = vector.load %arg11[%c1_230, %c1_231, %c0_232] : memref<17x17x128xf32, #tpu.memory_space<vmem>>, vector<16x16x128xf32>
    tpu.vector_store %arg11[%c1_230, %c1_231, %c0_232], %163 {strides = array<i32>} : memref<17x17x128xf32, #tpu.memory_space<vmem>>, vector<16x16x128xf32>,
    %c0_233 = arith.constant 0 : index
    %c0_234 = arith.constant 0 : index
    %c0_235 = arith.constant 0 : index
    %165 = vector.load %arg11[%c0_233, %c0_234, %c0_235] : memref<17x17x128xf32, #tpu.memory_space<vmem>>, vector<16x17x128xf32>
    %166 = vector.shape_cast %165 : vector<16x17x128xf32> to vector<8x2x17x128xf32>
    %c1_236 = arith.constant 1 : index
    %c0_237 = arith.constant 0 : index
    %c0_238 = arith.constant 0 : index
    %167 = vector.load %arg11[%c1_236, %c0_237, %c0_238] : memref<17x17x128xf32, #tpu.memory_space<vmem>>, vector<16x17x128xf32>
    %168 = vector.shape_cast %167 : vector<16x17x128xf32> to vector<8x2x17x128xf32>
    %169 = vector.extract_strided_slice %166 {offsets = [0, 0, 0, 0], sizes = [8, 1, 17, 128], strides = [1, 1, 1, 1]} : vector<8x2x17x128xf32> to vector<8x1x17x128xf32>
    %170 = vector.shape_cast %169 : vector<8x1x17x128xf32> to vector<8x17x128xf32>
    %171 = vector.extract_strided_slice %166 {offsets = [0, 1, 0, 0], sizes = [8, 1, 17, 128], strides = [1, 1, 1, 1]} : vector<8x2x17x128xf32> to vector<8x1x17x128xf32>
    %172 = vector.shape_cast %171 : vector<8x1x17x128xf32> to vector<8x17x128xf32>
    %173 = arith.maximumf %170, %172 : vector<8x17x128xf32>
    %174 = vector.extract_strided_slice %168 {offsets = [0, 1, 0, 0], sizes = [8, 1, 17, 128], strides = [1, 1, 1, 1]} : vector<8x2x17x128xf32> to vector<8x1x17x128xf32>
    %175 = vector.shape_cast %174 : vector<8x1x17x128xf32> to vector<8x17x128xf32>
    %176 = arith.maximumf %173, %175 : vector<8x17x128xf32>
    %c0_239 = arith.constant 0 : index
    %c0_240 = arith.constant 0 : index
    %c0_241 = arith.constant 0 : index
    %177 = vector.load %arg12[%c0_239, %c0_240, %c0_241] : memref<8x17x128xf32, #tpu.memory_space<vmem>>, vector<8x17x128xf32>
    tpu.vector_store %arg12[%c0_239, %c0_240, %c0_241], %176 {strides = array<i32>} : memref<8x17x128xf32, #tpu.memory_space<vmem>>, vector<8x17x128xf32>,
    %c0_242 = arith.constant 0 : index
    %c0_243 = arith.constant 0 : index
    %c0_244 = arith.constant 0 : index
    %178 = tpu.strided_load %arg12[%c0_242, %c0_243, %c0_244] {strides = array<i32: 1, 2, 1>} : memref<8x17x128xf32, #tpu.memory_space<vmem>>, vector<8x8x128xf32>
    %c0_245 = arith.constant 0 : index
    %c1_246 = arith.constant 1 : index
    %c0_247 = arith.constant 0 : index
    %179 = tpu.strided_load %arg12[%c0_245, %c1_246, %c0_247] {strides = array<i32: 1, 2, 1>} : memref<8x17x128xf32, #tpu.memory_space<vmem>>, vector<8x8x128xf32>
    %c0_248 = arith.constant 0 : index
    %c2_249 = arith.constant 2 : index
    %c0_250 = arith.constant 0 : index
    %180 = tpu.strided_load %arg12[%c0_248, %c2_249, %c0_250] {strides = array<i32: 1, 2, 1>} : memref<8x17x128xf32, #tpu.memory_space<vmem>>, vector<8x8x128xf32>
    %181 = arith.maximumf %178, %179 : vector<8x8x128xf32>
    %182 = arith.maximumf %181, %180 : vector<8x8x128xf32>
    %c0_251 = arith.constant 0 : index
    %c1_252 = arith.constant 1 : index
    %c0_253 = arith.constant 0 : index
    %183 = tpu.strided_load %arg9[%c0_251, %c1_252, %c0_253] {strides = array<i32: 1, 2, 1>} : memref<18x18x128xf32, #tpu.memory_space<vmem>>, vector<18x8x128xf32>
    %184 = vector.extract_strided_slice %183 {offsets = [1, 0, 0], sizes = [16, 8, 128], strides = [1, 1, 1]} : vector<18x8x128xf32> to vector<16x8x128xf32>
    %185 = vector.shape_cast %184 : vector<16x8x128xf32> to vector<8x2x8x128xf32>
    %186 = vector.extract_strided_slice %185 {offsets = [0, 0, 0, 0], sizes = [8, 1, 8, 128], strides = [1, 1, 1, 1]} : vector<8x2x8x128xf32> to vector<8x1x8x128xf32>
    %187 = vector.shape_cast %186 : vector<8x1x8x128xf32> to vector<8x8x128xf32>
    %188 = vector.shape_cast %187 : vector<8x8x128xf32> to vector<64x128xf32>
    %c0_254 = arith.constant 0 : index
    %c0_255 = arith.constant 0 : index
    %189 = vector.load %arg6[%c0_254, %c0_255] : memref<128x128xf32, #tpu.memory_space<vmem>>, vector<128x128xf32>
    %cst_256 = arith.constant dense<0.000000e+00> : vector<64x128xf32>
    %190 = tpu.matmul %188, %189, %cst_256 {dimension_numbers = #tpu.dot_dimension_numbers<[1], [0], [0], [1], [0, 0, 1, 1], [], []>} : vector<64x128xf32>, vector<128x128xf32>, vector<64x128xf32> -> vector<64x128xf32>
    %c0_257 = arith.constant 0 : index
    %c0_258 = arith.constant 0 : index
    %191 = vector.load %arg7[%c0_257, %c0_258] : memref<1x128xf32, #tpu.memory_space<vmem>>, vector<1x128xf32>
    %192 = vector.broadcast %191 : vector<1x128xf32> to vector<64x128xf32>
    %193 = arith.addf %190, %192 : vector<64x128xf32>
    %194 = vector.shape_cast %193 : vector<64x128xf32> to vector<8x8x128xf32>
    %195 = arith.addf %182, %194 : vector<8x8x128xf32>
    %c0_259 = arith.constant 0 : index
    %c0_260 = arith.constant 0 : index
    %c0_261 = arith.constant 0 : index
    %c0_262 = arith.constant 0 : index
    %196 = vector.load %arg8[%c0_259, %c0_260, %c0_261, %c0_262] : memref<1x8x8x128xf32, #tpu.memory_space<vmem>>, vector<1x8x8x128xf32>
    %197 = vector.shape_cast %196 : vector<1x8x8x128xf32> to vector<8x8x128xf32>
    %198 = vector.shape_cast %195 : vector<8x8x128xf32> to vector<1x8x8x128xf32>
    tpu.vector_store %arg8[%c0_259, %c0_260, %c0_261, %c0_262], %198 {strides = array<i32>} : memref<1x8x8x128xf32, #tpu.memory_space<vmem>>, vector<1x8x8x128xf32>,
    return
  }
  func.func @transform_0(%arg0: i32) -> (i32, i32, i32, i32) {
    %c0_i32 = arith.constant 0 : i32
    %c0_i32_0 = arith.constant 0 : i32
    %c0_i32_1 = arith.constant 0 : i32
    %c0_i32_2 = arith.constant 0 : i32
    return %arg0, %c0_i32, %c0_i32_0, %c0_i32_1 : i32, i32, i32, i32
  }
  func.func @transform_1(%arg0: i32) -> (i32, i32) {
    %c0_i32 = arith.constant 0 : i32
    %c0_i32_0 = arith.constant 0 : i32
    %c0_i32_1 = arith.constant 0 : i32
    return %c0_i32, %c0_i32_0 : i32, i32
  }
  func.func @transform_2(%arg0: i32) -> (i32, i32) {
    %c0_i32 = arith.constant 0 : i32
    %c0_i32_0 = arith.constant 0 : i32
    %c0_i32_1 = arith.constant 0 : i32
    return %c0_i32, %c0_i32_0 : i32, i32
  }
  func.func @transform_3(%arg0: i32) -> (i32, i32) {
    %c0_i32 = arith.constant 0 : i32
    %c0_i32_0 = arith.constant 0 : i32
    %c0_i32_1 = arith.constant 0 : i32
    return %c0_i32, %c0_i32_0 : i32, i32
  }
  func.func @transform_4(%arg0: i32) -> (i32, i32) {
    %c0_i32 = arith.constant 0 : i32
    %c0_i32_0 = arith.constant 0 : i32
    %c0_i32_1 = arith.constant 0 : i32
    return %c0_i32, %c0_i32_0 : i32, i32
  }
  func.func @transform_5(%arg0: i32) -> (i32, i32) {
    %c0_i32 = arith.constant 0 : i32
    %c0_i32_0 = arith.constant 0 : i32
    %c0_i32_1 = arith.constant 0 : i32
    return %c0_i32, %c0_i32_0 : i32, i32
  }
  func.func @transform_6(%arg0: i32) -> (i32, i32) {
    %c0_i32 = arith.constant 0 : i32
    %c0_i32_0 = arith.constant 0 : i32
    %c0_i32_1 = arith.constant 0 : i32
    return %c0_i32, %c0_i32_0 : i32, i32
  }
  func.func @transform_7(%arg0: i32) -> (i32, i32, i32, i32) {
    %c0_i32 = arith.constant 0 : i32
    %c0_i32_0 = arith.constant 0 : i32
    %c0_i32_1 = arith.constant 0 : i32
    %c0_i32_2 = arith.constant 0 : i32
    return %arg0, %c0_i32, %c0_i32_0, %c0_i32_1 : i32, i32, i32, i32
  }
}

</mosaic_0001>

<bundles_post_ra>
// kernel: xception_block.1
= control target key start
LH: loop header
LB: loop body
LE: loop exit
PB: predicated region body
PF: predicated region fallthrough
CT: control target
= control target key end

     0   :  { %s11408_s24 = smov 0   ;;  %s13537_s0 = inlined_call_operand.vmem [shape: f32[2,16,16,128], index: 0, kind: input, shape index: {}]   ;;  %s13538_s1 = inlined_call_operand.vmem [shape: f32[1152,128], index: 1, kind: input, shape index: {}]   ;;  %s13539_s2 = inlined_call_operand.vmem [shape: f32[1,128], index: 2, kind: input, shape index: {}]   ;;  %s13540_s3 = inlined_call_operand.vmem [shape: f32[1152,128], index: 3, kind: input, shape index: {}]   ;;  %s13541_s4 = inlined_call_operand.vmem [shape: f32[1,128], index: 4, kind: input, shape index: {}]   ;;  %s13542_s5 = inlined_call_operand.vmem [shape: f32[128,128], index: 5, kind: input, shape index: {}]   ;;  %s13543_s6 = inlined_call_operand.vmem [shape: f32[1,128], index: 6, kind: input, shape index: {}]   ;;  %s13544_s7 = inlined_call_operand.vmem [shape: f32[2,8,8,128], index: 7, kind: output, shape index: {}]  }
   0x1 LB: > { %s7756_s25 = sadd.s32 4294967295, %s11364_s24   ;;  %p7760_p0 = scmp.ge.s32.totalorder %s11364_s24, 1  ;;  %s11364_s24 = sphi %s11408_s24, %s17_s24  }
   0x2   : > { %p237_p1 = scmp.lt.s32.totalorder %s11364_s24, 3 }
   0x4   : > { %p238_p2 = pnand %p7760_p0, %p237_p1 }
   0x6   : > { %241 = sbr.rel (%p238_p2) target bundleno = 1608 (0x648), region = 48 }
   0xd   : > { %v553_v0 = vld [vmem:[%s13538_s1] sm:$0xff]  ;;  %v554_v1 = vld [vmem:[%s13538_s1 + $0x8] sm:$0xff]  ;;  %v11425_v2 = vld [vmem:[%s13538_s1 + $0x10] sm:$0xff]  ;;  %p11429_p3 = scmp.lt.s32.totalorder %s7756_s25, 1  ;;  %v11366_v5 = vmov 0.0  }
   0xe   : > { %v11433_v3 = vpack.c.bf16 %v554_v1, %v553_v0  ;;  %v11438_v4 = vld [vmem:[%s13538_s1 + $0x18] sm:$0xff]  ;;  %279 = vst [vmem:[#allocation2] sm:$0xff] %v11366_v5  ;;  %280 = vst [vmem:[#allocation2 + $0x8] sm:$0xff] %v11366_v5  ;;  %v557_v7 = vld [vmem:[%s13538_s1 + $0x20] sm:$0xff] }
   0xf   : > { %281 = vst [vmem:[#allocation2 + $0x10] sm:$0x3] %v11366_v5  ;;  %283 = vst [vmem:[#allocation2 + $0x198] sm:$0xff] %v11366_v5  ;;  %v10148_v6 = vpack.c.bf16 %v11438_v4, %v11425_v2  ;;  %v558_v8 = vld [vmem:[%s13538_s1 + $0x28] sm:$0xff]  ;;  %s13750_s25 = smov (!%p11429_p3, %s7756_s25), 1  ;;  %v559_v10 = vld [vmem:[%s13538_s1 + $0x30] sm:$0xff] }
  0x10   : > { %284 = vst [vmem:[#allocation2 + $0x1a0] sm:$0xff] %v11366_v5  ;;  %285 = vst [vmem:[#allocation2 + $0x1a8] sm:$0x3] %v11366_v5  ;;  %10145 = vmatprep.subr.bf16.mxu0 %v11433_v3  ;;  %s7770_s16 = sshll.u32 %s13750_s25, 8  ;;  %v10152_v9 = vpack.c.bf16 %v558_v8, %v557_v7  ;;  %v560_v11 = vld [vmem:[%s13538_s1 + $0x38] sm:$0xff]  ;;  %v561_v20 = vld [vmem:[%s13538_s1 + $0x40] sm:$0xff] }
  0x11   : > { %287 = vst [vmem:[#allocation2 + $0x18] sm:$0x1] %v11366_v5  ;;  %288 = vst [vmem:[#allocation2 + $0x30] sm:$0x1] %v11366_v5  ;;  %10147 = vmatpush3.bf16.msra.mxu0 %v11433_v3  ;;  %s11550_s23 = scalar_lea.vmem %s13537_s0, %s7770_s16  ;;  %v10156_v19 = vpack.c.bf16 %v560_v11, %v559_v10  ;;  %v562_v23 = vld [vmem:[%s13538_s1 + $0x48] sm:$0xff]  ;;  %v563_v33 = vld [vmem:[%s13538_s1 + $0x50] sm:$0xff] }
  0x12   : > { %289 = vst [vmem:[#allocation2 + $0x48] sm:$0x1] %v11366_v5  ;;  %290 = vst [vmem:[#allocation2 + $0x60] sm:$0x1] %v11366_v5  ;;  %10149 = vmatprep.subr.bf16.mxu0 %v10148_v6  ;;  %v11553_v12 = vld [vmem:[%s11550_s23] sm:$0xff]  ;;  %v11556_v13 = vld [vmem:[%s11550_s23 + $0x8] sm:$0xff]  ;;  %v10160_v30 = vpack.c.bf16 %v562_v23, %v561_v20 }
  0x13   : > { %291 = vst [vmem:[#allocation2 + $0x78] sm:$0x1] %v11366_v5  ;;  %292 = vst [vmem:[#allocation2 + $0x90] sm:$0x1] %v11366_v5  ;;  %v11559_v14 = vld [vmem:[%s11550_s23 + $0x10] sm:$0xff]  ;;  %v11565_v15 = vld [vmem:[%s11550_s23 + $0x18] sm:$0xff] }
  0x14   : > { %293 = vst [vmem:[#allocation2 + $0xa8] sm:$0x1] %v11366_v5  ;;  %294 = vst [vmem:[#allocation2 + $0xc0] sm:$0x1] %v11366_v5  ;;  %v11569_v16 = vld [vmem:[%s11550_s23 + $0x20] sm:$0xff]  ;;  %v11572_v17 = vld [vmem:[%s11550_s23 + $0x28] sm:$0xff] }
  0x15   : > { %295 = vst [vmem:[#allocation2 + $0xd8] sm:$0x1] %v11366_v5  ;;  %296 = vst [vmem:[#allocation2 + $0xf0] sm:$0x1] %v11366_v5  ;;  %10151 = vmatpush3.bf16.msra.mxu0 %v10148_v6  ;;  %v11575_v18 = vld [vmem:[%s11550_s23 + $0x30] sm:$0xff]  ;;  %v11584_v22 = vld [vmem:[%s11550_s23 + $0x38] sm:$0xff] }
  0x16   : > { %297 = vst [vmem:[#allocation2 + $0x108] sm:$0x1] %v11366_v5  ;;  %298 = vst [vmem:[#allocation2 + $0x120] sm:$0x1] %v11366_v5  ;;  %10153 = vmatprep.subr.bf16.mxu0 %v10152_v9  ;;  %v11591_v24 = vld [vmem:[%s11550_s23 + $0x40] sm:$0xff]  ;;  %v11594_v25 = vld [vmem:[%s11550_s23 + $0x48] sm:$0xff] }
  0x17   : > { %299 = vst [vmem:[#allocation2 + $0x138] sm:$0x1] %v11366_v5  ;;  %300 = vst [vmem:[#allocation2 + $0x150] sm:$0x1] %v11366_v5  ;;  %v11599_v26 = vld [vmem:[%s11550_s23 + $0x50] sm:$0xff]  ;;  %v11602_v27 = vld [vmem:[%s11550_s23 + $0x58] sm:$0xff] }
  0x18   : > { %301 = vst [vmem:[#allocation2 + $0x168] sm:$0x1] %v11366_v5  ;;  %302 = vst [vmem:[#allocation2 + $0x180] sm:$0x1] %v11366_v5  ;;  %v11607_v28 = vld [vmem:[%s11550_s23 + $0x60] sm:$0xff]  ;;  %v11610_v29 = vld [vmem:[%s11550_s23 + $0x68] sm:$0xff] }
  0x19   : > { %305 = vst [vmem:[#allocation2 + $0x29] sm:$0x1] %v11366_v5  ;;  %306 = vst [vmem:[#allocation2 + $0x41] sm:$0x1] %v11366_v5  ;;  %10155 = vmatpush3.bf16.msra.mxu0 %v10152_v9  ;;  %v11615_v31 = vld [vmem:[%s11550_s23 + $0x70] sm:$0xff]  ;;  %v11618_v32 = vld [vmem:[%s11550_s23 + $0x78] sm:$0xff] }
  0x1a   : > { %307 = vst [vmem:[#allocation2 + $0x59] sm:$0x1] %v11366_v5  ;;  %308 = vst [vmem:[#allocation2 + $0x71] sm:$0x1] %v11366_v5  ;;  %10157 = vmatprep.subr.bf16.mxu0 %v10156_v19  ;;  %v564_v34 = vld [vmem:[%s13538_s1 + $0x58] sm:$0xff]  ;;  %v11629_v35 = vld [vmem:[%s11550_s23 + $0x80] sm:$0xff] }
  0x1b   : > { %309 = vst [vmem:[#allocation2 + $0x89] sm:$0x1] %v11366_v5  ;;  %310 = vst [vmem:[#allocation2 + $0xa1] sm:$0x1] %v11366_v5  ;;  %v10164_v36 = vpack.c.bf16 %v564_v34, %v563_v33  ;;  %v11633_v37 = vld [vmem:[%s11550_s23 + $0x88] sm:$0xff]  ;;  %v11636_v38 = vld [vmem:[%s11550_s23 + $0x90] sm:$0xff] }
  0x1c   : > { %311 = vst [vmem:[#allocation2 + $0xb9] sm:$0x1] %v11366_v5  ;;  %312 = vst [vmem:[#allocation2 + $0xd1] sm:$0x1] %v11366_v5  ;;  %v565_v39 = vld [vmem:[%s13538_s1 + $0x60] sm:$0xff]  ;;  %v566_v40 = vld [vmem:[%s13538_s1 + $0x68] sm:$0xff] }
  0x1d   : > { %313 = vst [vmem:[#allocation2 + $0xe9] sm:$0x1] %v11366_v5  ;;  %314 = vst [vmem:[#allocation2 + $0x101] sm:$0x1] %v11366_v5  ;;  %10159 = vmatpush3.bf16.msra.mxu0 %v10156_v19  ;;  %v11647_v41 = vld [vmem:[%s11550_s23 + $0x98] sm:$0xff]  ;;  %v10168_v42 = vpack.c.bf16 %v566_v40, %v565_v39  ;;  %v567_v43 = vld [vmem:[%s13538_s1 + $0x70] sm:$0xff] }
  0x1e   : > { %315 = vst [vmem:[#allocation2 + $0x119] sm:$0x1] %v11366_v5  ;;  %316 = vst [vmem:[#allocation2 + $0x131] sm:$0x1] %v11366_v5  ;;  %10161 = vmatprep.subr.bf16.mxu0 %v10160_v30  ;;  %v568_v44 = vld [vmem:[%s13538_s1 + $0x78] sm:$0xff]  ;;  %v11657_v45 = vld [vmem:[%s11550_s23 + $0xa0] sm:$0xff] }
  0x1f   : > { %317 = vst [vmem:[#allocation2 + $0x149] sm:$0x1] %v11366_v5  ;;  %318 = vst [vmem:[#allocation2 + $0x161] sm:$0x1] %v11366_v5  ;;  %v11661_v46 = vld [vmem:[%s11550_s23 + $0xa8] sm:$0xff]  ;;  %v11664_v47 = vld [vmem:[%s11550_s23 + $0xb0] sm:$0xff]  ;;  %v10172_v52 = vpack.c.bf16 %v568_v44, %v567_v43 }
  0x20   : > { %319 = vst [vmem:[#allocation2 + $0x179] sm:$0x1] %v11366_v5  ;;  %320 = vst [vmem:[#allocation2 + $0x191] sm:$0x1] %v11366_v5  ;;  %v11667_v48 = vld [vmem:[%s11550_s23 + $0xb8] sm:$0xff]  ;;  %v11673_v49 = vld [vmem:[%s11550_s23 + $0xc0] sm:$0xff] }
  0x21   : > { %322 = vst [vmem:[#allocation3] sm:$0xff] %v11366_v5  ;;  %323 = vst [vmem:[#allocation3 + $0x8] sm:$0xff] %v11366_v5  ;;  %10163 = vmatpush3.bf16.msra.mxu0 %v10160_v30  ;;  %v11676_v50 = vld [vmem:[%s11550_s23 + $0xc8] sm:$0xff]  ;;  %v11679_v51 = vld [vmem:[%s11550_s23 + $0xd0] sm:$0xff]  ;;  %s7771_s16 = sshll.u32 %s13750_s25, 6 }
  0x22   : > { %324 = vst [vmem:[#allocation3 + $0x10] sm:$0x3] %v11366_v5  ;;  %326 = vst [vmem:[#allocation3 + $0x198] sm:$0xff] %v11366_v5  ;;  %10165 = vmatprep.subr.bf16.mxu0 %v10164_v36  ;;  %v11685_v53 = vld [vmem:[%s11550_s23 + $0xd8] sm:$0xff]  ;;  %v922_v54 = vld [vmem:[%s13538_s1 + $0x80] sm:$0xff]  ;;  %s13496_s19 = scalar_lea.vmem %s13544_s7, %s7771_s16 }
  0x23   : > { %327 = vst [vmem:[#allocation3 + $0x1a0] sm:$0xff] %v11366_v5  ;;  %328 = vst [vmem:[#allocation3 + $0x1a8] sm:$0x3] %v11366_v5  ;;  %v923_v55 = vld [vmem:[%s13538_s1 + $0x88] sm:$0xff]  ;;  %v11695_v56 = vld [vmem:[%s11550_s23 + $0xe0] sm:$0xff] }
  0x24   : > { %330 = vst [vmem:[#allocation3 + $0x18] sm:$0x1] %v11366_v5  ;;  %331 = vst [vmem:[#allocation3 + $0x30] sm:$0x1] %v11366_v5  ;;  %v11698_v57 = vld [vmem:[%s11550_s23 + $0xe8] sm:$0xff]  ;;  %v10176_v58 = vpack.c.bf16 %v923_v55, %v922_v54  ;;  %v924_v59 = vld [vmem:[%s13538_s1 + $0x90] sm:$0xff] }
  0x25   : > { %332 = vst [vmem:[#allocation3 + $0x48] sm:$0x1] %v11366_v5  ;;  %333 = vst [vmem:[#allocation3 + $0x60] sm:$0x1] %v11366_v5  ;;  %10167 = vmatpush3.bf16.msra.mxu0 %v10164_v36  ;;  %v925_v60 = vld [vmem:[%s13538_s1 + $0x98] sm:$0xff]  ;;  %v926_v63 = vld [vmem:[%s13538_s1 + $0xa0] sm:$0xff] }
  0x26   : > { %334 = vst [vmem:[#allocation3 + $0x78] sm:$0x1] %v11366_v5  ;;  %335 = vst [vmem:[#allocation3 + $0x90] sm:$0x1] %v11366_v5  ;;  %10169 = vmatprep.subr.bf16.mxu0 %v10168_v42  ;;  %v10180_v62 = vpack.c.bf16 %v925_v60, %v924_v59  ;;  %v927_v0 = vld [vmem:[%s13538_s1 + $0xa8] sm:$0xff]  ;;  %v928_v4 = vld [vmem:[%s13538_s1 + $0xb0] sm:$0xff] }
  0x27   : > { %336 = vst [vmem:[#allocation3 + $0xa8] sm:$0x1] %v11366_v5  ;;  %337 = vst [vmem:[#allocation3 + $0xc0] sm:$0x1] %v11366_v5  ;;  %v10184_v3 = vpack.c.bf16 %v927_v0, %v926_v63  ;;  %v929_v6 = vld [vmem:[%s13538_s1 + $0xb8] sm:$0xff]  ;;  %v930_v9 = vld [vmem:[%s13538_s1 + $0xc0] sm:$0xff] }
  0x28   : > { %338 = vst [vmem:[#allocation3 + $0xd8] sm:$0x1] %v11366_v5  ;;  %339 = vst [vmem:[#allocation3 + $0xf0] sm:$0x1] %v11366_v5  ;;  %v10188_v8 = vpack.c.bf16 %v929_v6, %v928_v4  ;;  %v931_v10 = vld [vmem:[%s13538_s1 + $0xc8] sm:$0xff]  ;;  %v933_v23 = vld [vmem:[%s13538_s1 + $0xd8] sm:$0xff] }
  0x29   : > { %340 = vst [vmem:[#allocation3 + $0x108] sm:$0x1] %v11366_v5  ;;  %341 = vst [vmem:[#allocation3 + $0x120] sm:$0x1] %v11366_v5  ;;  %10171 = vmatpush3.bf16.msra.mxu0 %v10168_v42  ;;  %v10192_v20 = vpack.c.bf16 %v931_v10, %v930_v9  ;;  %v934_v36 = vld [vmem:[%s13538_s1 + $0xe0] sm:$0xff]  ;;  %v935_v39 = vld [vmem:[%s13538_s1 + $0xe8] sm:$0xff] }
  0x2a   : > { %342 = vst [vmem:[#allocation3 + $0x138] sm:$0x1] %v11366_v5  ;;  %343 = vst [vmem:[#allocation3 + $0x150] sm:$0x1] %v11366_v5  ;;  %10173 = vmatprep.subr.bf16.mxu0 %v10172_v52  ;;  %v10200_v43 = vpack.c.bf16 %v935_v39, %v934_v36  ;;  %v936_v44 = vld [vmem:[%s13538_s1 + $0xf0] sm:$0xff]  ;;  %v1291_v59 = vld [vmem:[%s13538_s1 + $0x100] sm:$0xff] }
  0x2b   : > { %344 = vst [vmem:[#allocation3 + $0x168] sm:$0x1] %v11366_v5  ;;  %345 = vst [vmem:[#allocation3 + $0x180] sm:$0x1] %v11366_v5  ;;  %v1292_v60 = vld [vmem:[%s13538_s1 + $0x108] sm:$0xff] }
  0x2c   : > { %348 = vst [vmem:[#allocation3 + $0x29] sm:$0x1] %v11366_v5  ;;  %349 = vst [vmem:[#allocation3 + $0x41] sm:$0x1] %v11366_v5  ;;  %v10208_v0 = vpack.c.bf16 %v1292_v60, %v1291_v59  ;;  %v1293_v59 = vld [vmem:[%s13538_s1 + $0x110] sm:$0xff]  ;;  %v1294_v60 = vld [vmem:[%s13538_s1 + $0x118] sm:$0xff] }
  0x2d   : > { %350 = vst [vmem:[#allocation3 + $0x59] sm:$0x1] %v11366_v5  ;;  %351 = vst [vmem:[#allocation3 + $0x71] sm:$0x1] %v11366_v5  ;;  %10175 = vmatpush3.bf16.msra.mxu0 %v10172_v52  ;;  %v937_v52 = vld [vmem:[%s13538_s1 + $0xf8] sm:$0xff] }
  0x2e   : > { %352 = vst [vmem:[#allocation3 + $0x89] sm:$0x1] %v11366_v5  ;;  %353 = vst [vmem:[#allocation3 + $0xa1] sm:$0x1] %v11366_v5  ;;  %10177 = vmatprep.subr.bf16.mxu0 %v10176_v58 }
  0x2f   : > { %354 = vst [vmem:[#allocation3 + $0xb9] sm:$0x1] %v11366_v5  ;;  %355 = vst [vmem:[#allocation3 + $0xd1] sm:$0x1] %v11366_v5 }
  0x30   : > { %356 = vst [vmem:[#allocation3 + $0xe9] sm:$0x1] %v11366_v5  ;;  %357 = vst [vmem:[#allocation3 + $0x101] sm:$0x1] %v11366_v5 }
  0x31   : > { %358 = vst [vmem:[#allocation3 + $0x119] sm:$0x1] %v11366_v5  ;;  %359 = vst [vmem:[#allocation3 + $0x131] sm:$0x1] %v11366_v5 }
  0x32   : > { %360 = vst [vmem:[#allocation3 + $0x149] sm:$0x1] %v11366_v5  ;;  %361 = vst [vmem:[#allocation3 + $0x161] sm:$0x1] %v11366_v5 }
  0x33   : > { %362 = vst [vmem:[#allocation3 + $0x179] sm:$0x1] %v11366_v5  ;;  %363 = vst [vmem:[#allocation3 + $0x191] sm:$0x1] %v11366_v5 }
  0x34   : > { %286 = vst [vmem:[#allocation2] sm:$0x1] %v11366_v5  ;;  %303 = vst [vmem:[#allocation2 + $0x198] sm:$0x1] %v11366_v5 }
  0x35   : > { %304 = vst [vmem:[#allocation2 + $0x11] sm:$0x1] %v11366_v5  ;;  %321 = vst [vmem:[#allocation2 + $0x1a9] sm:$0x1] %v11366_v5 }
  0x36   : > { %329 = vst [vmem:[#allocation3] sm:$0x1] %v11366_v5  ;;  %346 = vst [vmem:[#allocation3 + $0x198] sm:$0x1] %v11366_v5 }
  0x37   : > { %347 = vst [vmem:[#allocation3 + $0x11] sm:$0x1] %v11366_v5  ;;  %364 = vst [vmem:[#allocation3 + $0x1a9] sm:$0x1] %v11366_v5 }
  0x38   : > { %418 = vst [vmem:[#allocation2 + $0x19] sm:$0xff] %v11553_v12  ;;  %419 = vst [vmem:[#allocation2 + $0x21] sm:$0xff] %v11556_v13 }
  0x39   : > { %420 = vst [vmem:[#allocation2 + $0x31] sm:$0xff] %v11559_v14  ;;  %421 = vst [vmem:[#allocation2 + $0x39] sm:$0xff] %v11565_v15 }
  0x3a   : > { %422 = vst [vmem:[#allocation2 + $0x49] sm:$0xff] %v11569_v16  ;;  %423 = vst [vmem:[#allocation2 + $0x51] sm:$0xff] %v11572_v17 }
  0x3b   : > { %v489_v21 = vld [vmem:[#allocation2] sm:$0xff]  ;;  %424 = vst [vmem:[#allocation2 + $0x61] sm:$0xff] %v11575_v18  ;;  %425 = vst [vmem:[#allocation2 + $0x69] sm:$0xff] %v11584_v22 }
  0x3c   : > { %8692 = vmatprep.mubr.f32.mxu0 %v489_v21  ;;  %426 = vst [vmem:[#allocation2 + $0x79] sm:$0xff] %v11591_v24  ;;  %427 = vst [vmem:[#allocation2 + $0x81] sm:$0xff] %v11594_v25  ;;  %v932_v21 = vld [vmem:[%s13538_s1 + $0xd0] sm:$0xff] }
  0x3d   : > { %428 = vst [vmem:[#allocation2 + $0x91] sm:$0xff] %v11599_v26  ;;  %429 = vst [vmem:[#allocation2 + $0x99] sm:$0xff] %v11602_v27  ;;  %8693 = vmatmul.mubr.f32.vlgmr.msra.gmra.mrb[0].mxu0 %v11366_v5  ;;  %v10196_v34 = vpack.c.bf16 %v933_v23, %v932_v21 }
  0x3e   : > { %430 = vst [vmem:[#allocation2 + $0xa9] sm:$0xff] %v11607_v28  ;;  %431 = vst [vmem:[#allocation2 + $0xb1] sm:$0xff] %v11610_v29  ;;  %10179 = vmatpush3.bf16.msra.mxu0 %v10176_v58  ;;  %v10204_v58 = vpack.c.bf16 %v937_v52, %v936_v44 }
  0x3f   : > { %432 = vst [vmem:[#allocation2 + $0xc1] sm:$0xff] %v11615_v31  ;;  %433 = vst [vmem:[#allocation2 + $0xc9] sm:$0xff] %v11618_v32  ;;  %v11708_v61 = vld [vmem:[#allocation2 + $0x18] sm:$0xff]  ;;  %v11718_v1 = vld [vmem:[#allocation2 + $0x20] sm:$0xff]  ;;  %10181 = vmatprep.subr.bf16.mxu0 %v10180_v62 }
  0x40   : > { %434 = vst [vmem:[#allocation2 + $0xd9] sm:$0xff] %v11629_v35  ;;  %435 = vst [vmem:[#allocation2 + $0xe1] sm:$0xff] %v11633_v37  ;;  %8695 = vmatprep.mubr.f32.mxu0 %v11708_v61  ;;  %v11720_v2 = vld [vmem:[#allocation2 + $0x30] sm:$0xff]  ;;  %v11730_v5 = vld [vmem:[#allocation2 + $0x38] sm:$0xff] }
  0x41   : > { %436 = vst [vmem:[#allocation2 + $0xf1] sm:$0xff] %v11636_v38  ;;  %437 = vst [vmem:[#allocation2 + $0xf9] sm:$0xff] %v11647_v41  ;;  %8696 = vmatmul.mubr.f32.gmra.mrb[2].mxu0 %v11718_v1  ;;  %v11732_v7 = vld [vmem:[#allocation2 + $0x48] sm:$0xff]  ;;  %v11742_v11 = vld [vmem:[#allocation2 + $0x50] sm:$0xff] }
  0x42   : > { %438 = vst [vmem:[#allocation2 + $0x109] sm:$0xff] %v11657_v45  ;;  %439 = vst [vmem:[#allocation2 + $0x111] sm:$0xff] %v11661_v46  ;;  %8698 = vmatprep.mubr.f32.mxu0 %v11720_v2  ;;  %10183 = vmatpush3.bf16.msra.mxu0 %v10180_v62  ;;  %v11744_v19 = vld [vmem:[#allocation2 + $0x60] sm:$0xff]  ;;  %v11754_v30 = vld [vmem:[#allocation2 + $0x68] sm:$0xff] }
  0x43   : > { %440 = vst [vmem:[#allocation2 + $0x121] sm:$0xff] %v11664_v47  ;;  %441 = vst [vmem:[#allocation2 + $0x129] sm:$0xff] %v11667_v48  ;;  %10185 = vmatprep.subr.bf16.mxu0 %v10184_v3  ;;  %v11756_v33 = vld [vmem:[#allocation2 + $0x78] sm:$0xff]  ;;  %v11766_v40 = vld [vmem:[#allocation2 + $0x80] sm:$0xff] }
  0x44   : > { %442 = vst [vmem:[#allocation2 + $0x139] sm:$0xff] %v11673_v49  ;;  %443 = vst [vmem:[#allocation2 + $0x141] sm:$0xff] %v11676_v50  ;;  %v11768_v42 = vld [vmem:[#allocation2 + $0x90] sm:$0xff]  ;;  %v11778_v54 = vld [vmem:[#allocation2 + $0x98] sm:$0xff] }
  0x45   : > { %444 = vst [vmem:[#allocation2 + $0x151] sm:$0xff] %v11679_v51  ;;  %445 = vst [vmem:[#allocation2 + $0x159] sm:$0xff] %v11685_v53  ;;  %8699 = vmatmul.mubr.f32.gmra.mrb[4].mxu0 %v11730_v5  ;;  %v11780_v55 = vld [vmem:[#allocation2 + $0xa8] sm:$0xff]  ;;  %v11790_v62 = vld [vmem:[#allocation2 + $0xb0] sm:$0xff] }
  0x46   : > { %13618 = vst [vmem:[#allocation7_spill] sm:$0xff] %v11695_v56  ;;  %13619 = vst [vmem:[#allocation8_spill] sm:$0xff] %v11698_v57  ;;  %8701 = vmatprep.mubr.f32.mxu0 %v11732_v7  ;;  %10187 = vmatpush3.bf16.msra.mxu0 %v10184_v3  ;;  %v11792_v63 = vld [vmem:[#allocation2 + $0xc0] sm:$0xff]  ;;  %v11796_v3 = vld [vmem:[#allocation2 + $0xc8] sm:$0xff] }
  0x47   : > { %446 = vst [vmem:[#allocation2 + $0x169] sm:$0xff] %v11695_v56  ;;  %447 = vst [vmem:[#allocation2 + $0x171] sm:$0xff] %v11698_v57  ;;  %10189 = vmatprep.subr.bf16.mxu0 %v10188_v8  ;;  %v11798_v4 = vld [vmem:[#allocation2 + $0xd8] sm:$0xff]  ;;  %v11802_v6 = vld [vmem:[#allocation2 + $0xe0] sm:$0xff] }
  0x48   : > { %v11808_v9 = vld [vmem:[#allocation2 + $0xf8] sm:$0xff] }
  0x49   : > { %8702 = vmatmul.mubr.f32.gmra.mrb[6].mxu0 %v11742_v11  ;;  %v11810_v10 = vld [vmem:[#allocation2 + $0x108] sm:$0xff] }
  0x4a   : > { %8704 = vmatprep.mubr.f32.mxu0 %v11744_v19  ;;  %10191 = vmatpush3.bf16.msra.mxu0 %v10188_v8  ;;  %v11804_v8 = vld [vmem:[#allocation2 + $0xf0] sm:$0xff]  ;;  %v11816_v21 = vld [vmem:[#allocation2 + $0x120] sm:$0xff]  ;;  %v11820_v23 = vld [vmem:[#allocation2 + $0x128] sm:$0xff] }
  0x4b   : > { %10193 = vmatprep.subr.bf16.mxu0 %v10192_v20  ;;  %v11826_v36 = vld [vmem:[#allocation2 + $0x140] sm:$0xff] }
  0x4c   : > { %13621 = vst [vmem:[#allocation10_spill] sm:$0xff] %v11826_v36  ;;  %v11828_v39 = vld [vmem:[#allocation2 + $0x150] sm:$0xff] }
  0x4d   : > { %8705 = vmatmul.mubr.f32.gmra.mrb[8].mxu0 %v11754_v30  ;;  %13622 = vst [vmem:[#allocation11_spill] sm:$0xff] %v11828_v39 }
  0x4e   : > { %8707 = vmatprep.mubr.f32.mxu0 %v11756_v33  ;;  %10195 = vmatpush3.bf16.msra.mxu0 %v10192_v20  ;;  %v11814_v20 = vld [vmem:[#allocation2 + $0x110] sm:$0xff]  ;;  %v11834_v44 = vld [vmem:[#allocation2 + $0x168] sm:$0xff] }
  0x4f   : > { %10197 = vmatprep.subr.bf16.mxu0 %v10196_v34  ;;  %13624 = vst [vmem:[#allocation13_spill] sm:$0xff] %v11834_v44  ;;  %v11838_v52 = vld [vmem:[#allocation2 + $0x170] sm:$0xff] }
  0x51   : > { %8708 = vmatmul.mubr.f32.gmra.mrb[10].mxu0 %v11766_v40 }
  0x52   : > { %8710 = vmatprep.mubr.f32.mxu0 %v11768_v42  ;;  %10199 = vmatpush3.bf16.msra.mxu0 %v10196_v34  ;;  %v11822_v34 = vld [vmem:[#allocation2 + $0x138] sm:$0xff] }
  0x53   : > { %10201 = vmatprep.subr.bf16.mxu0 %v10200_v43  ;;  %13620 = vst [vmem:[#allocation9_spill] sm:$0xff] %v11822_v34 }
  0x55   : > { %8711 = vmatmul.mubr.f32.gmra.mrb[12].mxu0 %v11778_v54 }
  0x56   : > { %8713 = vmatprep.mubr.f32.mxu0 %v11780_v55  ;;  %10203 = vmatpush3.bf16.msra.mxu0 %v10200_v43  ;;  %v11832_v43 = vld [vmem:[#allocation2 + $0x158] sm:$0xff] }
  0x57   : > { %10205 = vmatprep.subr.bf16.mxu0 %v10204_v58  ;;  %13623 = vst [vmem:[#allocation12_spill] sm:$0xff] %v11832_v43 }
  0x59   : > { %8714 = vmatmul.mubr.f32.gmra.mrb[14].mxu0 %v11790_v62 }
  0x5a   : > { %8716 = vmatprep.mubr.f32.mxu0 %v11792_v63  ;;  %10207 = vmatpush3.bf16.msra.mxu0 %v10204_v58  ;;  %v858_v58 = vld [vmem:[#allocation2 + $0x1] sm:$0xff] }
  0x5b   : > { %10209 = vmatprep.subr.bf16.mxu0 %v10208_v0 }
  0x5d   : > { %8717 = vmatmul.mubr.f32.gmra.mrb[16].mxu0 %v11796_v3 }
  0x5e   : > { %8719 = vmatprep.mubr.f32.mxu0 %v11798_v4 }
  0x61   : > { %8720 = vmatmul.mubr.f32.gmra.mrb[18].mxu0 %v11802_v6 }
  0x62   : > { %8722 = vmatprep.mubr.f32.mxu0 %v11804_v8 }
  0x65   : > { %8723 = vmatmul.mubr.f32.gmra.mrb[20].mxu0 %v11808_v9 }
  0x66   : > { %8725 = vmatprep.mubr.f32.mxu0 %v11810_v10 }
  0x69   : > { %8726 = vmatmul.mubr.f32.gmra.mrb[22].mxu0 %v11814_v20 }
  0x6a   : > { %8728 = vmatprep.mubr.f32.mxu0 %v11816_v21 }
  0x6d   : > { %8729 = vmatmul.mubr.f32.gmra.mrb[24].mxu0 %v11820_v23 }
  0x6e   : > { %8731 = vmatprep.mubr.f32.mxu0 %v11822_v34 }
  0x71   : > { %8732 = vmatmul.mubr.f32.gmra.mrb[26].mxu0 %v11826_v36  ;;  %v10212_v36 = vpack.c.bf16 %v1294_v60, %v1293_v59  ;;  %v1298_v59 = vld [vmem:[%s13538_s1 + $0x138] sm:$0xff] }
  0x72   : > { %8734 = vmatprep.mubr.f32.mxu0 %v11828_v39  ;;  %v859_v39 = vld [vmem:[#allocation2 + $0x9] sm:$0xff]  ;;  %v1302_v60 = vld [vmem:[%s13538_s1 + $0x158] sm:$0xff] }
  0x75   : > { %8735 = vmatmul.mubr.f32.gmra.mrb[28].mxu0 %v11832_v43  ;;  %v1296_v43 = vld [vmem:[%s13538_s1 + $0x128] sm:$0xff] }
  0x76   : > { %8737 = vmatprep.mubr.f32.mxu0 %v11834_v44  ;;  %v1295_v44 = vld [vmem:[%s13538_s1 + $0x120] sm:$0xff] }
  0x77   : > { %v10216_v34 = vpack.c.bf16 %v1296_v43, %v1295_v44  ;;  %v1300_v43 = vld [vmem:[%s13538_s1 + $0x148] sm:$0xff] }
  0x79   : > { %8738 = vmatmul.mubr.f32.gmra.mrb[30].mxu0 %v11838_v52 }
  0x7a   : > { %8772 = vmatprep.mubr.f32.mxu0 %v858_v58  ;;  %v1297_v58 = vld [vmem:[%s13538_s1 + $0x130] sm:$0xff] }
  0x7d   : > { %8773 = vmatmul.mubr.f32.vlgmr.msra.gmra.mrb[0].mxu0 %v859_v39  ;;  %v10220_v39 = vpack.c.bf16 %v1298_v59, %v1297_v58  ;;  %v1304_v59 = vld [vmem:[%s13538_s1 + $0x168] sm:$0xff] }
  0x7e   : > { %10211 = vmatpush3.bf16.msra.mxu0 %v10208_v0  ;;  %8775 = vmatprep.mubr.f32.mxu0 %v11553_v12  ;;  %v1299_v0 = vld [vmem:[%s13538_s1 + $0x140] sm:$0xff] }
  0x7f   : > { %10213 = vmatprep.subr.bf16.mxu0 %v10212_v36  ;;  %v10224_v44 = vpack.c.bf16 %v1300_v43, %v1299_v0  ;;  %v1306_v43 = vld [vmem:[%s13538_s1 + $0x178] sm:$0xff] }
  0x81   : > { %8776 = vmatmul.mubr.f32.gmra.mrb[2].mxu0 %v11556_v13 }
  0x82   : > { %8778 = vmatprep.mubr.f32.mxu0 %v11559_v14  ;;  %10215 = vmatpush3.bf16.msra.mxu0 %v10212_v36  ;;  %v1301_v36 = vld [vmem:[%s13538_s1 + $0x150] sm:$0xff] }
  0x83   : > { %10217 = vmatprep.subr.bf16.mxu0 %v10216_v34  ;;  %v10228_v58 = vpack.c.bf16 %v1302_v60, %v1301_v36  ;;  %v1661_v60 = vld [vmem:[%s13538_s1 + $0x188] sm:$0xff] }
  0x85   : > { %8779 = vmatmul.mubr.f32.gmra.mrb[4].mxu0 %v11565_v15 }
  0x86   : > { %8781 = vmatprep.mubr.f32.mxu0 %v11569_v16  ;;  %10219 = vmatpush3.bf16.msra.mxu0 %v10216_v34  ;;  %v1303_v34 = vld [vmem:[%s13538_s1 + $0x160] sm:$0xff] }
  0x87   : > { %10221 = vmatprep.subr.bf16.mxu0 %v10220_v39  ;;  %v10232_v0 = vpack.c.bf16 %v1304_v59, %v1303_v34  ;;  %v11919_v59 = vld [vmem:[%s11550_s23 + $0xf8] sm:$0xff] }
  0x88   : > { %13626 = vst [vmem:[#allocation15_spill] sm:$0xff] %v11919_v59  ;;  %449 = vst [vmem:[#allocation2 + $0x189] sm:$0xff] %v11919_v59  ;;  %v1664_v59 = vld [vmem:[%s13538_s1 + $0x1a0] sm:$0xff] }
  0x89   : > { %8782 = vmatmul.mubr.f32.gmra.mrb[6].mxu0 %v11572_v17 }
  0x8a   : > { %8784 = vmatprep.mubr.f32.mxu0 %v11575_v18  ;;  %10223 = vmatpush3.bf16.msra.mxu0 %v10220_v39  ;;  %v1305_v39 = vld [vmem:[%s13538_s1 + $0x170] sm:$0xff] }
  0x8b   : > { %10225 = vmatprep.subr.bf16.mxu0 %v10224_v44  ;;  %v10236_v36 = vpack.c.bf16 %v1306_v43, %v1305_v39  ;;  %v1662_v39 = vld [vmem:[%s13538_s1 + $0x190] sm:$0xff]  ;;  %v1663_v43 = vld [vmem:[%s13538_s1 + $0x198] sm:$0xff] }
  0x8d   : > { %8785 = vmatmul.mubr.f32.gmra.mrb[8].mxu0 %v11584_v22 }
  0x8e   : > { %8787 = vmatprep.mubr.f32.mxu0 %v11591_v24  ;;  %10227 = vmatpush3.bf16.msra.mxu0 %v10224_v44  ;;  %v1660_v44 = vld [vmem:[%s13538_s1 + $0x180] sm:$0xff] }
  0x8f   : > { %10229 = vmatprep.subr.bf16.mxu0 %v10228_v58  ;;  %v10240_v34 = vpack.c.bf16 %v1661_v60, %v1660_v44  ;;  %v11933_v44 = vld [vmem:[#allocation2 + $0x1a] sm:$0xff]  ;;  %v10244_v60 = vpack.c.bf16 %v1663_v43, %v1662_v39  ;;  %v1666_v39 = vld [vmem:[%s13538_s1 + $0x1b0] sm:$0xff] }
  0x90   : > { %13627 = vst [vmem:[#allocation16_spill] sm:$0xff] %v11933_v44  ;;  %v1667_v43 = vld [vmem:[%s13538_s1 + $0x1b8] sm:$0xff] }
  0x91   : > { %8788 = vmatmul.mubr.f32.gmra.mrb[10].mxu0 %v11594_v25 }
  0x92   : > { %8790 = vmatprep.mubr.f32.mxu0 %v11599_v26  ;;  %10231 = vmatpush3.bf16.msra.mxu0 %v10228_v58  ;;  %v11915_v58 = vld [vmem:[%s11550_s23 + $0xf0] sm:$0xff] }
  0x93   : > { %10233 = vmatprep.subr.bf16.mxu0 %v10232_v0  ;;  %13625 = vst [vmem:[#allocation14_spill] sm:$0xff] %v11915_v58  ;;  %448 = vst [vmem:[#allocation2 + $0x181] sm:$0xff] %v11915_v58  ;;  %v1665_v58 = vld [vmem:[%s13538_s1 + $0x1a8] sm:$0xff] }
  0x95   : > { %8791 = vmatmul.mubr.f32.gmra.mrb[12].mxu0 %v11602_v27 }
  0x96   : > { %8793 = vmatprep.mubr.f32.mxu0 %v11607_v28  ;;  %10235 = vmatpush3.bf16.msra.mxu0 %v10232_v0  ;;  %v1227_v0 = vld [vmem:[#allocation2 + $0x2] sm:$0xff] }
  0x97   : > { %10237 = vmatprep.subr.bf16.mxu0 %v10236_v36 }
  0x99   : > { %8794 = vmatmul.mubr.f32.gmra.mrb[14].mxu0 %v11610_v29 }
  0x9a   : > { %8796 = vmatprep.mubr.f32.mxu0 %v11615_v31  ;;  %10239 = vmatpush3.bf16.msra.mxu0 %v10236_v36  ;;  %v1228_v36 = vld [vmem:[#allocation2 + $0xa] sm:$0xff] }
  0x9b   : > { %10241 = vmatprep.subr.bf16.mxu0 %v10240_v34 }
  0x9d   : > { %8797 = vmatmul.mubr.f32.gmra.mrb[16].mxu0 %v11618_v32 }
  0x9e   : > { %8799 = vmatprep.mubr.f32.mxu0 %v11629_v35 }
  0xa1   : > { %8800 = vmatmul.mubr.f32.gmra.mrb[18].mxu0 %v11633_v37 }
  0xa2   : > { %8802 = vmatprep.mubr.f32.mxu0 %v11636_v38 }
  0xa5   : > { %8803 = vmatmul.mubr.f32.gmra.mrb[20].mxu0 %v11647_v41 }
  0xa6   : > { %8805 = vmatprep.mubr.f32.mxu0 %v11657_v45 }
  0xa9   : > { %8806 = vmatmul.mubr.f32.gmra.mrb[22].mxu0 %v11661_v46 }
  0xaa   : > { %8808 = vmatprep.mubr.f32.mxu0 %v11664_v47 }
  0xad   : > { %8809 = vmatmul.mubr.f32.gmra.mrb[24].mxu0 %v11667_v48 }
  0xae   : > { %8811 = vmatprep.mubr.f32.mxu0 %v11673_v49 }
  0xb1   : > { %8812 = vmatmul.mubr.f32.gmra.mrb[26].mxu0 %v11676_v50 }
  0xb2   : > { %8814 = vmatprep.mubr.f32.mxu0 %v11679_v51 }
  0xb5   : > { %8815 = vmatmul.mubr.f32.gmra.mrb[28].mxu0 %v11685_v53 }
  0xb6   : > { %8817 = vmatprep.mubr.f32.mxu0 %v11695_v56  ;;  %v11942_v56 = vld [vmem:[#allocation2 + $0x22] sm:$0xff] }
  0xb7   : > { %13628 = vst [vmem:[#allocation17_spill] sm:$0xff] %v11942_v56 }
  0xb9   : > { %8818 = vmatmul.mubr.f32.gmra.mrb[30].mxu0 %v11698_v57  ;;  %v11944_v57 = vld [vmem:[#allocation2 + $0x32] sm:$0xff] }
  0xba   : > { %8852 = vmatprep.mubr.f32.mxu0 %v1227_v0  ;;  %13629 = vst [vmem:[#allocation18_spill] sm:$0xff] %v11944_v57  ;;  %v10248_v0 = vpack.c.bf16 %v1665_v58, %v1664_v59  ;;  %v1668_v58 = vld [vmem:[%s13538_s1 + $0x1c0] sm:$0xff]  ;;  %v1669_v59 = vld [vmem:[%s13538_s1 + $0x1c8] sm:$0xff] }
  0xbd   : > { %8853 = vmatmul.mubr.f32.vlgmr.msra.gmra.mrb[0].mxu0 %v1228_v36  ;;  %v11956_v36 = vld [vmem:[#allocation2 + $0x4a] sm:$0xff] }
  0xbe   : > { %10243 = vmatpush3.bf16.msra.mxu0 %v10240_v34  ;;  %8855 = vmatprep.mubr.f32.mxu0 %v11933_v44  ;;  %v11954_v34 = vld [vmem:[#allocation2 + $0x3a] sm:$0xff]  ;;  %13631 = vst [vmem:[#allocation20_spill] sm:$0xff] %v11956_v36  ;;  %v10252_v44 = vpack.c.bf16 %v1667_v43, %v1666_v39  ;;  %v1670_v39 = vld [vmem:[%s13538_s1 + $0x1d0] sm:$0xff] }
  0xbf   : > { %10245 = vmatprep.subr.bf16.mxu0 %v10244_v60  ;;  %13630 = vst [vmem:[#allocation19_spill] sm:$0xff] %v11954_v34  ;;  %v1671_v43 = vld [vmem:[%s13538_s1 + $0x1d8] sm:$0xff] }
  0xc1   : > { %8856 = vmatmul.mubr.f32.gmra.mrb[2].mxu0 %v11942_v56  ;;  %v10256_v56 = vpack.c.bf16 %v1669_v59, %v1668_v58  ;;  %v1672_v58 = vld [vmem:[%s13538_s1 + $0x1e0] sm:$0xff]  ;;  %v1673_v59 = vld [vmem:[%s13538_s1 + $0x1e8] sm:$0xff] }
  0xc2   : > { %8858 = vmatprep.mubr.f32.mxu0 %v11944_v57  ;;  %10247 = vmatpush3.bf16.msra.mxu0 %v10244_v60  ;;  %v11966_v57 = vld [vmem:[#allocation2 + $0x52] sm:$0xff]  ;;  %v11968_v60 = vld [vmem:[#allocation2 + $0x62] sm:$0xff] }
  0xc3   : > { %10249 = vmatprep.subr.bf16.mxu0 %v10248_v0  ;;  %13632 = vst [vmem:[#allocation21_spill] sm:$0xff] %v11966_v57  ;;  %13633 = vst [vmem:[#allocation22_spill] sm:$0xff] %v11968_v60 }
  0xc5   : > { %8859 = vmatmul.mubr.f32.gmra.mrb[4].mxu0 %v11954_v34  ;;  %v10260_v34 = vpack.c.bf16 %v1671_v43, %v1670_v39  ;;  %v1674_v39 = vld [vmem:[%s13538_s1 + $0x1f0] sm:$0xff]  ;;  %v1675_v43 = vld [vmem:[%s13538_s1 + $0x1f8] sm:$0xff] }
  0xc6   : > { %8861 = vmatprep.mubr.f32.mxu0 %v11956_v36  ;;  %10251 = vmatpush3.bf16.msra.mxu0 %v10248_v0  ;;  %v11978_v36 = vld [vmem:[#allocation2 + $0x6a] sm:$0xff]  ;;  %v11980_v0 = vld [vmem:[#allocation2 + $0x7a] sm:$0xff] }
  0xc7   : > { %10253 = vmatprep.subr.bf16.mxu0 %v10252_v44  ;;  %13634 = vst [vmem:[#allocation23_spill] sm:$0xff] %v11978_v36  ;;  %13635 = vst [vmem:[#allocation24_spill] sm:$0xff] %v11980_v0 }
  0xc9   : > { %8862 = vmatmul.mubr.f32.gmra.mrb[6].mxu0 %v11966_v57  ;;  %v10264_v57 = vpack.c.bf16 %v1673_v59, %v1672_v58  ;;  %v2029_v58 = vld [vmem:[%s13538_s1 + $0x200] sm:$0xff]  ;;  %v2030_v59 = vld [vmem:[%s13538_s1 + $0x208] sm:$0xff] }
  0xca   : > { %8864 = vmatprep.mubr.f32.mxu0 %v11968_v60  ;;  %10255 = vmatpush3.bf16.msra.mxu0 %v10252_v44  ;;  %v11990_v60 = vld [vmem:[#allocation2 + $0x82] sm:$0xff]  ;;  %v11992_v44 = vld [vmem:[#allocation2 + $0x92] sm:$0xff] }
  0xcb   : > { %10257 = vmatprep.subr.bf16.mxu0 %v10256_v56  ;;  %13636 = vst [vmem:[#allocation25_spill] sm:$0xff] %v11990_v60  ;;  %13637 = vst [vmem:[#allocation26_spill] sm:$0xff] %v11992_v44 }
  0xcd   : > { %8865 = vmatmul.mubr.f32.gmra.mrb[8].mxu0 %v11978_v36  ;;  %v10268_v36 = vpack.c.bf16 %v1675_v43, %v1674_v39  ;;  %v12020_v39 = vld [vmem:[#allocation2 + $0xca] sm:$0xff]  ;;  %v12022_v43 = vld [vmem:[#allocation2 + $0xda] sm:$0xff] }
  0xce   : > { %8867 = vmatprep.mubr.f32.mxu0 %v11980_v0  ;;  %10259 = vmatpush3.bf16.msra.mxu0 %v10256_v56  ;;  %v12002_v0 = vld [vmem:[#allocation2 + $0x9a] sm:$0xff]  ;;  %v12004_v56 = vld [vmem:[#allocation2 + $0xaa] sm:$0xff]  ;;  %13639 = vst [vmem:[#allocation28_spill] sm:$0xff] %v12020_v39  ;;  %13640 = vst [vmem:[#allocation29_spill] sm:$0xff] %v12022_v43 }
  0xcf   : > { %10261 = vmatprep.subr.bf16.mxu0 %v10260_v34  ;;  %13638 = vst [vmem:[#allocation27_spill] sm:$0xff] %v12004_v56 }
  0xd1   : > { %8868 = vmatmul.mubr.f32.gmra.mrb[10].mxu0 %v11990_v60  ;;  %v10272_v60 = vpack.c.bf16 %v2030_v59, %v2029_v58  ;;  %v12032_v58 = vld [vmem:[#allocation2 + $0xfa] sm:$0xff]  ;;  %v12034_v59 = vld [vmem:[#allocation2 + $0x10a] sm:$0xff] }
  0xd2   : > { %8870 = vmatprep.mubr.f32.mxu0 %v11992_v44  ;;  %10263 = vmatpush3.bf16.msra.mxu0 %v10260_v34  ;;  %v12014_v44 = vld [vmem:[#allocation2 + $0xb2] sm:$0xff]  ;;  %v12016_v34 = vld [vmem:[#allocation2 + $0xc2] sm:$0xff]  ;;  %13643 = vst [vmem:[#allocation32_spill] sm:$0xff] %v12032_v58  ;;  %13644 = vst [vmem:[#allocation33_spill] sm:$0xff] %v12034_v59 }
  0xd3   : > { %10265 = vmatprep.subr.bf16.mxu0 %v10264_v57 }
  0xd5   : > { %8871 = vmatmul.mubr.f32.gmra.mrb[12].mxu0 %v12002_v0 }
  0xd6   : > { %8873 = vmatprep.mubr.f32.mxu0 %v12004_v56  ;;  %10267 = vmatpush3.bf16.msra.mxu0 %v10264_v57  ;;  %v12026_v56 = vld [vmem:[#allocation2 + $0xe2] sm:$0xff]  ;;  %v12028_v57 = vld [vmem:[#allocation2 + $0xf2] sm:$0xff] }
  0xd7   : > { %10269 = vmatprep.subr.bf16.mxu0 %v10268_v36  ;;  %13641 = vst [vmem:[#allocation30_spill] sm:$0xff] %v12026_v56  ;;  %13642 = vst [vmem:[#allocation31_spill] sm:$0xff] %v12028_v57 }
  0xd9   : > { %8874 = vmatmul.mubr.f32.gmra.mrb[14].mxu0 %v12014_v44 }
  0xda   : > { %8876 = vmatprep.mubr.f32.mxu0 %v12016_v34  ;;  %10271 = vmatpush3.bf16.msra.mxu0 %v10268_v36  ;;  %v12038_v36 = vld [vmem:[#allocation2 + $0x112] sm:$0xff] }
  0xdb   : > { %10273 = vmatprep.subr.bf16.mxu0 %v10272_v60  ;;  %13645 = vst [vmem:[#allocation34_spill] sm:$0xff] %v12038_v36 }
  0xdd   : > { %8877 = vmatmul.mubr.f32.gmra.mrb[16].mxu0 %v12020_v39  ;;  %v12040_v39 = vld [vmem:[#allocation2 + $0x122] sm:$0xff] }
  0xde   : > { %8879 = vmatprep.mubr.f32.mxu0 %v12022_v43  ;;  %13646 = vst [vmem:[#allocation35_spill] sm:$0xff] %v12040_v39  ;;  %v12044_v43 = vld [vmem:[#allocation2 + $0x12a] sm:$0xff] }
  0xdf   : > { %13647 = vst [vmem:[#allocation36_spill] sm:$0xff] %v12044_v43 }
  0xe1   : > { %8880 = vmatmul.mubr.f32.gmra.mrb[18].mxu0 %v12026_v56  ;;  %v12046_v56 = vld [vmem:[#allocation2 + $0x13a] sm:$0xff] }
  0xe2   : > { %8882 = vmatprep.mubr.f32.mxu0 %v12028_v57  ;;  %13648 = vst [vmem:[#allocation37_spill] sm:$0xff] %v12046_v56  ;;  %v12050_v57 = vld [vmem:[#allocation2 + $0x142] sm:$0xff] }
  0xe3   : > { %13649 = vst [vmem:[#allocation38_spill] sm:$0xff] %v12050_v57 }
  0xe5   : > { %8883 = vmatmul.mubr.f32.gmra.mrb[20].mxu0 %v12032_v58  ;;  %v12052_v58 = vld [vmem:[#allocation2 + $0x152] sm:$0xff] }
  0xe6   : > { %8885 = vmatprep.mubr.f32.mxu0 %v12034_v59  ;;  %13650 = vst [vmem:[#allocation39_spill] sm:$0xff] %v12052_v58  ;;  %v12056_v59 = vld [vmem:[#allocation2 + $0x15a] sm:$0xff] }
  0xe7   : > { %13651 = vst [vmem:[#allocation40_spill] sm:$0xff] %v12056_v59 }
  0xe9   : > { %8886 = vmatmul.mubr.f32.gmra.mrb[22].mxu0 %v12038_v36  ;;  %v12058_v36 = vld [vmem:[#allocation2 + $0x16a] sm:$0xff] }
  0xea   : > { %8888 = vmatprep.mubr.f32.mxu0 %v12040_v39  ;;  %13652 = vst [vmem:[#allocation41_spill] sm:$0xff] %v12058_v36  ;;  %v12062_v39 = vld [vmem:[#allocation2 + $0x172] sm:$0xff] }
  0xed   : > { %8889 = vmatmul.mubr.f32.gmra.mrb[24].mxu0 %v12044_v43 }
  0xee   : > { %8891 = vmatprep.mubr.f32.mxu0 %v12046_v56  ;;  %v2031_v56 = vld [vmem:[%s13538_s1 + $0x210] sm:$0xff] }
  0xf1   : > { %8892 = vmatmul.mubr.f32.gmra.mrb[26].mxu0 %v12050_v57  ;;  %v2032_v57 = vld [vmem:[%s13538_s1 + $0x218] sm:$0xff] }
  0xf2   : > { %8894 = vmatprep.mubr.f32.mxu0 %v12052_v58  ;;  %v10276_v58 = vpack.c.bf16 %v2032_v57, %v2031_v56  ;;  %v2036_v56 = vld [vmem:[%s13538_s1 + $0x238] sm:$0xff] }
  0xf3   : > { %v2040_v57 = vld [vmem:[%s13538_s1 + $0x258] sm:$0xff] }
  0xf5   : > { %8895 = vmatmul.mubr.f32.gmra.mrb[28].mxu0 %v12056_v59  ;;  %v2033_v59 = vld [vmem:[%s13538_s1 + $0x220] sm:$0xff] }
  0xf6   : > { %8897 = vmatprep.mubr.f32.mxu0 %v12058_v36  ;;  %v2034_v36 = vld [vmem:[%s13538_s1 + $0x228] sm:$0xff] }
  0xf7   : > { %v10280_v43 = vpack.c.bf16 %v2034_v36, %v2033_v59  ;;  %v2399_v59 = vld [vmem:[%s13538_s1 + $0x288] sm:$0xff]  ;;  %v2405_v36 = vld [vmem:[%s13538_s1 + $0x2b8] sm:$0xff] }
  0xf9   : > { %8898 = vmatmul.mubr.f32.gmra.mrb[30].mxu0 %v12062_v39 }
  0xfa   : > { %8932 = vmatprep.mubr.f32.mxu0 %v11708_v61  ;;  %v2035_v61 = vld [vmem:[%s13538_s1 + $0x230] sm:$0xff] }
  0xfd   : > { %8933 = vmatmul.mubr.f32.vlgmr.msra.gmra.mrb[0].mxu0 %v11718_v1  ;;  %v10284_v1 = vpack.c.bf16 %v2036_v56, %v2035_v61  ;;  %v2407_v61 = vld [vmem:[%s13538_s1 + $0x2c8] sm:$0xff]  ;;  %v2409_v56 = vld [vmem:[%s13538_s1 + $0x2d8] sm:$0xff] }
  0xfe   : > { %10275 = vmatpush3.bf16.msra.mxu0 %v10272_v60  ;;  %8935 = vmatprep.mubr.f32.mxu0 %v11720_v2  ;;  %v2037_v2 = vld [vmem:[%s13538_s1 + $0x240] sm:$0xff]  ;;  %v2038_v60 = vld [vmem:[%s13538_s1 + $0x248] sm:$0xff] }
  0xff   : > { %10277 = vmatprep.subr.bf16.mxu0 %v10276_v58 }
 0x101   : > { %8936 = vmatmul.mubr.f32.gmra.mrb[2].mxu0 %v11730_v5  ;;  %v10288_v5 = vpack.c.bf16 %v2038_v60, %v2037_v2  ;;  %v2413_v2 = vld [vmem:[%s13538_s1 + $0x2f8] sm:$0xff]  ;;  %v2769_v60 = vld [vmem:[%s13538_s1 + $0x308] sm:$0xff] }
 0x102   : > { %8938 = vmatprep.mubr.f32.mxu0 %v11732_v7  ;;  %10279 = vmatpush3.bf16.msra.mxu0 %v10276_v58  ;;  %v2039_v7 = vld [vmem:[%s13538_s1 + $0x250] sm:$0xff]  ;;  %v2044_v58 = vld [vmem:[%s13538_s1 + $0x278] sm:$0xff] }
 0x103   : > { %10281 = vmatprep.subr.bf16.mxu0 %v10280_v43 }
 0x105   : > { %8939 = vmatmul.mubr.f32.gmra.mrb[4].mxu0 %v11742_v11  ;;  %v10292_v11 = vpack.c.bf16 %v2040_v57, %v2039_v7  ;;  %v2776_v57 = vld [vmem:[%s13538_s1 + $0x340] sm:$0xff] }
 0x106   : > { %8941 = vmatprep.mubr.f32.mxu0 %v11744_v19  ;;  %10283 = vmatpush3.bf16.msra.mxu0 %v10280_v43  ;;  %v2041_v19 = vld [vmem:[%s13538_s1 + $0x260] sm:$0xff]  ;;  %v2042_v43 = vld [vmem:[%s13538_s1 + $0x268] sm:$0xff] }
 0x107   : > { %10285 = vmatprep.subr.bf16.mxu0 %v10284_v1 }
 0x109   : > { %8942 = vmatmul.mubr.f32.gmra.mrb[6].mxu0 %v11754_v30  ;;  %v10296_v30 = vpack.c.bf16 %v2042_v43, %v2041_v19  ;;  %v13667_v19 = vld [vmem:[#allocation21_spill] sm:$0xff]  ;;  %v13668_v43 = vld [vmem:[#allocation22_spill] sm:$0xff] }
 0x10a   : > { %8944 = vmatprep.mubr.f32.mxu0 %v11756_v33  ;;  %10287 = vmatpush3.bf16.msra.mxu0 %v10284_v1  ;;  %v2043_v33 = vld [vmem:[%s13538_s1 + $0x270] sm:$0xff]  ;;  %v2411_v1 = vld [vmem:[%s13538_s1 + $0x2e8] sm:$0xff] }
 0x10b   : > { %10289 = vmatprep.subr.bf16.mxu0 %v10288_v5 }
 0x10d   : > { %8945 = vmatmul.mubr.f32.gmra.mrb[8].mxu0 %v11766_v40  ;;  %v10300_v40 = vpack.c.bf16 %v2044_v58, %v2043_v33  ;;  %v2778_v33 = vld [vmem:[%s13538_s1 + $0x350] sm:$0xff]  ;;  %v2779_v58 = vld [vmem:[%s13538_s1 + $0x358] sm:$0xff] }
 0x10e   : > { %8947 = vmatprep.mubr.f32.mxu0 %v11768_v42  ;;  %10291 = vmatpush3.bf16.msra.mxu0 %v10288_v5  ;;  %v2398_v42 = vld [vmem:[%s13538_s1 + $0x280] sm:$0xff] }
 0x10f   : > { %10293 = vmatprep.subr.bf16.mxu0 %v10292_v11  ;;  %v13666_v5 = vld [vmem:[#allocation20_spill] sm:$0xff] }
 0x111   : > { %8948 = vmatmul.mubr.f32.gmra.mrb[10].mxu0 %v11778_v54  ;;  %v10304_v54 = vpack.c.bf16 %v2399_v59, %v2398_v42  ;;  %v13670_v42 = vld [vmem:[#allocation24_spill] sm:$0xff]  ;;  %v10356_v59 = vpack.c.bf16 %v2779_v58, %v2778_v33 }
 0x112   : > { %8950 = vmatprep.mubr.f32.mxu0 %v11780_v55  ;;  %10295 = vmatpush3.bf16.msra.mxu0 %v10292_v11  ;;  %v13653_v55 = vld [vmem:[#allocation9_spill] sm:$0xff]  ;;  %v2716_v33 = vld [vmem:[#allocation2 + $0xc0] sm:$0xff] }
 0x113   : > { %10297 = vmatprep.subr.bf16.mxu0 %v10296_v30  ;;  %v2777_v11 = vld [vmem:[%s13538_s1 + $0x348] sm:$0xff] }
 0x115   : > { %8951 = vmatmul.mubr.f32.gmra.mrb[12].mxu0 %v11790_v62  ;;  %v13654_v62 = vld [vmem:[#allocation10_spill] sm:$0xff] }
 0x116   : > { %8953 = vmatprep.mubr.f32.mxu0 %v11792_v63  ;;  %10299 = vmatpush3.bf16.msra.mxu0 %v10296_v30  ;;  %v13655_v63 = vld [vmem:[#allocation11_spill] sm:$0xff]  ;;  %v10352_v30 = vpack.c.bf16 %v2777_v11, %v2776_v57  ;;  %v2714_v57 = vld [vmem:[#allocation2 + $0xa8] sm:$0xff] }
 0x117   : > { %10301 = vmatprep.subr.bf16.mxu0 %v10300_v40 }
 0x119   : > { %8954 = vmatmul.mubr.f32.gmra.mrb[14].mxu0 %v11796_v3  ;;  %v13656_v3 = vld [vmem:[#allocation12_spill] sm:$0xff] }
 0x11a   : > { %8956 = vmatprep.mubr.f32.mxu0 %v11798_v4  ;;  %10303 = vmatpush3.bf16.msra.mxu0 %v10300_v40  ;;  %v13657_v4 = vld [vmem:[#allocation13_spill] sm:$0xff]  ;;  %v13669_v40 = vld [vmem:[#allocation23_spill] sm:$0xff] }
 0x11b   : > { %10305 = vmatprep.subr.bf16.mxu0 %v10304_v54 }
 0x11d   : > { %8957 = vmatmul.mubr.f32.gmra.mrb[16].mxu0 %v11802_v6  ;;  %v12142_v6 = vld [vmem:[#allocation2 + $0x180] sm:$0xff] }
 0x11e   : > { %8959 = vmatprep.mubr.f32.mxu0 %v11804_v8  ;;  %v12146_v8 = vld [vmem:[#allocation2 + $0x188] sm:$0xff] }
 0x121   : > { %8960 = vmatmul.mubr.f32.gmra.mrb[18].mxu0 %v11808_v9  ;;  %v2400_v9 = vld [vmem:[%s13538_s1 + $0x290] sm:$0xff] }
 0x122   : > { %8962 = vmatprep.mubr.f32.mxu0 %v11810_v10  ;;  %v2401_v10 = vld [vmem:[%s13538_s1 + $0x298] sm:$0xff] }
 0x125   : > { %8963 = vmatmul.mubr.f32.gmra.mrb[20].mxu0 %v11814_v20  ;;  %v10308_v20 = vpack.c.bf16 %v2401_v10, %v2400_v9  ;;  %v2783_v9 = vld [vmem:[%s13538_s1 + $0x378] sm:$0xff] }
 0x126   : > { %8965 = vmatprep.mubr.f32.mxu0 %v11816_v21  ;;  %v2402_v21 = vld [vmem:[%s13538_s1 + $0x2a0] sm:$0xff]  ;;  %v13673_v10 = vld [vmem:[#allocation27_spill] sm:$0xff] }
 0x129   : > { %8966 = vmatmul.mubr.f32.gmra.mrb[22].mxu0 %v11820_v23  ;;  %v2403_v23 = vld [vmem:[%s13538_s1 + $0x2a8] sm:$0xff] }
 0x12a   : > { %8968 = vmatprep.mubr.f32.mxu0 %v13653_v55  ;;  %v2781_v55 = vld [vmem:[%s13538_s1 + $0x368] sm:$0xff] }
 0x12d   : > { %8969 = vmatmul.mubr.f32.gmra.mrb[24].mxu0 %v13654_v62  ;;  %v13671_v62 = vld [vmem:[#allocation25_spill] sm:$0xff] }
 0x12e   : > { %8971 = vmatprep.mubr.f32.mxu0 %v13655_v63  ;;  %v13672_v63 = vld [vmem:[#allocation26_spill] sm:$0xff] }
 0x131   : > { %8972 = vmatmul.mubr.f32.gmra.mrb[26].mxu0 %v13656_v3 }
 0x132   : > { %8974 = vmatprep.mubr.f32.mxu0 %v13657_v4  ;;  %v2782_v4 = vld [vmem:[%s13538_s1 + $0x370] sm:$0xff] }
 0x135   : > { %8975 = vmatmul.mubr.f32.gmra.mrb[28].mxu0 %v11838_v52  ;;  %v10312_v52 = vpack.c.bf16 %v2403_v23, %v2402_v21  ;;  %v3137_v21 = vld [vmem:[%s13538_s1 + $0x380] sm:$0xff]  ;;  %v3138_v23 = vld [vmem:[%s13538_s1 + $0x388] sm:$0xff] }
 0x136   : > { %8977 = vmatprep.mubr.f32.mxu0 %v12142_v6 }
 0x139   : > { %8978 = vmatmul.mubr.f32.gmra.mrb[30].mxu0 %v12146_v8 }
 0x13a   : > { %9012 = vmatprep.mubr.f32.mxu0 %v11553_v12  ;;  %v2404_v12 = vld [vmem:[%s13538_s1 + $0x2b0] sm:$0xff] }
 0x13d   : > { %9013 = vmatmul.mubr.f32.vlgmr.msra.gmra.mrb[0].mxu0 %v11556_v13  ;;  %v10316_v13 = vpack.c.bf16 %v2405_v36, %v2404_v12  ;;  %v13675_v12 = vld [vmem:[#allocation29_spill] sm:$0xff]  ;;  %v13676_v36 = vld [vmem:[#allocation30_spill] sm:$0xff] }
 0x13e   : > { %10307 = vmatpush3.bf16.msra.mxu0 %v10304_v54  ;;  %9015 = vmatprep.mubr.f32.mxu0 %v11559_v14  ;;  %v2406_v14 = vld [vmem:[%s13538_s1 + $0x2c0] sm:$0xff] }
 0x13f   : > { %10309 = vmatprep.subr.bf16.mxu0 %v10308_v20  ;;  %v2780_v54 = vld [vmem:[%s13538_s1 + $0x360] sm:$0xff] }
 0x140   : > { %v10360_v3 = vpack.c.bf16 %v2781_v55, %v2780_v54  ;;  %v2718_v54 = vld [vmem:[#allocation2 + $0xd8] sm:$0xff] }
 0x141   : > { %9016 = vmatmul.mubr.f32.gmra.mrb[2].mxu0 %v11565_v15  ;;  %v10320_v15 = vpack.c.bf16 %v2407_v61, %v2406_v14  ;;  %v13678_v14 = vld [vmem:[#allocation32_spill] sm:$0xff]  ;;  %v13679_v61 = vld [vmem:[#allocation33_spill] sm:$0xff] }
 0x142   : > { %9018 = vmatprep.mubr.f32.mxu0 %v11569_v16  ;;  %10311 = vmatpush3.bf16.msra.mxu0 %v10308_v20  ;;  %v2408_v16 = vld [vmem:[%s13538_s1 + $0x2d0] sm:$0xff]  ;;  %v10364_v20 = vpack.c.bf16 %v2783_v9, %v2782_v4 }
 0x143   : > { %10313 = vmatprep.subr.bf16.mxu0 %v10312_v52  ;;  %v2720_v4 = vld [vmem:[#allocation2 + $0xf0] sm:$0xff] }
 0x145   : > { %9019 = vmatmul.mubr.f32.gmra.mrb[4].mxu0 %v11572_v17  ;;  %v10324_v17 = vpack.c.bf16 %v2409_v56, %v2408_v16  ;;  %v13683_v16 = vld [vmem:[#allocation37_spill] sm:$0xff]  ;;  %v13684_v56 = vld [vmem:[#allocation38_spill] sm:$0xff] }
 0x146   : > { %9021 = vmatprep.mubr.f32.mxu0 %v11575_v18  ;;  %10315 = vmatpush3.bf16.msra.mxu0 %v10312_v52  ;;  %v2410_v18 = vld [vmem:[%s13538_s1 + $0x2e0] sm:$0xff] }
 0x147   : > { %10317 = vmatprep.subr.bf16.mxu0 %v10316_v13  ;;  %v13674_v52 = vld [vmem:[#allocation28_spill] sm:$0xff] }
 0x149   : > { %9022 = vmatmul.mubr.f32.gmra.mrb[6].mxu0 %v11584_v22  ;;  %v10328_v22 = vpack.c.bf16 %v2411_v1, %v2410_v18  ;;  %v13686_v18 = vld [vmem:[#allocation40_spill] sm:$0xff]  ;;  %v13687_v1 = vld [vmem:[#allocation41_spill] sm:$0xff] }
 0x14a   : > { %9024 = vmatprep.mubr.f32.mxu0 %v11591_v24  ;;  %10319 = vmatpush3.bf16.msra.mxu0 %v10316_v13  ;;  %v2412_v24 = vld [vmem:[%s13538_s1 + $0x2f0] sm:$0xff]  ;;  %v13677_v13 = vld [vmem:[#allocation31_spill] sm:$0xff] }
 0x14b   : > { %10321 = vmatprep.subr.bf16.mxu0 %v10320_v15 }
 0x14d   : > { %9025 = vmatmul.mubr.f32.gmra.mrb[8].mxu0 %v11594_v25  ;;  %v10332_v25 = vpack.c.bf16 %v2413_v2, %v2412_v24  ;;  %v12310_v24 = vld [vmem:[#allocation2 + $0x18a] sm:$0xff] }
 0x14e   : > { %9027 = vmatprep.mubr.f32.mxu0 %v11599_v26  ;;  %10323 = vmatpush3.bf16.msra.mxu0 %v10320_v15  ;;  %v2768_v26 = vld [vmem:[%s13538_s1 + $0x300] sm:$0xff]  ;;  %v2704_v2 = vld [vmem:[#allocation2 + $0x30] sm:$0xff] }
 0x14f   : > { %10325 = vmatprep.subr.bf16.mxu0 %v10324_v17  ;;  %v13682_v15 = vld [vmem:[#allocation36_spill] sm:$0xff] }
 0x151   : > { %9028 = vmatmul.mubr.f32.gmra.mrb[10].mxu0 %v11602_v27  ;;  %v10336_v27 = vpack.c.bf16 %v2769_v60, %v2768_v26  ;;  %v3140_v26 = vld [vmem:[%s13538_s1 + $0x398] sm:$0xff] }
 0x152   : > { %9030 = vmatprep.mubr.f32.mxu0 %v11607_v28  ;;  %10327 = vmatpush3.bf16.msra.mxu0 %v10324_v17  ;;  %v13658_v28 = vld [vmem:[#allocation7_spill] sm:$0xff] }
 0x153   : > { %10329 = vmatprep.subr.bf16.mxu0 %v10328_v22  ;;  %v13685_v17 = vld [vmem:[#allocation39_spill] sm:$0xff] }
 0x154   : > { %v2705_v60 = vld [vmem:[#allocation2 + $0x38] sm:$0xff] }
 0x155   : > { %9031 = vmatmul.mubr.f32.gmra.mrb[12].mxu0 %v11610_v29  ;;  %v13659_v29 = vld [vmem:[#allocation8_spill] sm:$0xff] }
 0x156   : > { %9033 = vmatprep.mubr.f32.mxu0 %v11615_v31  ;;  %10331 = vmatpush3.bf16.msra.mxu0 %v10328_v22  ;;  %v13660_v31 = vld [vmem:[#allocation14_spill] sm:$0xff]  ;;  %v12306_v22 = vld [vmem:[#allocation2 + $0x182] sm:$0xff] }
 0x157   : > { %10333 = vmatprep.subr.bf16.mxu0 %v10332_v25 }
 0x159   : > { %9034 = vmatmul.mubr.f32.gmra.mrb[14].mxu0 %v11618_v32  ;;  %v2770_v32 = vld [vmem:[%s13538_s1 + $0x310] sm:$0xff] }
 0x15a   : > { %9036 = vmatprep.mubr.f32.mxu0 %v11629_v35  ;;  %10335 = vmatpush3.bf16.msra.mxu0 %v10332_v25  ;;  %v2771_v35 = vld [vmem:[%s13538_s1 + $0x318] sm:$0xff]  ;;  %v3139_v25 = vld [vmem:[%s13538_s1 + $0x390] sm:$0xff] }
 0x15b   : > { %10337 = vmatprep.subr.bf16.mxu0 %v10336_v27 }
 0x15d   : > { %9037 = vmatmul.mubr.f32.gmra.mrb[16].mxu0 %v11633_v37  ;;  %v13661_v37 = vld [vmem:[#allocation15_spill] sm:$0xff] }
 0x15e   : > { %9039 = vmatprep.mubr.f32.mxu0 %v11636_v38  ;;  %v13662_v38 = vld [vmem:[#allocation16_spill] sm:$0xff] }
 0x161   : > { %9040 = vmatmul.mubr.f32.gmra.mrb[18].mxu0 %v11647_v41  ;;  %v10340_v41 = vpack.c.bf16 %v2771_v35, %v2770_v32  ;;  %v2708_v32 = vld [vmem:[#allocation2 + $0x60] sm:$0xff] }
 0x162   : > { %9042 = vmatprep.mubr.f32.mxu0 %v11657_v45  ;;  %v2772_v45 = vld [vmem:[%s13538_s1 + $0x320] sm:$0xff] }
 0x165   : > { %9043 = vmatmul.mubr.f32.gmra.mrb[20].mxu0 %v11661_v46  ;;  %v2773_v46 = vld [vmem:[%s13538_s1 + $0x328] sm:$0xff] }
 0x166   : > { %9045 = vmatprep.mubr.f32.mxu0 %v11664_v47  ;;  %v13663_v47 = vld [vmem:[#allocation17_spill] sm:$0xff] }
 0x169   : > { %9046 = vmatmul.mubr.f32.gmra.mrb[22].mxu0 %v11667_v48  ;;  %v13664_v48 = vld [vmem:[#allocation18_spill] sm:$0xff] }
 0x16a   : > { %9048 = vmatprep.mubr.f32.mxu0 %v11673_v49  ;;  %v10344_v49 = vpack.c.bf16 %v2773_v46, %v2772_v45  ;;  %v2710_v45 = vld [vmem:[#allocation2 + $0x78] sm:$0xff] }
 0x16d   : > { %9049 = vmatmul.mubr.f32.gmra.mrb[24].mxu0 %v11676_v50  ;;  %v2774_v50 = vld [vmem:[%s13538_s1 + $0x330] sm:$0xff] }
 0x16e   : > { %9051 = vmatprep.mubr.f32.mxu0 %v11679_v51  ;;  %v2775_v51 = vld [vmem:[%s13538_s1 + $0x338] sm:$0xff] }
 0x16f   : > { %v10348_v7 = vpack.c.bf16 %v2775_v51, %v2774_v50  ;;  %v2712_v50 = vld [vmem:[#allocation2 + $0x90] sm:$0xff] }
 0x171   : > { %9052 = vmatmul.mubr.f32.gmra.mrb[26].mxu0 %v11685_v53  ;;  %v13665_v53 = vld [vmem:[#allocation19_spill] sm:$0xff] }
 0x172   : > { %9054 = vmatprep.mubr.f32.mxu0 %v13658_v28  ;;  %v10372_v28 = vpack.c.bf16 %v3140_v26, %v3139_v25  ;;  %v3075_v25 = vld [vmem:[#allocation2 + $0x49] sm:$0xff] }
 0x175   : > { %9055 = vmatmul.mubr.f32.gmra.mrb[28].mxu0 %v13659_v29  ;;  %v3142_v29 = vld [vmem:[%s13538_s1 + $0x3a8] sm:$0xff] }
 0x176   : > { %9057 = vmatprep.mubr.f32.mxu0 %v13660_v31  ;;  %v2707_v31 = vld [vmem:[#allocation2 + $0x50] sm:$0xff] }
 0x179   : > { %9058 = vmatmul.mubr.f32.gmra.mrb[30].mxu0 %v13661_v37  ;;  %v3143_v37 = vld [vmem:[%s13538_s1 + $0x3b0] sm:$0xff] }
 0x17a   : > { %9092 = vmatprep.mubr.f32.mxu0 %v13662_v38  ;;  %v3144_v38 = vld [vmem:[%s13538_s1 + $0x3b8] sm:$0xff] }
 0x17b   : > { %v10380_v46 = vpack.c.bf16 %v3144_v38, %v3143_v37  ;;  %v3512_v37 = vld [vmem:[%s13538_s1 + $0x430] sm:$0xff] }
 0x17d   : > { %9093 = vmatmul.mubr.f32.vlgmr.msra.gmra.mrb[0].mxu0 %v13663_v47  ;;  %v3145_v47 = vld [vmem:[%s13538_s1 + $0x3c0] sm:$0xff] }
 0x17e   : > { %10339 = vmatpush3.bf16.msra.mxu0 %v10336_v27  ;;  %9095 = vmatprep.mubr.f32.mxu0 %v13664_v48  ;;  %v2706_v27 = vld [vmem:[#allocation2 + $0x48] sm:$0xff] }
 0x17f   : > { %10341 = vmatprep.subr.bf16.mxu0 %v10340_v41  ;;  %v3146_v48 = vld [vmem:[%s13538_s1 + $0x3c8] sm:$0xff] }
 0x180   : > { %v10384_v51 = vpack.c.bf16 %v3146_v48, %v3145_v47  ;;  %v3078_v47 = vld [vmem:[#allocation2 + $0x69] sm:$0xff]  ;;  %v3079_v48 = vld [vmem:[#allocation2 + $0x79] sm:$0xff] }
 0x181   : > { %9096 = vmatmul.mubr.f32.gmra.mrb[2].mxu0 %v13665_v53  ;;  %v3147_v53 = vld [vmem:[%s13538_s1 + $0x3d0] sm:$0xff] }
 0x182   : > { %9098 = vmatprep.mubr.f32.mxu0 %v13666_v5  ;;  %10343 = vmatpush3.bf16.msra.mxu0 %v10340_v41  ;;  %v2709_v41 = vld [vmem:[#allocation2 + $0x68] sm:$0xff]  ;;  %v3148_v5 = vld [vmem:[%s13538_s1 + $0x3d8] sm:$0xff] }
 0x183   : > { %10345 = vmatprep.subr.bf16.mxu0 %v10344_v49  ;;  %v10388_v11 = vpack.c.bf16 %v3148_v5, %v3147_v53  ;;  %v3515_v53 = vld [vmem:[%s13538_s1 + $0x448] sm:$0xff]  ;;  %v4019_v5 = vld [vmem:[%s13540_s3 + $0x40] sm:$0xff] }
 0x185   : > { %9099 = vmatmul.mubr.f32.gmra.mrb[4].mxu0 %v13667_v19  ;;  %v3149_v19 = vld [vmem:[%s13538_s1 + $0x3e0] sm:$0xff] }
 0x186   : > { %9101 = vmatprep.mubr.f32.mxu0 %v13668_v43  ;;  %10347 = vmatpush3.bf16.msra.mxu0 %v10344_v49  ;;  %v2711_v49 = vld [vmem:[#allocation2 + $0x80] sm:$0xff]  ;;  %v3150_v43 = vld [vmem:[%s13538_s1 + $0x3e8] sm:$0xff] }
 0x187   : > { %10349 = vmatprep.subr.bf16.mxu0 %v10348_v7  ;;  %v10392_v58 = vpack.c.bf16 %v3150_v43, %v3149_v19  ;;  %v3516_v43 = vld [vmem:[%s13538_s1 + $0x450] sm:$0xff] }
 0x189   : > { %9102 = vmatmul.mubr.f32.gmra.mrb[6].mxu0 %v13669_v40  ;;  %v3151_v40 = vld [vmem:[%s13538_s1 + $0x3f0] sm:$0xff] }
 0x18a   : > { %9104 = vmatprep.mubr.f32.mxu0 %v13670_v42  ;;  %10351 = vmatpush3.bf16.msra.mxu0 %v10348_v7  ;;  %v2713_v7 = vld [vmem:[#allocation2 + $0x98] sm:$0xff] }
 0x18b   : > { %10353 = vmatprep.subr.bf16.mxu0 %v10352_v30  ;;  %v3152_v42 = vld [vmem:[%s13538_s1 + $0x3f8] sm:$0xff] }
 0x18c   : > { %v10396_v55 = vpack.c.bf16 %v3152_v42, %v3151_v40  ;;  %v4022_v40 = vld [vmem:[%s13540_s3 + $0x58] sm:$0xff] }
 0x18d   : > { %9105 = vmatmul.mubr.f32.gmra.mrb[8].mxu0 %v13671_v62  ;;  %v3506_v62 = vld [vmem:[%s13538_s1 + $0x400] sm:$0xff] }
 0x18e   : > { %9107 = vmatprep.mubr.f32.mxu0 %v13672_v63  ;;  %10355 = vmatpush3.bf16.msra.mxu0 %v10352_v30  ;;  %v2715_v30 = vld [vmem:[#allocation2 + $0xb0] sm:$0xff]  ;;  %v3507_v63 = vld [vmem:[%s13538_s1 + $0x408] sm:$0xff]  ;;  %v3082_v42 = vld [vmem:[#allocation2 + $0x99] sm:$0xff] }
 0x18f   : > { %10357 = vmatprep.subr.bf16.mxu0 %v10356_v59  ;;  %v10400_v9 = vpack.c.bf16 %v3507_v63, %v3506_v62  ;;  %v3518_v62 = vld [vmem:[%s13538_s1 + $0x460] sm:$0xff]  ;;  %v3519_v63 = vld [vmem:[%s13538_s1 + $0x468] sm:$0xff] }
 0x191   : > { %9108 = vmatmul.mubr.f32.gmra.mrb[10].mxu0 %v12002_v0  ;;  %v10368_v0 = vpack.c.bf16 %v3138_v23, %v3137_v21  ;;  %v2723_v21 = vld [vmem:[#allocation2 + $0x110] sm:$0xff]  ;;  %v2724_v23 = vld [vmem:[#allocation2 + $0x120] sm:$0xff] }
 0x192   : > { %9110 = vmatprep.mubr.f32.mxu0 %v13673_v10  ;;  %10359 = vmatpush3.bf16.msra.mxu0 %v10356_v59  ;;  %v2717_v59 = vld [vmem:[#allocation2 + $0xc8] sm:$0xff]  ;;  %v2721_v10 = vld [vmem:[#allocation2 + $0xf8] sm:$0xff] }
 0x193   : > { %10361 = vmatprep.subr.bf16.mxu0 %v10360_v3 }
 0x195   : > { %9111 = vmatmul.mubr.f32.gmra.mrb[12].mxu0 %v12014_v44  ;;  %v13680_v44 = vld [vmem:[#allocation34_spill] sm:$0xff] }
 0x196   : > { %9113 = vmatprep.mubr.f32.mxu0 %v12016_v34  ;;  %10363 = vmatpush3.bf16.msra.mxu0 %v10360_v3  ;;  %v13681_v34 = vld [vmem:[#allocation35_spill] sm:$0xff]  ;;  %v2719_v3 = vld [vmem:[#allocation2 + $0xe0] sm:$0xff] }
 0x197   : > { %10365 = vmatprep.subr.bf16.mxu0 %v10364_v20 }
 0x199   : > { %9114 = vmatmul.mubr.f32.gmra.mrb[14].mxu0 %v13674_v52  ;;  %v2726_v52 = vld [vmem:[#allocation2 + $0x138] sm:$0xff] }
 0x19a   : > { %9116 = vmatprep.mubr.f32.mxu0 %v13675_v12  ;;  %10367 = vmatpush3.bf16.msra.mxu0 %v10364_v20  ;;  %v2722_v20 = vld [vmem:[#allocation2 + $0x108] sm:$0xff]  ;;  %v2727_v12 = vld [vmem:[#allocation2 + $0x140] sm:$0xff] }
 0x19b   : > { %10369 = vmatprep.subr.bf16.mxu0 %v10368_v0 }
 0x19d   : > { %9117 = vmatmul.mubr.f32.gmra.mrb[16].mxu0 %v13676_v36  ;;  %v2728_v36 = vld [vmem:[#allocation2 + $0x150] sm:$0xff] }
 0x19e   : > { %9119 = vmatprep.mubr.f32.mxu0 %v13677_v13  ;;  %v2729_v13 = vld [vmem:[#allocation2 + $0x158] sm:$0xff] }
 0x1a1   : > { %9120 = vmatmul.mubr.f32.gmra.mrb[18].mxu0 %v13678_v14  ;;  %v2730_v14 = vld [vmem:[#allocation2 + $0x168] sm:$0xff] }
 0x1a2   : > { %9122 = vmatprep.mubr.f32.mxu0 %v13679_v61  ;;  %v2731_v61 = vld [vmem:[#allocation2 + $0x170] sm:$0xff] }
 0x1a5   : > { %9123 = vmatmul.mubr.f32.gmra.mrb[20].mxu0 %v13680_v44  ;;  %v2734_v44 = vld [vmem:[#allocation2 + $0x198] sm:$0xff] }
 0x1a6   : > { %9125 = vmatprep.mubr.f32.mxu0 %v13681_v34  ;;  %v3073_v34 = vld [vmem:[#allocation2 + $0x31] sm:$0xff] }
 0x1a9   : > { %9126 = vmatmul.mubr.f32.gmra.mrb[22].mxu0 %v13682_v15  ;;  %v3508_v15 = vld [vmem:[%s13538_s1 + $0x410] sm:$0xff] }
 0x1aa   : > { %9128 = vmatprep.mubr.f32.mxu0 %v13683_v16  ;;  %v3509_v16 = vld [vmem:[%s13538_s1 + $0x418] sm:$0xff] }
 0x1ab   : > { %v10404_v26 = vpack.c.bf16 %v3509_v16, %v3508_v15  ;;  %v3096_v15 = vld [vmem:[#allocation2 + $0x141] sm:$0xff]  ;;  %v3097_v16 = vld [vmem:[#allocation2 + $0x151] sm:$0xff] }
 0x1ad   : > { %9129 = vmatmul.mubr.f32.gmra.mrb[24].mxu0 %v13684_v56  ;;  %v12369_v56 = vld [vmem:[#allocation2 + $0x8] sm:$0xff] }
 0x1ae   : > { %9131 = vmatprep.mubr.f32.mxu0 %v13685_v17  ;;  %v4013_v17 = vld [vmem:[%s13540_s3 + $0x10] sm:$0xff] }
 0x1b1   : > { %9132 = vmatmul.mubr.f32.gmra.mrb[26].mxu0 %v13686_v18  ;;  %v3074_v18 = vld [vmem:[#allocation2 + $0x39] sm:$0xff] }
 0x1b2   : > { %9134 = vmatprep.mubr.f32.mxu0 %v13687_v1 }
 0x1b5   : > { %9135 = vmatmul.mubr.f32.gmra.mrb[28].mxu0 %v12062_v39  ;;  %v3141_v39 = vld [vmem:[%s13538_s1 + $0x3a0] sm:$0xff] }
 0x1b6   : > { %9137 = vmatprep.mubr.f32.mxu0 %v12306_v22  ;;  %v10376_v35 = vpack.c.bf16 %v3142_v29, %v3141_v39  ;;  %v4015_v39 = vld [vmem:[%s13540_s3 + $0x20] sm:$0xff]  ;;  %v4016_v29 = vld [vmem:[%s13540_s3 + $0x28] sm:$0xff] }
 0x1b7   : > { %v10440_v38 = vpack.c.bf16 %v4016_v29, %v4015_v39  ;;  %v3446_v39 = vld [vmem:[#allocation2 + $0x62] sm:$0xff]  ;;  %v3447_v29 = vld [vmem:[#allocation2 + $0x6a] sm:$0xff] }
 0x1b9   : > { %9138 = vmatmul.mubr.f32.gmra.mrb[30].mxu0 %v12310_v24 }
 0x1ba   : > { %9172 = vmatprep.mubr.f32.mxu0 %v2704_v2  ;;  %v4014_v2 = vld [vmem:[%s13540_s3 + $0x18] sm:$0xff] }
 0x1bd   : > { %9173 = vmatmul.mubr.f32.vlgmr.msra.gmra.mrb[0].mxu0 %v2705_v60  ;;  %v3510_v60 = vld [vmem:[%s13538_s1 + $0x420] sm:$0xff] }
 0x1be   : > { %10371 = vmatpush3.bf16.msra.mxu0 %v10368_v0  ;;  %9175 = vmatprep.mubr.f32.mxu0 %v2706_v27  ;;  %v2725_v0 = vld [vmem:[#allocation2 + $0x128] sm:$0xff]  ;;  %v10436_v27 = vpack.c.bf16 %v4014_v2, %v4013_v17  ;;  %v3100_v17 = vld [vmem:[#allocation2 + $0x171] sm:$0xff] }
 0x1bf   : > { %10373 = vmatprep.subr.bf16.mxu0 %v10372_v28  ;;  %v11356_v2 = vld [vmem:[#allocation2 + $0x189] sm:$0xff] }
 0x1c1   : > { %9176 = vmatmul.mubr.f32.gmra.mrb[2].mxu0 %v2707_v31  ;;  %v3076_v31 = vld [vmem:[#allocation2 + $0x51] sm:$0xff] }
 0x1c2   : > { %9178 = vmatprep.mubr.f32.mxu0 %v2708_v32  ;;  %10375 = vmatpush3.bf16.msra.mxu0 %v10372_v28  ;;  %v3511_v28 = vld [vmem:[%s13538_s1 + $0x428] sm:$0xff] }
 0x1c3   : > { %10377 = vmatprep.subr.bf16.mxu0 %v10376_v35  ;;  %v3077_v32 = vld [vmem:[#allocation2 + $0x61] sm:$0xff] }
 0x1c5   : > { %9179 = vmatmul.mubr.f32.gmra.mrb[4].mxu0 %v2709_v41  ;;  %v3513_v41 = vld [vmem:[%s13538_s1 + $0x438] sm:$0xff] }
 0x1c6   : > { %9181 = vmatprep.mubr.f32.mxu0 %v2710_v45  ;;  %10379 = vmatpush3.bf16.msra.mxu0 %v10376_v35  ;;  %v10408_v35 = vpack.c.bf16 %v3511_v28, %v3510_v60  ;;  %v4017_v45 = vld [vmem:[%s13540_s3 + $0x30] sm:$0xff]  ;;  %v3443_v60 = vld [vmem:[#allocation2 + $0x3a] sm:$0xff] }
 0x1c7   : > { %10381 = vmatprep.subr.bf16.mxu0 %v10380_v46  ;;  %v3445_v28 = vld [vmem:[#allocation2 + $0x52] sm:$0xff] }
 0x1c9   : > { %9182 = vmatmul.mubr.f32.gmra.mrb[6].mxu0 %v2711_v49  ;;  %v10412_v49 = vpack.c.bf16 %v3513_v41, %v3512_v37  ;;  %v3451_v37 = vld [vmem:[#allocation2 + $0x9a] sm:$0xff]  ;;  %v3453_v41 = vld [vmem:[#allocation2 + $0xb2] sm:$0xff] }
 0x1ca   : > { %9184 = vmatprep.mubr.f32.mxu0 %v2712_v50  ;;  %10383 = vmatpush3.bf16.msra.mxu0 %v10380_v46  ;;  %v4018_v46 = vld [vmem:[%s13540_s3 + $0x38] sm:$0xff]  ;;  %v3514_v50 = vld [vmem:[%s13538_s1 + $0x440] sm:$0xff] }
 0x1cb   : > { %10385 = vmatprep.subr.bf16.mxu0 %v10384_v51  ;;  %v10416_v19 = vpack.c.bf16 %v3515_v53, %v3514_v50  ;;  %v3459_v50 = vld [vmem:[#allocation2 + $0xfa] sm:$0xff]  ;;  %v3461_v53 = vld [vmem:[#allocation2 + $0x112] sm:$0xff] }
 0x1cd   : > { %9185 = vmatmul.mubr.f32.gmra.mrb[8].mxu0 %v2713_v7  ;;  %v4020_v7 = vld [vmem:[%s13540_s3 + $0x48] sm:$0xff] }
 0x1ce   : > { %9187 = vmatprep.mubr.f32.mxu0 %v2714_v57  ;;  %10387 = vmatpush3.bf16.msra.mxu0 %v10384_v51  ;;  %v10444_v51 = vpack.c.bf16 %v4018_v46, %v4017_v45  ;;  %v3080_v57 = vld [vmem:[#allocation2 + $0x81] sm:$0xff]  ;;  %v3455_v46 = vld [vmem:[#allocation2 + $0xca] sm:$0xff] }
 0x1cf   : > { %10389 = vmatprep.subr.bf16.mxu0 %v10388_v11  ;;  %v3454_v45 = vld [vmem:[#allocation2 + $0xc2] sm:$0xff] }
 0x1d1   : > { %9188 = vmatmul.mubr.f32.gmra.mrb[10].mxu0 %v2715_v30  ;;  %v10448_v30 = vpack.c.bf16 %v4020_v7, %v4019_v5  ;;  %v3462_v5 = vld [vmem:[#allocation2 + $0x122] sm:$0xff]  ;;  %v3463_v7 = vld [vmem:[#allocation2 + $0x12a] sm:$0xff] }
 0x1d2   : > { %9190 = vmatprep.mubr.f32.mxu0 %v2716_v33  ;;  %10391 = vmatpush3.bf16.msra.mxu0 %v10388_v11  ;;  %v3081_v11 = vld [vmem:[#allocation2 + $0x91] sm:$0xff] }
 0x1d3   : > { %10393 = vmatprep.subr.bf16.mxu0 %v10392_v58  ;;  %v3517_v33 = vld [vmem:[%s13538_s1 + $0x458] sm:$0xff] }
 0x1d5   : > { %9191 = vmatmul.mubr.f32.gmra.mrb[12].mxu0 %v2717_v59  ;;  %v3083_v59 = vld [vmem:[#allocation2 + $0xa9] sm:$0xff] }
 0x1d6   : > { %9193 = vmatprep.mubr.f32.mxu0 %v2718_v54  ;;  %10395 = vmatpush3.bf16.msra.mxu0 %v10392_v58  ;;  %v4021_v58 = vld [vmem:[%s13540_s3 + $0x50] sm:$0xff]  ;;  %v10420_v54 = vpack.c.bf16 %v3517_v33, %v3516_v43  ;;  %v3467_v43 = vld [vmem:[#allocation2 + $0x15a] sm:$0xff] }
 0x1d7   : > { %10397 = vmatprep.subr.bf16.mxu0 %v10396_v55  ;;  %v3469_v33 = vld [vmem:[#allocation2 + $0x172] sm:$0xff] }
 0x1d9   : > { %9194 = vmatmul.mubr.f32.gmra.mrb[14].mxu0 %v2719_v3  ;;  %v3084_v3 = vld [vmem:[#allocation2 + $0xb1] sm:$0xff] }
 0x1da   : > { %9196 = vmatprep.mubr.f32.mxu0 %v2720_v4  ;;  %10399 = vmatpush3.bf16.msra.mxu0 %v10396_v55  ;;  %v10452_v55 = vpack.c.bf16 %v4022_v40, %v4021_v58  ;;  %v3085_v4 = vld [vmem:[#allocation2 + $0xc1] sm:$0xff] }
 0x1db   : > { %10401 = vmatprep.subr.bf16.mxu0 %v10400_v9  ;;  %v3472_v58 = vld [vmem:[#allocation2 + $0x19a] sm:$0xff]  ;;  %v3473_v40 = vld [vmem:[#allocation2 + $0x1a2] sm:$0xff] }
 0x1dd   : > { %9197 = vmatmul.mubr.f32.gmra.mrb[16].mxu0 %v2721_v10  ;;  %v3520_v10 = vld [vmem:[%s13538_s1 + $0x470] sm:$0xff] }
 0x1de   : > { %9199 = vmatprep.mubr.f32.mxu0 %v2722_v20  ;;  %v3521_v20 = vld [vmem:[%s13538_s1 + $0x478] sm:$0xff] }
 0x1e1   : > { %9200 = vmatmul.mubr.f32.gmra.mrb[18].mxu0 %v2723_v21  ;;  %v3086_v21 = vld [vmem:[#allocation2 + $0xc9] sm:$0xff] }
 0x1e2   : > { %9202 = vmatprep.mubr.f32.mxu0 %v2724_v23  ;;  %v3087_v23 = vld [vmem:[#allocation2 + $0xd9] sm:$0xff] }
 0x1e5   : > { %9203 = vmatmul.mubr.f32.gmra.mrb[20].mxu0 %v2725_v0  ;;  %v10428_v0 = vpack.c.bf16 %v3521_v20, %v3520_v10  ;;  %v4383_v10 = vld [vmem:[%s13540_s3 + $0x98] sm:$0xff]  ;;  %v4384_v20 = vld [vmem:[%s13540_s3 + $0xa0] sm:$0xff] }
 0x1e6   : > { %9205 = vmatprep.mubr.f32.mxu0 %v2726_v52  ;;  %v3088_v52 = vld [vmem:[#allocation2 + $0xe1] sm:$0xff] }
 0x1e9   : > { %9206 = vmatmul.mubr.f32.gmra.mrb[22].mxu0 %v2727_v12  ;;  %v3089_v12 = vld [vmem:[#allocation2 + $0xf1] sm:$0xff] }
 0x1ea   : > { %9208 = vmatprep.mubr.f32.mxu0 %v2728_v36  ;;  %v3090_v36 = vld [vmem:[#allocation2 + $0xf9] sm:$0xff] }
 0x1ed   : > { %9209 = vmatmul.mubr.f32.gmra.mrb[24].mxu0 %v2729_v13  ;;  %v3091_v13 = vld [vmem:[#allocation2 + $0x109] sm:$0xff] }
 0x1ee   : > { %9211 = vmatprep.mubr.f32.mxu0 %v2730_v14  ;;  %v3092_v14 = vld [vmem:[#allocation2 + $0x111] sm:$0xff] }
 0x1f1   : > { %9212 = vmatmul.mubr.f32.gmra.mrb[26].mxu0 %v2731_v61  ;;  %v3093_v61 = vld [vmem:[#allocation2 + $0x121] sm:$0xff] }
 0x1f2   : > { %9214 = vmatprep.mubr.f32.mxu0 %v12142_v6  ;;  %v4011_v6 = vld [vmem:[%s13540_s3] sm:$0xff] }
 0x1f5   : > { %9215 = vmatmul.mubr.f32.gmra.mrb[28].mxu0 %v12146_v8  ;;  %v4012_v8 = vld [vmem:[%s13540_s3 + $0x8] sm:$0xff] }
 0x1f6   : > { %9217 = vmatprep.mubr.f32.mxu0 %v2734_v44  ;;  %v10432_v1 = vpack.c.bf16 %v4012_v8, %v4011_v6  ;;  %v3094_v44 = vld [vmem:[#allocation2 + $0x129] sm:$0xff]  ;;  %v3098_v6 = vld [vmem:[#allocation2 + $0x159] sm:$0xff] }
 0x1f7   : > { %v3099_v8 = vld [vmem:[#allocation2 + $0x169] sm:$0xff] }
 0x1f8   : > { %10433 = vmatprep.subr.bf16.mxu1 %v10432_v1 }
 0x1f9   : > { %9218 = vmatmul.mubr.f32.gmra.mrb[30].mxu0 %v12369_v56  ;;  %10435 = vmatpush3.bf16.msra.mxu1 %v10432_v1  ;;  %v3103_v1 = vld [vmem:[#allocation2 + $0x199] sm:$0xff] }
 0x1fa   : > { %9252 = vmatprep.mubr.f32.mxu0 %v3073_v34  ;;  %10437 = vmatprep.subr.bf16.mxu1 %v10436_v27  ;;  %v3095_v34 = vld [vmem:[#allocation2 + $0x139] sm:$0xff] }
 0x1fd   : > { %9253 = vmatmul.mubr.f32.vlgmr.msra.gmra.mrb[0].mxu0 %v3074_v18  ;;  %10439 = vmatpush3.bf16.msra.mxu1 %v10436_v27  ;;  %v11355_v18 = vld [vmem:[#allocation2 + $0x181] sm:$0xff]  ;;  %v3444_v27 = vld [vmem:[#allocation2 + $0x4a] sm:$0xff] }
 0x1fe   : > { %10403 = vmatpush3.bf16.msra.mxu0 %v10400_v9  ;;  %9255 = vmatprep.mubr.f32.mxu0 %v3075_v25  ;;  %v10424_v9 = vpack.c.bf16 %v3519_v63, %v3518_v62  ;;  %v3104_v25 = vld [vmem:[#allocation2 + $0x1a1] sm:$0xff]  ;;  %v3947_v62 = vld [vmem:[#allocation3] sm:$0xff] }
 0x1ff   : > { %10405 = vmatprep.subr.bf16.mxu0 %v10404_v26  ;;  %10441 = vmatprep.subr.bf16.mxu1 %v10440_v38  ;;  %v4380_v63 = vld [vmem:[%s13540_s3 + $0x80] sm:$0xff] }
 0x200   : > { %9412 = vmatprep.mubr.f32.mxu1 %v3947_v62 }
 0x201   : > { %9256 = vmatmul.mubr.f32.gmra.mrb[2].mxu0 %v3076_v31  ;;  %10443 = vmatpush3.bf16.msra.mxu1 %v10440_v38  ;;  %v3448_v31 = vld [vmem:[#allocation2 + $0x7a] sm:$0xff]  ;;  %v3452_v38 = vld [vmem:[#allocation2 + $0xaa] sm:$0xff] }
 0x202   : > { %9258 = vmatprep.mubr.f32.mxu0 %v3077_v32  ;;  %10407 = vmatpush3.bf16.msra.mxu0 %v10404_v26  ;;  %v3442_v26 = vld [vmem:[#allocation2 + $0x32] sm:$0xff]  ;;  %v3449_v32 = vld [vmem:[#allocation2 + $0x82] sm:$0xff] }
 0x203   : > { %10409 = vmatprep.subr.bf16.mxu0 %v10408_v35  ;;  %10445 = vmatprep.subr.bf16.mxu1 %v10444_v51 }
 0x205   : > { %9259 = vmatmul.mubr.f32.gmra.mrb[4].mxu0 %v3078_v47  ;;  %10447 = vmatpush3.bf16.msra.mxu1 %v10444_v51  ;;  %v3456_v47 = vld [vmem:[#allocation2 + $0xda] sm:$0xff]  ;;  %v3460_v51 = vld [vmem:[#allocation2 + $0x10a] sm:$0xff] }
 0x206   : > { %9261 = vmatprep.mubr.f32.mxu0 %v3079_v48  ;;  %10411 = vmatpush3.bf16.msra.mxu0 %v10408_v35  ;;  %v3450_v35 = vld [vmem:[#allocation2 + $0x92] sm:$0xff]  ;;  %v3457_v48 = vld [vmem:[#allocation2 + $0xe2] sm:$0xff] }
 0x207   : > { %10413 = vmatprep.subr.bf16.mxu0 %v10412_v49  ;;  %10449 = vmatprep.subr.bf16.mxu1 %v10448_v30 }
 0x209   : > { %9262 = vmatmul.mubr.f32.gmra.mrb[6].mxu0 %v3080_v57  ;;  %10451 = vmatpush3.bf16.msra.mxu1 %v10448_v30  ;;  %v3464_v57 = vld [vmem:[#allocation2 + $0x13a] sm:$0xff]  ;;  %v3468_v30 = vld [vmem:[#allocation2 + $0x16a] sm:$0xff] }
 0x20a   : > { %9264 = vmatprep.mubr.f32.mxu0 %v3081_v11  ;;  %10415 = vmatpush3.bf16.msra.mxu0 %v10412_v49  ;;  %v3458_v49 = vld [vmem:[#allocation2 + $0xf2] sm:$0xff]  ;;  %v3465_v11 = vld [vmem:[#allocation2 + $0x142] sm:$0xff] }
 0x20b   : > { %10417 = vmatprep.subr.bf16.mxu0 %v10416_v19  ;;  %10453 = vmatprep.subr.bf16.mxu1 %v10452_v55 }
 0x20d   : > { %9265 = vmatmul.mubr.f32.gmra.mrb[8].mxu0 %v3082_v42  ;;  %10455 = vmatpush3.bf16.msra.mxu1 %v10452_v55  ;;  %v4023_v42 = vld [vmem:[%s13540_s3 + $0x60] sm:$0xff] }
 0x20e   : > { %9267 = vmatprep.mubr.f32.mxu0 %v3083_v59  ;;  %10419 = vmatpush3.bf16.msra.mxu0 %v10416_v19  ;;  %v3466_v19 = vld [vmem:[#allocation2 + $0x152] sm:$0xff]  ;;  %v4024_v59 = vld [vmem:[%s13540_s3 + $0x68] sm:$0xff] }
 0x20f   : > { %10421 = vmatprep.subr.bf16.mxu0 %v10420_v54 }
 0x211   : > { %9268 = vmatmul.mubr.f32.gmra.mrb[10].mxu0 %v3084_v3  ;;  %v4381_v3 = vld [vmem:[%s13540_s3 + $0x88] sm:$0xff] }
 0x212   : > { %9270 = vmatprep.mubr.f32.mxu0 %v3085_v4  ;;  %10423 = vmatpush3.bf16.msra.mxu0 %v10420_v54  ;;  %v10456_v54 = vpack.c.bf16 %v4024_v59, %v4023_v42  ;;  %v10464_v4 = vpack.c.bf16 %v4381_v3, %v4380_v63 }
 0x213   : > { %10425 = vmatprep.subr.bf16.mxu0 %v10424_v9 }
 0x214   : > { %10457 = vmatprep.subr.bf16.mxu1 %v10456_v54 }
 0x215   : > { %9271 = vmatmul.mubr.f32.gmra.mrb[12].mxu0 %v3086_v21  ;;  %10459 = vmatpush3.bf16.msra.mxu1 %v10456_v54  ;;  %v4385_v21 = vld [vmem:[%s13540_s3 + $0xa8] sm:$0xff] }
 0x216   : > { %9273 = vmatprep.mubr.f32.mxu0 %v3087_v23  ;;  %10427 = vmatpush3.bf16.msra.mxu0 %v10424_v9  ;;  %v4382_v9 = vld [vmem:[%s13540_s3 + $0x90] sm:$0xff]  ;;  %v10472_v23 = vpack.c.bf16 %v4385_v21, %v4384_v20 }
 0x217   : > { %10429 = vmatprep.subr.bf16.mxu0 %v10428_v0 }
 0x219   : > { %9274 = vmatmul.mubr.f32.gmra.mrb[14].mxu0 %v3088_v52  ;;  %v4387_v52 = vld [vmem:[%s13540_s3 + $0xb8] sm:$0xff] }
 0x21a   : > { %9276 = vmatprep.mubr.f32.mxu0 %v3089_v12  ;;  %10431 = vmatpush3.bf16.msra.mxu0 %v10428_v0  ;;  %v4386_v0 = vld [vmem:[%s13540_s3 + $0xb0] sm:$0xff] }
 0x21b   : > { %v10476_v12 = vpack.c.bf16 %v4387_v52, %v4386_v0 }
 0x21d   : > { %9277 = vmatmul.mubr.f32.gmra.mrb[16].mxu0 %v3090_v36  ;;  %v4388_v36 = vld [vmem:[%s13540_s3 + $0xc0] sm:$0xff] }
 0x21e   : > { %9279 = vmatprep.mubr.f32.mxu0 %v3091_v13  ;;  %v4389_v13 = vld [vmem:[%s13540_s3 + $0xc8] sm:$0xff] }
 0x221   : > { %9280 = vmatmul.mubr.f32.gmra.mrb[18].mxu0 %v3092_v14  ;;  %v10480_v14 = vpack.c.bf16 %v4389_v13, %v4388_v36 }
 0x222   : > { %9282 = vmatprep.mubr.f32.mxu0 %v3093_v61  ;;  %v4390_v61 = vld [vmem:[%s13540_s3 + $0xd0] sm:$0xff] }
 0x225   : > { %9283 = vmatmul.mubr.f32.gmra.mrb[20].mxu0 %v3094_v44  ;;  %v4391_v44 = vld [vmem:[%s13540_s3 + $0xd8] sm:$0xff] }
 0x226   : > { %9285 = vmatprep.mubr.f32.mxu0 %v3095_v34  ;;  %v10484_v34 = vpack.c.bf16 %v4391_v44, %v4390_v61 }
 0x229   : > { %9286 = vmatmul.mubr.f32.gmra.mrb[22].mxu0 %v3096_v15  ;;  %v4392_v15 = vld [vmem:[%s13540_s3 + $0xe0] sm:$0xff] }
 0x22a   : > { %9288 = vmatprep.mubr.f32.mxu0 %v3097_v16  ;;  %v4393_v16 = vld [vmem:[%s13540_s3 + $0xe8] sm:$0xff] }
 0x22d   : > { %9289 = vmatmul.mubr.f32.gmra.mrb[24].mxu0 %v3098_v6  ;;  %v10488_v6 = vpack.c.bf16 %v4393_v16, %v4392_v15 }
 0x22e   : > { %9291 = vmatprep.mubr.f32.mxu0 %v3099_v8  ;;  %v4394_v8 = vld [vmem:[%s13540_s3 + $0xf0] sm:$0xff] }
 0x231   : > { %9292 = vmatmul.mubr.f32.gmra.mrb[26].mxu0 %v3100_v17  ;;  %v4395_v17 = vld [vmem:[%s13540_s3 + $0xf8] sm:$0xff] }
 0x232   : > { %9294 = vmatprep.mubr.f32.mxu0 %v11355_v18  ;;  %v10492_v18 = vpack.c.bf16 %v4395_v17, %v4394_v8 }
 0x235   : > { %9295 = vmatmul.mubr.f32.gmra.mrb[28].mxu0 %v11356_v2  ;;  %v4750_v2 = vld [vmem:[%s13540_s3 + $0x108] sm:$0xff] }
 0x236   : > { %9297 = vmatprep.mubr.f32.mxu0 %v3103_v1  ;;  %v4749_v1 = vld [vmem:[%s13540_s3 + $0x100] sm:$0xff] }
 0x239   : > { %9298 = vmatmul.mubr.f32.gmra.mrb[30].mxu0 %v3104_v25  ;;  %v12513_v25 = vpack.c.bf16 %v4750_v2, %v4749_v1 }
 0x23a   : > { %9332 = vmatprep.mubr.f32.mxu0 %v3442_v26  ;;  %v12519_v26 = vld [vmem:[%s13539_s2] ss:$0 sm:$0xff] }
 0x23d   : > { %9333 = vmatmul.mubr.f32.vlgmr.msra.gmra.mrb[0].mxu0 %v3443_v60 }
 0x23e   : > { %9335 = vmatprep.mubr.f32.mxu0 %v3444_v27 }
 0x241   : > { %9336 = vmatmul.mubr.f32.gmra.mrb[2].mxu0 %v3445_v28 }
 0x242   : > { %9338 = vmatprep.mubr.f32.mxu0 %v3446_v39 }
 0x245   : > { %9339 = vmatmul.mubr.f32.gmra.mrb[4].mxu0 %v3447_v29 }
 0x246   : > { %9341 = vmatprep.mubr.f32.mxu0 %v3448_v31 }
 0x249   : > { %9342 = vmatmul.mubr.f32.gmra.mrb[6].mxu0 %v3449_v32 }
 0x24a   : > { %9344 = vmatprep.mubr.f32.mxu0 %v3450_v35 }
 0x24d   : > { %9345 = vmatmul.mubr.f32.gmra.mrb[8].mxu0 %v3451_v37 }
 0x24e   : > { %9347 = vmatprep.mubr.f32.mxu0 %v3452_v38 }
 0x251   : > { %9348 = vmatmul.mubr.f32.gmra.mrb[10].mxu0 %v3453_v41 }
 0x252   : > { %9350 = vmatprep.mubr.f32.mxu0 %v3454_v45 }
 0x255   : > { %9351 = vmatmul.mubr.f32.gmra.mrb[12].mxu0 %v3455_v46 }
 0x256   : > { %9353 = vmatprep.mubr.f32.mxu0 %v3456_v47 }
 0x259   : > { %9354 = vmatmul.mubr.f32.gmra.mrb[14].mxu0 %v3457_v48 }
 0x25a   : > { %9356 = vmatprep.mubr.f32.mxu0 %v3458_v49 }
 0x25d   : > { %9357 = vmatmul.mubr.f32.gmra.mrb[16].mxu0 %v3459_v50 }
 0x25e   : > { %9359 = vmatprep.mubr.f32.mxu0 %v3460_v51 }
 0x261   : > { %9360 = vmatmul.mubr.f32.gmra.mrb[18].mxu0 %v3461_v53 }
 0x262   : > { %9362 = vmatprep.mubr.f32.mxu0 %v3462_v5 }
 0x265   : > { %9363 = vmatmul.mubr.f32.gmra.mrb[20].mxu0 %v3463_v7 }
 0x266   : > { %9365 = vmatprep.mubr.f32.mxu0 %v3464_v57 }
 0x269   : > { %9366 = vmatmul.mubr.f32.gmra.mrb[22].mxu0 %v3465_v11 }
 0x26a   : > { %9368 = vmatprep.mubr.f32.mxu0 %v3466_v19 }
 0x26d   : > { %9369 = vmatmul.mubr.f32.gmra.mrb[24].mxu0 %v3467_v43 }
 0x26e   : > { %9371 = vmatprep.mubr.f32.mxu0 %v3468_v30 }
 0x271   : > { %9372 = vmatmul.mubr.f32.gmra.mrb[26].mxu0 %v3469_v33 }
 0x272   : > { %9374 = vmatprep.mubr.f32.mxu0 %v12306_v22  ;;  %v4025_v22 = vld [vmem:[%s13540_s3 + $0x70] sm:$0xff] }
 0x275   : > { %9375 = vmatmul.mubr.f32.gmra.mrb[28].mxu0 %v12310_v24  ;;  %v4026_v24 = vld [vmem:[%s13540_s3 + $0x78] sm:$0xff] }
 0x276   : > { %9377 = vmatprep.mubr.f32.mxu0 %v3472_v58  ;;  %v10460_v55 = vpack.c.bf16 %v4026_v24, %v4025_v22 }
 0x278   : > { %10461 = vmatprep.subr.bf16.mxu1 %v10460_v55 }
 0x279   : > { %9378 = vmatmul.mubr.f32.gmra.mrb[30].mxu0 %v3473_v40  ;;  %10463 = vmatpush3.bf16.msra.mxu1 %v10460_v55 }
 0x27a   : > { %10465 = vmatprep.subr.bf16.mxu1 %v10464_v4 }
 0x27c   : > { %9413 = vmatmul.mubr.f32.vlgmr.msra.gmra.mrb[0].mxu1 %v12369_v56  ;;  %v10468_v56 = vpack.c.bf16 %v4383_v10, %v4382_v9 }
 0x27d   : > { %10467 = vmatpush3.bf16.msra.mxu1 %v10464_v4 }
 0x27e   : > { %10469 = vmatprep.subr.bf16.mxu1 %v10468_v56 }
 0x281   : > { %10471 = vmatpush3.bf16.msra.mxu1 %v10468_v56 }
 0x282   : > { %10473 = vmatprep.subr.bf16.mxu1 %v10472_v23 }
 0x285   : > { %10475 = vmatpush3.bf16.msra.mxu1 %v10472_v23 }
 0x286   : > { %10477 = vmatprep.subr.bf16.mxu1 %v10476_v12 }
 0x289   : > { %10479 = vmatpush3.bf16.msra.mxu1 %v10476_v12 }
 0x28a   : > { %10481 = vmatprep.subr.bf16.mxu1 %v10480_v14 }
 0x28d   : > { %10483 = vmatpush3.bf16.msra.mxu1 %v10480_v14 }
 0x28e   : > { %10485 = vmatprep.subr.bf16.mxu1 %v10484_v34 }
 0x291   : > { %10487 = vmatpush3.bf16.msra.mxu1 %v10484_v34 }
 0x292   : > { %10489 = vmatprep.subr.bf16.mxu1 %v10488_v6 }
 0x295   : > { %10491 = vmatpush3.bf16.msra.mxu1 %v10488_v6 }
 0x296   : > { %10493 = vmatprep.subr.bf16.mxu1 %v10492_v18 }
 0x299   : > { %10495 = vmatpush3.bf16.msra.mxu1 %v10492_v18 }
 0x29a   : > { %10497 = vmatprep.subr.bf16.mxu1 %v12513_v25 }
 0x310   : > { %v9334_v60 = vpop.f32.mrb[0].mxu0 }
 0x311   : > { %v12522_v27 = vadd.f32 %v9334_v60, %v12519_v26  ;;  %v3588_v28 = vpop.f32.mrb[1].mxu0 }
 0x312   : > { %v12525_v39 = vadd.f32 %v12519_v26, %v3588_v28 }
 0x313   : > { %v13589_v29 = vmax.f32 %v12522_v27, 0.0 }
 0x314   : > { %v13590_v31 = vmax.f32 %v12525_v39, 0.0  ;;  %v9337_v32 = vpop.f32.mrb[2].mxu0 }
 0x315   : > { %3877 = vst [vmem:[#allocation3 + $0x21] sm:$0xff] %v13589_v29  ;;  %v12532_v35 = vadd.f32 %v9337_v32, %v12519_v26  ;;  %v3598_v37 = vpop.f32.mrb[3].mxu0 }
 0x316   : > { %3876 = vst [vmem:[#allocation3 + $0x19] sm:$0xff] %v13590_v31  ;;  %v12537_v38 = vadd.f32 %v12519_v26, %v3598_v37 }
 0x317   : > { %v13587_v41 = vmax.f32 %v12532_v35, 0.0 }
 0x318   : > { %v13588_v45 = vmax.f32 %v12537_v38, 0.0  ;;  %v9340_v46 = vpop.f32.mrb[4].mxu0 }
 0x319   : > { %3879 = vst [vmem:[#allocation3 + $0x39] sm:$0xff] %v13587_v41  ;;  %v12544_v47 = vadd.f32 %v9340_v46, %v12519_v26  ;;  %v3608_v48 = vpop.f32.mrb[5].mxu0 }
 0x31a   : > { %3878 = vst [vmem:[#allocation3 + $0x31] sm:$0xff] %v13588_v45  ;;  %v12549_v49 = vadd.f32 %v12519_v26, %v3608_v48 }
 0x31b   : > { %v13585_v50 = vmax.f32 %v12544_v47, 0.0 }
 0x31c   : > { %v13586_v51 = vmax.f32 %v12549_v49, 0.0  ;;  %v9343_v53 = vpop.f32.mrb[6].mxu0 }
 0x31d   : > { %3881 = vst [vmem:[#allocation3 + $0x51] sm:$0xff] %v13585_v50  ;;  %v12556_v5 = vadd.f32 %v9343_v53, %v12519_v26  ;;  %v3618_v7 = vpop.f32.mrb[7].mxu0  ;;  %v12558_v57 = vld [vmem:[#allocation3 + $0x18] sm:$0xff]  ;;  %v12560_v11 = vld [vmem:[#allocation3 + $0x20] sm:$0xff] }
 0x31e   : > { %3880 = vst [vmem:[#allocation3 + $0x49] sm:$0xff] %v13586_v51  ;;  %v12565_v19 = vadd.f32 %v12519_v26, %v3618_v7  ;;  %9415 = vmatprep.mubr.f32.mxu1 %v12558_v57 }
 0x31f   : > { %v13583_v43 = vmax.f32 %v12556_v5, 0.0  ;;  %9416 = vmatmul.mubr.f32.gmra.mrb[2].mxu1 %v12560_v11 }
 0x320   : > { %v13584_v30 = vmax.f32 %v12565_v19, 0.0  ;;  %v9346_v33 = vpop.f32.mrb[8].mxu0 }
 0x321   : > { %3883 = vst [vmem:[#allocation3 + $0x69] sm:$0xff] %v13583_v43  ;;  %v12574_v58 = vadd.f32 %v9346_v33, %v12519_v26  ;;  %v3628_v40 = vpop.f32.mrb[9].mxu0  ;;  %v12576_v42 = vld [vmem:[#allocation3 + $0x30] sm:$0xff]  ;;  %v12578_v59 = vld [vmem:[#allocation3 + $0x38] sm:$0xff] }
 0x322   : > { %3882 = vst [vmem:[#allocation3 + $0x61] sm:$0xff] %v13584_v30  ;;  %v12583_v54 = vadd.f32 %v12519_v26, %v3628_v40  ;;  %9418 = vmatprep.mubr.f32.mxu1 %v12576_v42 }
 0x323   : > { %v13581_v22 = vmax.f32 %v12574_v58, 0.0  ;;  %9419 = vmatmul.mubr.f32.gmra.mrb[4].mxu1 %v12578_v59 }
 0x324   : > { %v13582_v24 = vmax.f32 %v12583_v54, 0.0  ;;  %v9349_v55 = vpop.f32.mrb[10].mxu0 }
 0x325   : > { %3885 = vst [vmem:[#allocation3 + $0x81] sm:$0xff] %v13581_v22  ;;  %v12592_v62 = vadd.f32 %v9349_v55, %v12519_v26  ;;  %v3638_v63 = vpop.f32.mrb[11].mxu0  ;;  %v12594_v3 = vld [vmem:[#allocation3 + $0x48] sm:$0xff]  ;;  %v12596_v4 = vld [vmem:[#allocation3 + $0x50] sm:$0xff] }
 0x326   : > { %3884 = vst [vmem:[#allocation3 + $0x79] sm:$0xff] %v13582_v24  ;;  %v10779_v9 = vadd.f32 %v12519_v26, %v3638_v63  ;;  %9421 = vmatprep.mubr.f32.mxu1 %v12594_v3 }
 0x327   : > { %v13580_v10 = vmax.f32 %v12592_v62, 0.0  ;;  %9422 = vmatmul.mubr.f32.gmra.mrb[6].mxu1 %v12596_v4 }
 0x328   : > { %v12604_v56 = vmax.f32 %v10779_v9, 0.0  ;;  %v9352_v20 = vpop.f32.mrb[12].mxu0 }
 0x329   : > { %3887 = vst [vmem:[#allocation3 + $0x99] sm:$0xff] %v13580_v10  ;;  %v10780_v21 = vadd.f32 %v9352_v20, %v12519_v26  ;;  %v3648_v23 = vpop.f32.mrb[13].mxu0  ;;  %v12609_v0 = vld [vmem:[#allocation3 + $0x60] sm:$0xff]  ;;  %v12611_v52 = vld [vmem:[#allocation3 + $0x68] sm:$0xff] }
 0x32a   : > { %3886 = vst [vmem:[#allocation3 + $0x91] sm:$0xff] %v12604_v56  ;;  %v10781_v12 = vadd.f32 %v12519_v26, %v3648_v23  ;;  %9424 = vmatprep.mubr.f32.mxu1 %v12609_v0 }
 0x32b   : > { %v12616_v36 = vmax.f32 %v10780_v21, 0.0  ;;  %9425 = vmatmul.mubr.f32.gmra.mrb[8].mxu1 %v12611_v52 }
 0x32c   : > { %v12619_v13 = vmax.f32 %v10781_v12, 0.0  ;;  %v9355_v14 = vpop.f32.mrb[14].mxu0 }
 0x32d   : > { %3889 = vst [vmem:[#allocation3 + $0xb1] sm:$0xff] %v12616_v36  ;;  %v10782_v61 = vadd.f32 %v9355_v14, %v12519_v26  ;;  %v3658_v44 = vpop.f32.mrb[15].mxu0  ;;  %v12623_v34 = vld [vmem:[#allocation3 + $0x78] sm:$0xff]  ;;  %v12625_v15 = vld [vmem:[#allocation3 + $0x80] sm:$0xff] }
 0x32e   : > { %3888 = vst [vmem:[#allocation3 + $0xa9] sm:$0xff] %v12619_v13  ;;  %v10783_v16 = vadd.f32 %v12519_v26, %v3658_v44  ;;  %9427 = vmatprep.mubr.f32.mxu1 %v12623_v34 }
 0x32f   : > { %v12630_v6 = vmax.f32 %v10782_v61, 0.0  ;;  %9428 = vmatmul.mubr.f32.gmra.mrb[10].mxu1 %v12625_v15 }
 0x330   : > { %v12633_v8 = vmax.f32 %v10783_v16, 0.0  ;;  %v9358_v17 = vpop.f32.mrb[16].mxu0 }
 0x331   : > { %3891 = vst [vmem:[#allocation3 + $0xc9] sm:$0xff] %v12630_v6  ;;  %v10784_v18 = vadd.f32 %v9358_v17, %v12519_v26  ;;  %v3668_v1 = vpop.f32.mrb[17].mxu0  ;;  %v12637_v2 = vld [vmem:[#allocation3 + $0x90] sm:$0xff]  ;;  %v12639_v60 = vld [vmem:[#allocation3 + $0x98] sm:$0xff] }
 0x332   : > { %3890 = vst [vmem:[#allocation3 + $0xc1] sm:$0xff] %v12633_v8  ;;  %v10785_v28 = vadd.f32 %v12519_v26, %v3668_v1  ;;  %9430 = vmatprep.mubr.f32.mxu1 %v12637_v2 }
 0x333   : > { %v12644_v32 = vmax.f32 %v10784_v18, 0.0  ;;  %9431 = vmatmul.mubr.f32.gmra.mrb[12].mxu1 %v12639_v60 }
 0x334   : > { %v12647_v37 = vmax.f32 %v10785_v28, 0.0  ;;  %v9361_v46 = vpop.f32.mrb[18].mxu0 }
 0x335   : > { %3893 = vst [vmem:[#allocation3 + $0xe1] sm:$0xff] %v12644_v32  ;;  %v10786_v48 = vadd.f32 %v9361_v46, %v12519_v26  ;;  %v3678_v53 = vpop.f32.mrb[19].mxu0  ;;  %v12651_v7 = vld [vmem:[#allocation3 + $0xa8] sm:$0xff]  ;;  %v12653_v33 = vld [vmem:[#allocation3 + $0xb0] sm:$0xff] }
 0x336   : > { %3892 = vst [vmem:[#allocation3 + $0xd9] sm:$0xff] %v12647_v37  ;;  %v10787_v40 = vadd.f32 %v12519_v26, %v3678_v53  ;;  %9433 = vmatprep.mubr.f32.mxu1 %v12651_v7 }
 0x337   : > { %v12658_v55 = vmax.f32 %v10786_v48, 0.0  ;;  %9434 = vmatmul.mubr.f32.gmra.mrb[14].mxu1 %v12653_v33 }
 0x338   : > { %v12661_v63 = vmax.f32 %v10787_v40, 0.0  ;;  %v9364_v9 = vpop.f32.mrb[20].mxu0 }
 0x339   : > { %3895 = vst [vmem:[#allocation3 + $0xf9] sm:$0xff] %v12658_v55  ;;  %v10788_v20 = vadd.f32 %v9364_v9, %v12519_v26  ;;  %v3688_v21 = vpop.f32.mrb[21].mxu0  ;;  %v12665_v23 = vld [vmem:[#allocation3 + $0xc0] sm:$0xff]  ;;  %v12667_v12 = vld [vmem:[#allocation3 + $0xc8] sm:$0xff] }
 0x33a   : > { %3894 = vst [vmem:[#allocation3 + $0xf1] sm:$0xff] %v12661_v63  ;;  %v10789_v14 = vadd.f32 %v12519_v26, %v3688_v21  ;;  %9436 = vmatprep.mubr.f32.mxu1 %v12665_v23 }
 0x33b   : > { %v12672_v61 = vmax.f32 %v10788_v20, 0.0  ;;  %9437 = vmatmul.mubr.f32.gmra.mrb[16].mxu1 %v12667_v12 }
 0x33c   : > { %v12675_v44 = vmax.f32 %v10789_v14, 0.0  ;;  %v9367_v16 = vpop.f32.mrb[22].mxu0 }
 0x33d   : > { %3897 = vst [vmem:[#allocation3 + $0x111] sm:$0xff] %v12672_v61  ;;  %v10790_v17 = vadd.f32 %v9367_v16, %v12519_v26  ;;  %v3698_v18 = vpop.f32.mrb[23].mxu0  ;;  %v12679_v1 = vld [vmem:[#allocation3 + $0xd8] sm:$0xff]  ;;  %v12681_v28 = vld [vmem:[#allocation3 + $0xe0] sm:$0xff] }
 0x33e   : > { %3896 = vst [vmem:[#allocation3 + $0x109] sm:$0xff] %v12675_v44  ;;  %v10791_v46 = vadd.f32 %v12519_v26, %v3698_v18  ;;  %9439 = vmatprep.mubr.f32.mxu1 %v12679_v1 }
 0x33f   : > { %v12686_v48 = vmax.f32 %v10790_v17, 0.0  ;;  %9440 = vmatmul.mubr.f32.gmra.mrb[18].mxu1 %v12681_v28 }
 0x340   : > { %v12689_v53 = vmax.f32 %v10791_v46, 0.0  ;;  %v9370_v40 = vpop.f32.mrb[24].mxu0 }
 0x341   : > { %3899 = vst [vmem:[#allocation3 + $0x129] sm:$0xff] %v12686_v48  ;;  %v10792_v9 = vadd.f32 %v9370_v40, %v12519_v26  ;;  %v3708_v20 = vpop.f32.mrb[25].mxu0  ;;  %v12693_v21 = vld [vmem:[#allocation3 + $0xf0] sm:$0xff]  ;;  %v12695_v14 = vld [vmem:[#allocation3 + $0xf8] sm:$0xff] }
 0x342   : > { %3898 = vst [vmem:[#allocation3 + $0x121] sm:$0xff] %v12689_v53  ;;  %v10793_v16 = vadd.f32 %v12519_v26, %v3708_v20  ;;  %9442 = vmatprep.mubr.f32.mxu1 %v12693_v21 }
 0x343   : > { %v12700_v17 = vmax.f32 %v10792_v9, 0.0  ;;  %9443 = vmatmul.mubr.f32.gmra.mrb[20].mxu1 %v12695_v14 }
 0x344   : > { %v12703_v18 = vmax.f32 %v10793_v16, 0.0  ;;  %v9373_v46 = vpop.f32.mrb[26].mxu0 }
 0x345   : > { %3901 = vst [vmem:[#allocation3 + $0x141] sm:$0xff] %v12700_v17  ;;  %v10794_v40 = vadd.f32 %v9373_v46, %v12519_v26  ;;  %v3718_v10 = vpop.f32.mrb[27].mxu0  ;;  %v12707_v22 = vld [vmem:[#allocation3 + $0x108] sm:$0xff]  ;;  %v12709_v24 = vld [vmem:[#allocation3 + $0x110] sm:$0xff] }
 0x346   : > { %3900 = vst [vmem:[#allocation3 + $0x139] sm:$0xff] %v12703_v18  ;;  %v10795_v20 = vadd.f32 %v12519_v26, %v3718_v10  ;;  %9445 = vmatprep.mubr.f32.mxu1 %v12707_v22 }
 0x347   : > { %v12714_v9 = vmax.f32 %v10794_v40, 0.0  ;;  %9446 = vmatmul.mubr.f32.gmra.mrb[22].mxu1 %v12709_v24 }
 0x348   : > { %v12717_v16 = vmax.f32 %v10795_v20, 0.0  ;;  %v9376_v43 = vpop.f32.mrb[28].mxu0 }
 0x349   : > { %3903 = vst [vmem:[#allocation3 + $0x159] sm:$0xff] %v12714_v9  ;;  %v10796_v46 = vadd.f32 %v9376_v43, %v12519_v26  ;;  %v3728_v30 = vpop.f32.mrb[29].mxu0  ;;  %v12721_v50 = vld [vmem:[#allocation3 + $0x120] sm:$0xff]  ;;  %v12723_v51 = vld [vmem:[#allocation3 + $0x128] sm:$0xff] }
 0x34a   : > { %13688 = vst [vmem:[#allocation9_spill] sm:$0xff] %v12723_v51  ;;  %3902 = vst [vmem:[#allocation3 + $0x151] sm:$0xff] %v12717_v16  ;;  %v10797_v10 = vadd.f32 %v12519_v26, %v3728_v30  ;;  %9448 = vmatprep.mubr.f32.mxu1 %v12721_v50 }
 0x34b   : > { %v12728_v40 = vmax.f32 %v10796_v46, 0.0  ;;  %9449 = vmatmul.mubr.f32.gmra.mrb[24].mxu1 %v12723_v51 }
 0x34c   : > { %v12731_v20 = vmax.f32 %v10797_v10, 0.0  ;;  %v9379_v41 = vpop.f32.mrb[30].mxu0 }
 0x34d   : > { %3905 = vst [vmem:[#allocation3 + $0x171] sm:$0xff] %v12728_v40  ;;  %v12735_v43 = vadd.f32 %v9379_v41, %v12519_v26  ;;  %v3738_v45 = vpop.f32.mrb[31].mxu0  ;;  %v12737_v29 = vld [vmem:[#allocation3 + $0x138] sm:$0xff]  ;;  %v12739_v31 = vld [vmem:[#allocation3 + $0x140] sm:$0xff] }
 0x34e   : > { %13690 = vst [vmem:[#allocation11_spill] sm:$0xff] %v12737_v29  ;;  %13691 = vst [vmem:[#allocation12_spill] sm:$0xff] %v12739_v31  ;;  %v12743_v30 = vadd.f32 %v12519_v26, %v3738_v45  ;;  %9451 = vmatprep.mubr.f32.mxu1 %v12737_v29 }
 0x34f   : > { %13689 = vst [vmem:[#allocation10_spill] sm:$0xff] %v12735_v43  ;;  %3904 = vst [vmem:[#allocation3 + $0x169] sm:$0xff] %v12731_v20  ;;  %v13593_v46 = vmax.f32 %v12735_v43, 0.0  ;;  %9452 = vmatmul.mubr.f32.gmra.mrb[26].mxu1 %v12739_v31  ;;  %v4316_v31 = vld [vmem:[#allocation3 + $0x1] sm:$0xff] }
 0x350   : > { %13692 = vst [vmem:[#allocation13_spill] sm:$0xff] %v12743_v30  ;;  %v13595_v10 = vmax.f32 %v12743_v30, 0.0  ;;  %v4752_v43 = vld [vmem:[%s13540_s3 + $0x118] sm:$0xff] }
 0x351   : > { %3907 = vst [vmem:[#allocation3 + $0x189] sm:$0xff] %v13593_v46  ;;  %v12751_v41 = vld [vmem:[#allocation3 + $0x150] sm:$0xff]  ;;  %v12753_v51 = vld [vmem:[#allocation3 + $0x158] sm:$0xff]  ;;  %v4751_v46 = vld [vmem:[%s13540_s3 + $0x110] sm:$0xff] }
 0x352   : > { %13693 = vst [vmem:[#allocation7_spill] sm:$0xff] %v12751_v41  ;;  %13694 = vst [vmem:[#allocation8_spill] sm:$0xff] %v12753_v51  ;;  %9454 = vmatprep.mubr.f32.mxu1 %v12751_v41  ;;  %v10500_v30 = vpack.c.bf16 %v4752_v43, %v4751_v46  ;;  %v13696_v41 = vmax.f32 %v12525_v39, 0.0  ;;  %v4756_v43 = vld [vmem:[%s13540_s3 + $0x138] sm:$0xff]  ;;  %v13697_v46 = vmax.f32 %v12522_v27, 0.0  ;;  %v13700_v27 = vmax.f32 %v12549_v49, 0.0 }
 0x353   : > { %3906 = vst [vmem:[#allocation3 + $0x181] sm:$0xff] %v13595_v10  ;;  %9455 = vmatmul.mubr.f32.gmra.mrb[28].mxu1 %v12753_v51  ;;  %v4317_v10 = vld [vmem:[#allocation3 + $0x9] sm:$0xff] }
 0x354   : > { %v4753_v51 = vld [vmem:[%s13540_s3 + $0x120] sm:$0xff] }
 0x356   : > { %v12759_v26 = vld [vmem:[#allocation3 + $0x168] sm:$0xff]  ;;  %v12761_v45 = vld [vmem:[#allocation3 + $0x170] sm:$0xff] }
 0x357   : > { %13695 = vst [vmem:[#allocation14_spill] sm:$0xff] %v12759_v26  ;;  %9457 = vmatprep.mubr.f32.mxu1 %v12759_v26  ;;  %v4754_v26 = vld [vmem:[%s13540_s3 + $0x128] sm:$0xff] }
 0x358   : > { %9458 = vmatmul.mubr.f32.gmra.mrb[30].mxu1 %v12761_v45  ;;  %v10504_v29 = vpack.c.bf16 %v4754_v26, %v4753_v51  ;;  %v4758_v51 = vld [vmem:[%s13540_s3 + $0x148] sm:$0xff]  ;;  %v4760_v26 = vld [vmem:[%s13540_s3 + $0x158] sm:$0xff] }
 0x359   : > { %9492 = vmatprep.mubr.f32.mxu1 %v4316_v31  ;;  %v4755_v31 = vld [vmem:[%s13540_s3 + $0x130] sm:$0xff] }
 0x35a   : > { %v10508_v39 = vpack.c.bf16 %v4756_v43, %v4755_v31  ;;  %v13701_v31 = vmax.f32 %v12544_v47, 0.0  ;;  %v4762_v43 = vld [vmem:[%s13540_s3 + $0x168] sm:$0xff]  ;;  %v13704_v47 = vmax.f32 %v12583_v54, 0.0  ;;  %v5118_v54 = vld [vmem:[%s13540_s3 + $0x180] sm:$0xff] }
 0x35c   : > { %9493 = vmatmul.mubr.f32.vlgmr.msra.gmra.mrb[0].mxu1 %v4317_v10  ;;  %v13698_v10 = vmax.f32 %v12537_v38, 0.0 }
 0x35d   : > { %9495 = vmatprep.mubr.f32.mxu1 %v13696_v41  ;;  %10499 = vmatpush3.bf16.msra.mxu1 %v12513_v25  ;;  %v4757_v25 = vld [vmem:[%s13540_s3 + $0x140] sm:$0xff]  ;;  %v13699_v41 = vmax.f32 %v12532_v35, 0.0  ;;  %v13702_v35 = vmax.f32 %v12565_v19, 0.0 }
 0x35e   : > { %10501 = vmatprep.subr.bf16.mxu1 %v10500_v30  ;;  %v10512_v38 = vpack.c.bf16 %v4758_v51, %v4757_v25  ;;  %v13705_v25 = vmax.f32 %v12574_v58, 0.0  ;;  %v5119_v51 = vld [vmem:[%s13540_s3 + $0x188] sm:$0xff] }
 0x35f   : > { %v10528_v58 = vpack.c.bf16 %v5119_v51, %v5118_v54  ;;  %v12891_v54 = vld [vmem:[#allocation3 + $0x4a] sm:$0xff] }
 0x360   : > { %9496 = vmatmul.mubr.f32.gmra.mrb[2].mxu1 %v13697_v46  ;;  %v13703_v46 = vmax.f32 %v12556_v5, 0.0 }
 0x361   : > { %9498 = vmatprep.mubr.f32.mxu1 %v13698_v10  ;;  %10503 = vmatpush3.bf16.msra.mxu1 %v10500_v30  ;;  %v4759_v30 = vld [vmem:[%s13540_s3 + $0x150] sm:$0xff] }
 0x362   : > { %10505 = vmatprep.subr.bf16.mxu1 %v10504_v29  ;;  %v10516_v49 = vpack.c.bf16 %v4760_v26, %v4759_v30  ;;  %v4763_v10 = vld [vmem:[%s13540_s3 + $0x170] sm:$0xff]  ;;  %v4686_v30 = vld [vmem:[#allocation3 + $0xa] sm:$0xff] }
 0x364   : > { %9499 = vmatmul.mubr.f32.gmra.mrb[4].mxu1 %v13699_v41  ;;  %v13706_v41 = vmax.f32 %v12592_v62, 0.0  ;;  %v4685_v62 = vld [vmem:[#allocation3 + $0x2] sm:$0xff] }
 0x365   : > { %9501 = vmatprep.mubr.f32.mxu1 %v13700_v27  ;;  %10507 = vmatpush3.bf16.msra.mxu1 %v10504_v29  ;;  %v4761_v29 = vld [vmem:[%s13540_s3 + $0x160] sm:$0xff]  ;;  %v5120_v27 = vld [vmem:[%s13540_s3 + $0x190] sm:$0xff] }
 0x366   : > { %10509 = vmatprep.subr.bf16.mxu1 %v10508_v39  ;;  %v10520_v19 = vpack.c.bf16 %v4762_v43, %v4761_v29  ;;  %v12870_v43 = vld [vmem:[#allocation3 + $0x22] sm:$0xff] }
 0x368   : > { %9502 = vmatmul.mubr.f32.gmra.mrb[6].mxu1 %v13701_v31  ;;  %v5122_v31 = vld [vmem:[%s13540_s3 + $0x1a0] sm:$0xff] }
 0x369   : > { %9504 = vmatprep.mubr.f32.mxu1 %v13702_v35  ;;  %10511 = vmatpush3.bf16.msra.mxu1 %v10508_v39  ;;  %v4764_v39 = vld [vmem:[%s13540_s3 + $0x178] sm:$0xff]  ;;  %v5123_v35 = vld [vmem:[%s13540_s3 + $0x1a8] sm:$0xff] }
 0x36a   : > { %10513 = vmatprep.subr.bf16.mxu1 %v10512_v38  ;;  %v10524_v5 = vpack.c.bf16 %v4764_v39, %v4763_v10  ;;  %v10536_v29 = vpack.c.bf16 %v5123_v35, %v5122_v31  ;;  %v12882_v39 = vld [vmem:[#allocation3 + $0x3a] sm:$0xff] }
 0x36b   : > { %v5131_v31 = vld [vmem:[%s13540_s3 + $0x1e8] sm:$0xff] }
 0x36c   : > { %9505 = vmatmul.mubr.f32.gmra.mrb[8].mxu1 %v13703_v46  ;;  %v5124_v46 = vld [vmem:[%s13540_s3 + $0x1b0] sm:$0xff] }
 0x36d   : > { %9507 = vmatprep.mubr.f32.mxu1 %v13704_v47  ;;  %10515 = vmatpush3.bf16.msra.mxu1 %v10512_v38  ;;  %v5121_v38 = vld [vmem:[%s13540_s3 + $0x198] sm:$0xff]  ;;  %v12915_v35 = vld [vmem:[#allocation3 + $0x7a] sm:$0xff] }
 0x36e   : > { %10517 = vmatprep.subr.bf16.mxu1 %v10516_v49  ;;  %v10532_v26 = vpack.c.bf16 %v5121_v38, %v5120_v27  ;;  %v5125_v47 = vld [vmem:[%s13540_s3 + $0x1b8] sm:$0xff] }
 0x36f   : > { %v10540_v10 = vpack.c.bf16 %v5125_v47, %v5124_v46  ;;  %v12903_v27 = vld [vmem:[#allocation3 + $0x62] sm:$0xff] }
 0x370   : > { %9508 = vmatmul.mubr.f32.gmra.mrb[10].mxu1 %v13705_v25  ;;  %v5126_v25 = vld [vmem:[%s13540_s3 + $0x1c0] sm:$0xff]  ;;  %v12918_v46 = vld [vmem:[#allocation3 + $0x82] sm:$0xff] }
 0x371   : > { %9510 = vmatprep.mubr.f32.mxu1 %v12604_v56  ;;  %10519 = vmatpush3.bf16.msra.mxu1 %v10516_v49  ;;  %v12867_v49 = vld [vmem:[#allocation3 + $0x1a] sm:$0xff] }
 0x372   : > { %10521 = vmatprep.subr.bf16.mxu1 %v10520_v19  ;;  %v5132_v47 = vld [vmem:[%s13540_s3 + $0x1f0] sm:$0xff] }
 0x374   : > { %9511 = vmatmul.mubr.f32.gmra.mrb[12].mxu1 %v13706_v41  ;;  %v12894_v41 = vld [vmem:[#allocation3 + $0x52] sm:$0xff] }
 0x375   : > { %9513 = vmatprep.mubr.f32.mxu1 %v12619_v13  ;;  %10523 = vmatpush3.bf16.msra.mxu1 %v10520_v19  ;;  %v12879_v19 = vld [vmem:[#allocation3 + $0x32] sm:$0xff] }
 0x376   : > { %10525 = vmatprep.subr.bf16.mxu1 %v10524_v5 }
 0x378   : > { %9514 = vmatmul.mubr.f32.gmra.mrb[14].mxu1 %v12616_v36 }
 0x379   : > { %9516 = vmatprep.mubr.f32.mxu1 %v12633_v8  ;;  %10527 = vmatpush3.bf16.msra.mxu1 %v10524_v5  ;;  %v5127_v5 = vld [vmem:[%s13540_s3 + $0x1c8] sm:$0xff] }
 0x37a   : > { %10529 = vmatprep.subr.bf16.mxu1 %v10528_v58  ;;  %v10544_v51 = vpack.c.bf16 %v5127_v5, %v5126_v25  ;;  %v12927_v25 = vld [vmem:[#allocation3 + $0x92] sm:$0xff] }
 0x37c   : > { %9517 = vmatmul.mubr.f32.gmra.mrb[16].mxu1 %v12630_v6 }
 0x37d   : > { %9519 = vmatprep.mubr.f32.mxu1 %v12647_v37 }
 0x380   : > { %9520 = vmatmul.mubr.f32.gmra.mrb[18].mxu1 %v12644_v32 }
 0x381   : > { %9522 = vmatprep.mubr.f32.mxu1 %v12661_v63 }
 0x384   : > { %9523 = vmatmul.mubr.f32.gmra.mrb[20].mxu1 %v12658_v55 }
 0x385   : > { %9525 = vmatprep.mubr.f32.mxu1 %v12675_v44 }
 0x388   : > { %9526 = vmatmul.mubr.f32.gmra.mrb[22].mxu1 %v12672_v61 }
 0x389   : > { %9528 = vmatprep.mubr.f32.mxu1 %v12689_v53 }
 0x38c   : > { %9529 = vmatmul.mubr.f32.gmra.mrb[24].mxu1 %v12686_v48 }
 0x38d   : > { %9531 = vmatprep.mubr.f32.mxu1 %v12703_v18 }
 0x390   : > { %9532 = vmatmul.mubr.f32.gmra.mrb[26].mxu1 %v12700_v17 }
 0x391   : > { %9534 = vmatprep.mubr.f32.mxu1 %v12717_v16 }
 0x394   : > { %9535 = vmatmul.mubr.f32.gmra.mrb[28].mxu1 %v12714_v9 }
 0x395   : > { %9537 = vmatprep.mubr.f32.mxu1 %v12731_v20 }
 0x398   : > { %9538 = vmatmul.mubr.f32.gmra.mrb[30].mxu1 %v12728_v40 }
 0x399   : > { %9572 = vmatprep.mubr.f32.mxu1 %v4685_v62  ;;  %v5129_v62 = vld [vmem:[%s13540_s3 + $0x1d8] sm:$0xff] }
 0x39c   : > { %9573 = vmatmul.mubr.f32.vlgmr.msra.gmra.mrb[0].mxu1 %v4686_v30  ;;  %v12906_v30 = vld [vmem:[#allocation3 + $0x6a] sm:$0xff] }
 0x39d   : > { %9575 = vmatprep.mubr.f32.mxu1 %v12867_v49  ;;  %10531 = vmatpush3.bf16.msra.mxu1 %v10528_v58  ;;  %v5128_v58 = vld [vmem:[%s13540_s3 + $0x1d0] sm:$0xff] }
 0x39e   : > { %10533 = vmatprep.subr.bf16.mxu1 %v10532_v26  ;;  %v10548_v38 = vpack.c.bf16 %v5129_v62, %v5128_v58  ;;  %v5487_v58 = vld [vmem:[%s13540_s3 + $0x200] sm:$0xff]  ;;  %v5488_v62 = vld [vmem:[%s13540_s3 + $0x208] sm:$0xff] }
 0x3a0   : > { %9576 = vmatmul.mubr.f32.gmra.mrb[2].mxu1 %v12870_v43 }
 0x3a1   : > { %9578 = vmatprep.mubr.f32.mxu1 %v12879_v19  ;;  %10535 = vmatpush3.bf16.msra.mxu1 %v10532_v26  ;;  %v5130_v26 = vld [vmem:[%s13540_s3 + $0x1e0] sm:$0xff] }
 0x3a2   : > { %10537 = vmatprep.subr.bf16.mxu1 %v10536_v29 }
 0x3a4   : > { %9579 = vmatmul.mubr.f32.gmra.mrb[4].mxu1 %v12882_v39 }
 0x3a5   : > { %9581 = vmatprep.mubr.f32.mxu1 %v12891_v54  ;;  %10539 = vmatpush3.bf16.msra.mxu1 %v10536_v29  ;;  %v10552_v29 = vpack.c.bf16 %v5131_v31, %v5130_v26  ;;  %v12939_v26 = vld [vmem:[#allocation3 + $0xaa] sm:$0xff]  ;;  %v12942_v31 = vld [vmem:[#allocation3 + $0xb2] sm:$0xff] }
 0x3a6   : > { %10541 = vmatprep.subr.bf16.mxu1 %v10540_v10 }
 0x3a8   : > { %9582 = vmatmul.mubr.f32.gmra.mrb[6].mxu1 %v12894_v41 }
 0x3a9   : > { %9584 = vmatprep.mubr.f32.mxu1 %v12903_v27  ;;  %10543 = vmatpush3.bf16.msra.mxu1 %v10540_v10  ;;  %v5133_v10 = vld [vmem:[%s13540_s3 + $0x1f8] sm:$0xff] }
 0x3aa   : > { %10545 = vmatprep.subr.bf16.mxu1 %v10544_v51  ;;  %v10556_v5 = vpack.c.bf16 %v5133_v10, %v5132_v47  ;;  %v12945_v47 = vld [vmem:[#allocation3 + $0xc2] sm:$0xff]  ;;  %v12948_v10 = vld [vmem:[#allocation3 + $0xca] sm:$0xff] }
 0x3ab   : > { %13708 = vst [vmem:[#allocation16_spill] sm:$0xff] %v12945_v47  ;;  %13709 = vst [vmem:[#allocation17_spill] sm:$0xff] %v12948_v10 }
 0x3ac   : > { %9585 = vmatmul.mubr.f32.gmra.mrb[8].mxu1 %v12906_v30 }
 0x3ad   : > { %9587 = vmatprep.mubr.f32.mxu1 %v12915_v35  ;;  %10547 = vmatpush3.bf16.msra.mxu1 %v10544_v51  ;;  %v12930_v51 = vld [vmem:[#allocation3 + $0x9a] sm:$0xff] }
 0x3ae   : > { %10549 = vmatprep.subr.bf16.mxu1 %v10548_v38  ;;  %13707 = vst [vmem:[#allocation15_spill] sm:$0xff] %v12930_v51 }
 0x3b0   : > { %9588 = vmatmul.mubr.f32.gmra.mrb[10].mxu1 %v12918_v46 }
 0x3b1   : > { %9590 = vmatprep.mubr.f32.mxu1 %v12927_v25  ;;  %10551 = vmatpush3.bf16.msra.mxu1 %v10548_v38  ;;  %v10560_v38 = vpack.c.bf16 %v5488_v62, %v5487_v58  ;;  %v12957_v58 = vld [vmem:[#allocation3 + $0xf2] sm:$0xff]  ;;  %v12960_v62 = vld [vmem:[#allocation3 + $0xfa] sm:$0xff] }
 0x3b2   : > { %10553 = vmatprep.subr.bf16.mxu1 %v10552_v29  ;;  %13712 = vst [vmem:[#allocation20_spill] sm:$0xff] %v12957_v58  ;;  %13713 = vst [vmem:[#allocation21_spill] sm:$0xff] %v12960_v62 }
 0x3b4   : > { %9591 = vmatmul.mubr.f32.gmra.mrb[12].mxu1 %v12930_v51  ;;  %v12951_v51 = vld [vmem:[#allocation3 + $0xda] sm:$0xff] }
 0x3b5   : > { %9593 = vmatprep.mubr.f32.mxu1 %v12939_v26  ;;  %10555 = vmatpush3.bf16.msra.mxu1 %v10552_v29  ;;  %13710 = vst [vmem:[#allocation18_spill] sm:$0xff] %v12951_v51  ;;  %v12954_v29 = vld [vmem:[#allocation3 + $0xe2] sm:$0xff] }
 0x3b6   : > { %10557 = vmatprep.subr.bf16.mxu1 %v10556_v5  ;;  %13711 = vst [vmem:[#allocation19_spill] sm:$0xff] %v12954_v29 }
 0x3b8   : > { %9594 = vmatmul.mubr.f32.gmra.mrb[14].mxu1 %v12942_v31 }
 0x3b9   : > { %9596 = vmatprep.mubr.f32.mxu1 %v12945_v47  ;;  %10559 = vmatpush3.bf16.msra.mxu1 %v10556_v5  ;;  %v12963_v5 = vld [vmem:[#allocation3 + $0x10a] sm:$0xff] }
 0x3ba   : > { %10561 = vmatprep.subr.bf16.mxu1 %v10560_v38  ;;  %13714 = vst [vmem:[#allocation22_spill] sm:$0xff] %v12963_v5 }
 0x3bc   : > { %9597 = vmatmul.mubr.f32.gmra.mrb[16].mxu1 %v12948_v10  ;;  %v12966_v10 = vld [vmem:[#allocation3 + $0x112] sm:$0xff] }
 0x3bd   : > { %9599 = vmatprep.mubr.f32.mxu1 %v12951_v51  ;;  %13715 = vst [vmem:[#allocation23_spill] sm:$0xff] %v12966_v10  ;;  %v12969_v51 = vld [vmem:[#allocation3 + $0x122] sm:$0xff] }
 0x3be   : > { %13716 = vst [vmem:[#allocation24_spill] sm:$0xff] %v12969_v51 }
 0x3c0   : > { %9600 = vmatmul.mubr.f32.gmra.mrb[18].mxu1 %v12954_v29  ;;  %v12972_v29 = vld [vmem:[#allocation3 + $0x12a] sm:$0xff] }
 0x3c1   : > { %9602 = vmatprep.mubr.f32.mxu1 %v12957_v58  ;;  %13717 = vst [vmem:[#allocation25_spill] sm:$0xff] %v12972_v29  ;;  %v12975_v58 = vld [vmem:[#allocation3 + $0x13a] sm:$0xff] }
 0x3c2   : > { %13718 = vst [vmem:[#allocation26_spill] sm:$0xff] %v12975_v58 }
 0x3c4   : > { %9603 = vmatmul.mubr.f32.gmra.mrb[20].mxu1 %v12960_v62  ;;  %v12978_v62 = vld [vmem:[#allocation3 + $0x142] sm:$0xff] }
 0x3c5   : > { %9605 = vmatprep.mubr.f32.mxu1 %v12963_v5  ;;  %13719 = vst [vmem:[#allocation27_spill] sm:$0xff] %v12978_v62  ;;  %v12981_v5 = vld [vmem:[#allocation3 + $0x152] sm:$0xff] }
 0x3c6   : > { %13720 = vst [vmem:[#allocation28_spill] sm:$0xff] %v12981_v5 }
 0x3c8   : > { %9606 = vmatmul.mubr.f32.gmra.mrb[22].mxu1 %v12966_v10  ;;  %v12984_v10 = vld [vmem:[#allocation3 + $0x15a] sm:$0xff] }
 0x3c9   : > { %9608 = vmatprep.mubr.f32.mxu1 %v12969_v51  ;;  %13721 = vst [vmem:[#allocation29_spill] sm:$0xff] %v12984_v10  ;;  %v12987_v51 = vld [vmem:[#allocation3 + $0x16a] sm:$0xff] }
 0x3ca   : > { %13722 = vst [vmem:[#allocation30_spill] sm:$0xff] %v12987_v51 }
 0x3cc   : > { %9609 = vmatmul.mubr.f32.gmra.mrb[24].mxu1 %v12972_v29  ;;  %v12990_v29 = vld [vmem:[#allocation3 + $0x172] sm:$0xff] }
 0x3cd   : > { %9611 = vmatprep.mubr.f32.mxu1 %v12975_v58  ;;  %v5489_v58 = vld [vmem:[%s13540_s3 + $0x210] sm:$0xff] }
 0x3d0   : > { %9612 = vmatmul.mubr.f32.gmra.mrb[26].mxu1 %v12978_v62  ;;  %v5490_v62 = vld [vmem:[%s13540_s3 + $0x218] sm:$0xff] }
 0x3d1   : > { %9614 = vmatprep.mubr.f32.mxu1 %v12981_v5  ;;  %v10564_v5 = vpack.c.bf16 %v5490_v62, %v5489_v58  ;;  %v5494_v58 = vld [vmem:[%s13540_s3 + $0x238] sm:$0xff]  ;;  %v5857_v62 = vld [vmem:[%s13540_s3 + $0x288] sm:$0xff] }
 0x3d4   : > { %9615 = vmatmul.mubr.f32.gmra.mrb[28].mxu1 %v12984_v10  ;;  %v5491_v10 = vld [vmem:[%s13540_s3 + $0x220] sm:$0xff] }
 0x3d5   : > { %9617 = vmatprep.mubr.f32.mxu1 %v12987_v51  ;;  %v5492_v51 = vld [vmem:[%s13540_s3 + $0x228] sm:$0xff] }
 0x3d6   : > { %v10568_v47 = vpack.c.bf16 %v5492_v51, %v5491_v10  ;;  %v5496_v51 = vld [vmem:[%s13540_s3 + $0x248] sm:$0xff]  ;;  %v5502_v10 = vld [vmem:[%s13540_s3 + $0x278] sm:$0xff] }
 0x3d8   : > { %9618 = vmatmul.mubr.f32.gmra.mrb[30].mxu1 %v12990_v29 }
 0x3d9   : > { %9652 = vmatprep.mubr.f32.mxu1 %v12558_v57  ;;  %v5493_v57 = vld [vmem:[%s13540_s3 + $0x230] sm:$0xff] }
 0x3dc   : > { %9653 = vmatmul.mubr.f32.vlgmr.msra.gmra.mrb[0].mxu1 %v12560_v11  ;;  %v10572_v11 = vpack.c.bf16 %v5494_v58, %v5493_v57  ;;  %v5860_v57 = vld [vmem:[%s13540_s3 + $0x2a0] sm:$0xff]  ;;  %v5861_v58 = vld [vmem:[%s13540_s3 + $0x2a8] sm:$0xff] }
 0x3dd   : > { %9655 = vmatprep.mubr.f32.mxu1 %v12576_v42  ;;  %10563 = vmatpush3.bf16.msra.mxu1 %v10560_v38  ;;  %v5495_v42 = vld [vmem:[%s13540_s3 + $0x240] sm:$0xff]  ;;  %v5498_v38 = vld [vmem:[%s13540_s3 + $0x258] sm:$0xff] }
 0x3de   : > { %10565 = vmatprep.subr.bf16.mxu1 %v10564_v5 }
 0x3e0   : > { %9656 = vmatmul.mubr.f32.gmra.mrb[2].mxu1 %v12578_v59  ;;  %v10576_v59 = vpack.c.bf16 %v5496_v51, %v5495_v42  ;;  %v10600_v42 = vpack.c.bf16 %v5861_v58, %v5860_v57  ;;  %v13092_v51 = vld [vmem:[#allocation3 + $0x39] sm:$0xff] }
 0x3e1   : > { %9658 = vmatprep.mubr.f32.mxu1 %v12594_v3  ;;  %10567 = vmatpush3.bf16.msra.mxu1 %v10564_v5  ;;  %v5497_v3 = vld [vmem:[%s13540_s3 + $0x250] sm:$0xff]  ;;  %v13735_v58 = vld [vmem:[#allocation17_spill] sm:$0xff] }
 0x3e2   : > { %10569 = vmatprep.subr.bf16.mxu1 %v10568_v47 }
 0x3e4   : > { %9659 = vmatmul.mubr.f32.gmra.mrb[4].mxu1 %v12596_v4  ;;  %v10580_v4 = vpack.c.bf16 %v5498_v38, %v5497_v3  ;;  %v5863_v3 = vld [vmem:[%s13540_s3 + $0x2b8] sm:$0xff] }
 0x3e5   : > { %9661 = vmatprep.mubr.f32.mxu1 %v12609_v0  ;;  %10571 = vmatpush3.bf16.msra.mxu1 %v10568_v47  ;;  %v5499_v0 = vld [vmem:[%s13540_s3 + $0x260] sm:$0xff]  ;;  %v5500_v47 = vld [vmem:[%s13540_s3 + $0x268] sm:$0xff] }
 0x3e6   : > { %10573 = vmatprep.subr.bf16.mxu1 %v10572_v11  ;;  %v13101_v38 = vld [vmem:[#allocation3 + $0x49] sm:$0xff] }
 0x3e8   : > { %9662 = vmatmul.mubr.f32.gmra.mrb[6].mxu1 %v12611_v52  ;;  %v10584_v52 = vpack.c.bf16 %v5500_v47, %v5499_v0  ;;  %v13104_v0 = vld [vmem:[#allocation3 + $0x51] sm:$0xff] }
 0x3e9   : > { %9664 = vmatprep.mubr.f32.mxu1 %v12623_v34  ;;  %10575 = vmatpush3.bf16.msra.mxu1 %v10572_v11  ;;  %v5501_v34 = vld [vmem:[%s13540_s3 + $0x270] sm:$0xff]  ;;  %v13089_v11 = vld [vmem:[#allocation3 + $0x31] sm:$0xff] }
 0x3ea   : > { %10577 = vmatprep.subr.bf16.mxu1 %v10576_v59  ;;  %v5864_v47 = vld [vmem:[%s13540_s3 + $0x2c0] sm:$0xff] }
 0x3ec   : > { %9665 = vmatmul.mubr.f32.gmra.mrb[8].mxu1 %v12625_v15  ;;  %v10588_v15 = vpack.c.bf16 %v5502_v10, %v5501_v34  ;;  %v13113_v34 = vld [vmem:[#allocation3 + $0x61] sm:$0xff] }
 0x3ed   : > { %9667 = vmatprep.mubr.f32.mxu1 %v12637_v2  ;;  %10579 = vmatpush3.bf16.msra.mxu1 %v10576_v59  ;;  %v5856_v2 = vld [vmem:[%s13540_s3 + $0x280] sm:$0xff]  ;;  %v5862_v59 = vld [vmem:[%s13540_s3 + $0x2b0] sm:$0xff] }
 0x3ee   : > { %10581 = vmatprep.subr.bf16.mxu1 %v10580_v4 }
 0x3f0   : > { %9668 = vmatmul.mubr.f32.gmra.mrb[10].mxu1 %v12639_v60  ;;  %v10592_v60 = vpack.c.bf16 %v5857_v62, %v5856_v2  ;;  %v5866_v2 = vld [vmem:[%s13540_s3 + $0x2d0] sm:$0xff]  ;;  %v5867_v62 = vld [vmem:[%s13540_s3 + $0x2d8] sm:$0xff] }
 0x3f1   : > { %9670 = vmatprep.mubr.f32.mxu1 %v12651_v7  ;;  %10583 = vmatpush3.bf16.msra.mxu1 %v10580_v4  ;;  %v13723_v7 = vld [vmem:[#allocation9_spill] sm:$0xff]  ;;  %v10604_v4 = vpack.c.bf16 %v5863_v3, %v5862_v59  ;;  %v13738_v59 = vld [vmem:[#allocation20_spill] sm:$0xff] }
 0x3f2   : > { %10585 = vmatprep.subr.bf16.mxu1 %v10584_v52  ;;  %v13739_v3 = vld [vmem:[#allocation21_spill] sm:$0xff] }
 0x3f4   : > { %9671 = vmatmul.mubr.f32.gmra.mrb[12].mxu1 %v12653_v33  ;;  %v13724_v33 = vld [vmem:[#allocation11_spill] sm:$0xff] }
 0x3f5   : > { %9673 = vmatprep.mubr.f32.mxu1 %v12665_v23  ;;  %10587 = vmatpush3.bf16.msra.mxu1 %v10584_v52  ;;  %v13725_v23 = vld [vmem:[#allocation12_spill] sm:$0xff]  ;;  %v5865_v52 = vld [vmem:[%s13540_s3 + $0x2c8] sm:$0xff] }
 0x3f6   : > { %10589 = vmatprep.subr.bf16.mxu1 %v10588_v15  ;;  %v10608_v10 = vpack.c.bf16 %v5865_v52, %v5864_v47  ;;  %v13742_v47 = vld [vmem:[#allocation24_spill] sm:$0xff]  ;;  %v13743_v52 = vld [vmem:[#allocation25_spill] sm:$0xff] }
 0x3f8   : > { %9674 = vmatmul.mubr.f32.gmra.mrb[14].mxu1 %v12667_v12  ;;  %v13726_v12 = vld [vmem:[#allocation7_spill] sm:$0xff] }
 0x3f9   : > { %9676 = vmatprep.mubr.f32.mxu1 %v12679_v1  ;;  %10591 = vmatpush3.bf16.msra.mxu1 %v10588_v15  ;;  %v13727_v1 = vld [vmem:[#allocation8_spill] sm:$0xff] }
 0x3fa   : > { %10593 = vmatprep.subr.bf16.mxu1 %v10592_v60  ;;  %v13116_v15 = vld [vmem:[#allocation3 + $0x69] sm:$0xff] }
 0x3fc   : > { %9677 = vmatmul.mubr.f32.gmra.mrb[16].mxu1 %v12681_v28  ;;  %v13728_v28 = vld [vmem:[#allocation14_spill] sm:$0xff] }
 0x3fd   : > { %9679 = vmatprep.mubr.f32.mxu1 %v12693_v21  ;;  %v13071_v21 = vld [vmem:[#allocation3 + $0x180] sm:$0xff] }
 0x400   : > { %9680 = vmatmul.mubr.f32.gmra.mrb[18].mxu1 %v12695_v14  ;;  %v5423_v14 = vld [vmem:[#allocation3 + $0x19] sm:$0xff] }
 0x401   : > { %9682 = vmatprep.mubr.f32.mxu1 %v12707_v22  ;;  %v13074_v22 = vld [vmem:[#allocation3 + $0x188] sm:$0xff] }
 0x404   : > { %9683 = vmatmul.mubr.f32.gmra.mrb[20].mxu1 %v12709_v24  ;;  %v5859_v24 = vld [vmem:[%s13540_s3 + $0x298] sm:$0xff] }
 0x405   : > { %9685 = vmatprep.mubr.f32.mxu1 %v12721_v50  ;;  %v5858_v50 = vld [vmem:[%s13540_s3 + $0x290] sm:$0xff] }
 0x406   : > { %v10596_v5 = vpack.c.bf16 %v5859_v24, %v5858_v50  ;;  %v5870_v50 = vld [vmem:[%s13540_s3 + $0x2f0] sm:$0xff]  ;;  %v5871_v24 = vld [vmem:[%s13540_s3 + $0x2f8] sm:$0xff] }
 0x408   : > { %9686 = vmatmul.mubr.f32.gmra.mrb[22].mxu1 %v13723_v7  ;;  %v10612_v7 = vpack.c.bf16 %v5867_v62, %v5866_v2  ;;  %v13745_v2 = vld [vmem:[#allocation27_spill] sm:$0xff]  ;;  %v13746_v62 = vld [vmem:[#allocation28_spill] sm:$0xff] }
 0x409   : > { %9688 = vmatprep.mubr.f32.mxu1 %v13724_v33  ;;  %v13128_v33 = vld [vmem:[#allocation3 + $0x81] sm:$0xff] }
 0x40c   : > { %9689 = vmatmul.mubr.f32.gmra.mrb[24].mxu1 %v13725_v23  ;;  %v5868_v23 = vld [vmem:[%s13540_s3 + $0x2e0] sm:$0xff] }
 0x40d   : > { %9691 = vmatprep.mubr.f32.mxu1 %v13726_v12  ;;  %v5869_v12 = vld [vmem:[%s13540_s3 + $0x2e8] sm:$0xff] }
 0x410   : > { %9692 = vmatmul.mubr.f32.gmra.mrb[26].mxu1 %v13727_v1  ;;  %v10616_v1 = vpack.c.bf16 %v5869_v12, %v5868_v23  ;;  %v13748_v23 = vld [vmem:[#allocation30_spill] sm:$0xff] }
 0x411   : > { %9694 = vmatprep.mubr.f32.mxu1 %v13728_v28  ;;  %v13138_v28 = vld [vmem:[#allocation3 + $0x99] sm:$0xff]  ;;  %v13253_v12 = vld [vmem:[#allocation3 + $0x182] sm:$0xff] }
 0x414   : > { %9695 = vmatmul.mubr.f32.gmra.mrb[28].mxu1 %v12761_v45  ;;  %v5424_v45 = vld [vmem:[#allocation3 + $0x21] sm:$0xff] }
 0x415   : > { %9697 = vmatprep.mubr.f32.mxu1 %v13071_v21 }
 0x418   : > { %9698 = vmatmul.mubr.f32.gmra.mrb[30].mxu1 %v13074_v22 }
 0x419   : > { %9732 = vmatprep.mubr.f32.mxu1 %v5423_v14  ;;  %v6226_v14 = vld [vmem:[%s13540_s3 + $0x300] sm:$0xff] }
 0x41c   : > { %9733 = vmatmul.mubr.f32.vlgmr.msra.gmra.mrb[0].mxu1 %v5424_v45 }
 0x41d   : > { %9735 = vmatprep.mubr.f32.mxu1 %v13089_v11  ;;  %10595 = vmatpush3.bf16.msra.mxu1 %v10592_v60  ;;  %v13125_v60 = vld [vmem:[#allocation3 + $0x79] sm:$0xff] }
 0x41e   : > { %10597 = vmatprep.subr.bf16.mxu1 %v10596_v5 }
 0x420   : > { %9736 = vmatmul.mubr.f32.gmra.mrb[2].mxu1 %v13092_v51 }
 0x421   : > { %9738 = vmatprep.mubr.f32.mxu1 %v13101_v38  ;;  %10599 = vmatpush3.bf16.msra.mxu1 %v10596_v5  ;;  %v6227_v5 = vld [vmem:[%s13540_s3 + $0x308] sm:$0xff] }
 0x422   : > { %10601 = vmatprep.subr.bf16.mxu1 %v10600_v42  ;;  %v10624_v45 = vpack.c.bf16 %v6227_v5, %v6226_v14  ;;  %v6598_v14 = vld [vmem:[%s13540_s3 + $0x398] sm:$0xff]  ;;  %v6162_v5 = vld [vmem:[#allocation3 + $0x30] sm:$0xff] }
 0x424   : > { %9739 = vmatmul.mubr.f32.gmra.mrb[4].mxu1 %v13104_v0 }
 0x425   : > { %9741 = vmatprep.mubr.f32.mxu1 %v13113_v34  ;;  %10603 = vmatpush3.bf16.msra.mxu1 %v10600_v42  ;;  %v13737_v42 = vld [vmem:[#allocation19_spill] sm:$0xff] }
 0x426   : > { %10605 = vmatprep.subr.bf16.mxu1 %v10604_v4 }
 0x428   : > { %9742 = vmatmul.mubr.f32.gmra.mrb[6].mxu1 %v13116_v15 }
 0x429   : > { %9744 = vmatprep.mubr.f32.mxu1 %v13125_v60  ;;  %10607 = vmatpush3.bf16.msra.mxu1 %v10604_v4  ;;  %v13740_v4 = vld [vmem:[#allocation22_spill] sm:$0xff] }
 0x42a   : > { %10609 = vmatprep.subr.bf16.mxu1 %v10608_v10 }
 0x42c   : > { %9745 = vmatmul.mubr.f32.gmra.mrb[8].mxu1 %v13128_v33 }
 0x42d   : > { %9747 = vmatprep.mubr.f32.mxu1 %v12604_v56  ;;  %10611 = vmatpush3.bf16.msra.mxu1 %v10608_v10  ;;  %v10620_v56 = vpack.c.bf16 %v5871_v24, %v5870_v50  ;;  %v13744_v10 = vld [vmem:[#allocation26_spill] sm:$0xff]  ;;  %v7558_v50 = vld [vmem:[%s13542_s5 + $0x8] sm:$0xff] }
 0x42e   : > { %10613 = vmatprep.subr.bf16.mxu1 %v10612_v7 }
 0x430   : > { %9748 = vmatmul.mubr.f32.gmra.mrb[10].mxu1 %v13138_v28 }
 0x431   : > { %9750 = vmatprep.mubr.f32.mxu1 %v12619_v13  ;;  %10615 = vmatpush3.bf16.msra.mxu1 %v10612_v7  ;;  %v13747_v7 = vld [vmem:[#allocation29_spill] sm:$0xff] }
 0x432   : > { %10617 = vmatprep.subr.bf16.mxu1 %v10616_v1 }
 0x434   : > { %9751 = vmatmul.mubr.f32.gmra.mrb[12].mxu1 %v12616_v36  ;;  %v13729_v36 = vld [vmem:[#allocation13_spill] sm:$0xff] }
 0x435   : > { %9753 = vmatprep.mubr.f32.mxu1 %v12633_v8  ;;  %10619 = vmatpush3.bf16.msra.mxu1 %v10616_v1  ;;  %v13730_v13 = vmax.f32 %v13729_v36, 0.0  ;;  %v6229_v8 = vld [vmem:[%s13540_s3 + $0x318] sm:$0xff]  ;;  %v7557_v1 = vld [vmem:[%s13542_s5] sm:$0xff] }
 0x436   : > { %10621 = vmatprep.subr.bf16.mxu1 %v10620_v56  ;;  %v13262_v24 = vpack.c.bf16 %v7558_v50, %v7557_v1  ;;  %v7560_v36 = vld [vmem:[%s13542_s5 + $0x18] sm:$0xff]  ;;  %v6609_v1 = vld [vmem:[%s13540_s3 + $0x3f0] sm:$0xff] }
 0x437   : > { %v6610_v50 = vld [vmem:[%s13540_s3 + $0x3f8] sm:$0xff] }
 0x438   : > { %9754 = vmatmul.mubr.f32.gmra.mrb[14].mxu1 %v12630_v6  ;;  %v6228_v6 = vld [vmem:[%s13540_s3 + $0x310] sm:$0xff]  ;;  %10721 = vmatprep.subr.bf16.mxu0 %v13262_v24 }
 0x439   : > { %9756 = vmatprep.mubr.f32.mxu1 %v12647_v37  ;;  %10623 = vmatpush3.bf16.msra.mxu1 %v10620_v56  ;;  %v13264_v56 = vld [vmem:[#allocation3 + $0x18a] sm:$0xff] }
 0x43a   : > { %10625 = vmatprep.subr.bf16.mxu1 %v10624_v45  ;;  %10723 = vmatpush3.bf16.msra.mxu0 %v13262_v24 }
 0x43c   : > { %9757 = vmatmul.mubr.f32.gmra.mrb[16].mxu1 %v12644_v32  ;;  %v13731_v32 = vld [vmem:[#allocation10_spill] sm:$0xff] }
 0x43d   : > { %9759 = vmatprep.mubr.f32.mxu1 %v12661_v63  ;;  %v13732_v37 = vmax.f32 %v13731_v32, 0.0  ;;  %v6230_v63 = vld [vmem:[%s13540_s3 + $0x320] sm:$0xff] }
 0x43e   : > { %v6599_v32 = vld [vmem:[%s13540_s3 + $0x3a0] sm:$0xff] }
 0x440   : > { %9760 = vmatmul.mubr.f32.gmra.mrb[18].mxu1 %v12658_v55  ;;  %v10628_v55 = vpack.c.bf16 %v6229_v8, %v6228_v6  ;;  %v6163_v8 = vld [vmem:[#allocation3 + $0x38] sm:$0xff] }
 0x441   : > { %9762 = vmatprep.mubr.f32.mxu1 %v12675_v44 }
 0x444   : > { %9763 = vmatmul.mubr.f32.gmra.mrb[20].mxu1 %v12672_v61  ;;  %v6231_v61 = vld [vmem:[%s13540_s3 + $0x328] sm:$0xff] }
 0x445   : > { %9765 = vmatprep.mubr.f32.mxu1 %v12689_v53  ;;  %v10632_v44 = vpack.c.bf16 %v6231_v61, %v6230_v63  ;;  %v6233_v53 = vld [vmem:[%s13540_s3 + $0x338] sm:$0xff]  ;;  %v7561_v63 = vld [vmem:[%s13542_s5 + $0x20] sm:$0xff]  ;;  %v7562_v61 = vld [vmem:[%s13542_s5 + $0x28] sm:$0xff] }
 0x448   : > { %9766 = vmatmul.mubr.f32.gmra.mrb[22].mxu1 %v12686_v48  ;;  %v6232_v48 = vld [vmem:[%s13540_s3 + $0x330] sm:$0xff] }
 0x449   : > { %9768 = vmatprep.mubr.f32.mxu1 %v12703_v18  ;;  %v6234_v18 = vld [vmem:[%s13540_s3 + $0x340] sm:$0xff] }
 0x44c   : > { %9769 = vmatmul.mubr.f32.gmra.mrb[24].mxu1 %v12700_v17  ;;  %v10636_v17 = vpack.c.bf16 %v6233_v53, %v6232_v48  ;;  %v13297_v48 = vpack.c.bf16 %v7562_v61, %v7561_v63  ;;  %v6165_v53 = vld [vmem:[#allocation3 + $0x50] sm:$0xff]  ;;  %v6177_v61 = vld [vmem:[#allocation3 + $0xe0] sm:$0xff] }
 0x44d   : > { %9771 = vmatprep.mubr.f32.mxu1 %v12717_v16 }
 0x450   : > { %9772 = vmatmul.mubr.f32.gmra.mrb[26].mxu1 %v12714_v9  ;;  %v6235_v9 = vld [vmem:[%s13540_s3 + $0x348] sm:$0xff] }
 0x451   : > { %9774 = vmatprep.mubr.f32.mxu1 %v12731_v20  ;;  %v10640_v16 = vpack.c.bf16 %v6235_v9, %v6234_v18  ;;  %v6237_v20 = vld [vmem:[%s13540_s3 + $0x358] sm:$0xff]  ;;  %v6166_v9 = vld [vmem:[#allocation3 + $0x60] sm:$0xff] }
 0x452   : > { %v6602_v18 = vld [vmem:[%s13540_s3 + $0x3b8] sm:$0xff] }
 0x454   : > { %9775 = vmatmul.mubr.f32.gmra.mrb[28].mxu1 %v12728_v40  ;;  %v6236_v40 = vld [vmem:[%s13540_s3 + $0x350] sm:$0xff] }
 0x455   : > { %9777 = vmatprep.mubr.f32.mxu1 %v13730_v13 }
 0x458   : > { %9778 = vmatmul.mubr.f32.gmra.mrb[30].mxu1 %v13732_v37  ;;  %v6600_v37 = vld [vmem:[%s13540_s3 + $0x3a8] sm:$0xff] }
 0x459   : > { %9812 = vmatprep.mubr.f32.mxu1 %v12867_v49  ;;  %v10644_v49 = vpack.c.bf16 %v6237_v20, %v6236_v40  ;;  %v7564_v40 = vld [vmem:[%s13542_s5 + $0x38] sm:$0xff] }
 0x45c   : > { %9813 = vmatmul.mubr.f32.vlgmr.msra.gmra.mrb[0].mxu1 %v12870_v43  ;;  %v6238_v43 = vld [vmem:[%s13540_s3 + $0x360] sm:$0xff] }
 0x45d   : > { %9815 = vmatprep.mubr.f32.mxu1 %v12879_v19  ;;  %10627 = vmatpush3.bf16.msra.mxu1 %v10624_v45  ;;  %v6239_v19 = vld [vmem:[%s13540_s3 + $0x368] sm:$0xff]  ;;  %v7559_v45 = vld [vmem:[%s13542_s5 + $0x10] sm:$0xff] }
 0x45e   : > { %10629 = vmatprep.subr.bf16.mxu1 %v10628_v55  ;;  %v13281_v6 = vpack.c.bf16 %v7560_v36, %v7559_v45  ;;  %v10684_v45 = vpack.c.bf16 %v6610_v50, %v6609_v1  ;;  %v6979_v1 = vld [vmem:[%s13540_s3 + $0x478] sm:$0xff] }
 0x45f   : > { %v6543_v50 = vld [vmem:[#allocation3 + $0xc1] sm:$0xff] }
 0x460   : > { %9816 = vmatmul.mubr.f32.gmra.mrb[2].mxu1 %v12882_v39  ;;  %v10648_v39 = vpack.c.bf16 %v6239_v19, %v6238_v43  ;;  %10725 = vmatprep.subr.bf16.mxu0 %v13281_v6  ;;  %v6167_v43 = vld [vmem:[#allocation3 + $0x68] sm:$0xff]  ;;  %v6603_v19 = vld [vmem:[%s13540_s3 + $0x3c0] sm:$0xff] }
 0x461   : > { %9818 = vmatprep.mubr.f32.mxu1 %v12891_v54  ;;  %10631 = vmatpush3.bf16.msra.mxu1 %v10628_v55  ;;  %v6240_v54 = vld [vmem:[%s13540_s3 + $0x370] sm:$0xff]  ;;  %v6164_v55 = vld [vmem:[#allocation3 + $0x48] sm:$0xff] }
 0x462   : > { %10633 = vmatprep.subr.bf16.mxu1 %v10632_v44  ;;  %10727 = vmatpush3.bf16.msra.mxu0 %v13281_v6 }
 0x463   : > { %10729 = vmatprep.subr.bf16.mxu0 %v13297_v48 }
 0x464   : > { %9819 = vmatmul.mubr.f32.gmra.mrb[4].mxu1 %v12894_v41  ;;  %v6241_v41 = vld [vmem:[%s13540_s3 + $0x378] sm:$0xff] }
 0x465   : > { %9821 = vmatprep.mubr.f32.mxu1 %v12903_v27  ;;  %10635 = vmatpush3.bf16.msra.mxu1 %v10632_v44  ;;  %v13733_v27 = vld [vmem:[#allocation15_spill] sm:$0xff]  ;;  %v10664_v44 = vpack.c.bf16 %v6600_v37, %v6599_v32  ;;  %v6965_v32 = vld [vmem:[%s13540_s3 + $0x408] sm:$0xff] }
 0x466   : > { %10637 = vmatprep.subr.bf16.mxu1 %v10636_v17  ;;  %10731 = vmatpush3.bf16.msra.mxu0 %v13297_v48  ;;  %v6176_v37 = vld [vmem:[#allocation3 + $0xd8] sm:$0xff] }
 0x468   : > { %9822 = vmatmul.mubr.f32.gmra.mrb[6].mxu1 %v12906_v30  ;;  %v10652_v30 = vpack.c.bf16 %v6241_v41, %v6240_v54  ;;  %v6168_v54 = vld [vmem:[#allocation3 + $0x78] sm:$0xff]  ;;  %v7565_v41 = vld [vmem:[%s13542_s5 + $0x40] sm:$0xff] }
 0x469   : > { %9824 = vmatprep.mubr.f32.mxu1 %v12915_v35  ;;  %10639 = vmatpush3.bf16.msra.mxu1 %v10636_v17  ;;  %v6595_v35 = vld [vmem:[%s13540_s3 + $0x380] sm:$0xff]  ;;  %v6601_v17 = vld [vmem:[%s13540_s3 + $0x3b0] sm:$0xff] }
 0x46a   : > { %10641 = vmatprep.subr.bf16.mxu1 %v10640_v16  ;;  %v10668_v20 = vpack.c.bf16 %v6602_v18, %v6601_v17  ;;  %v6179_v17 = vld [vmem:[#allocation3 + $0xf8] sm:$0xff]  ;;  %v6180_v18 = vld [vmem:[#allocation3 + $0x108] sm:$0xff] }
 0x46c   : > { %9825 = vmatmul.mubr.f32.gmra.mrb[8].mxu1 %v12918_v46  ;;  %v6596_v46 = vld [vmem:[%s13540_s3 + $0x388] sm:$0xff] }
 0x46d   : > { %9827 = vmatprep.mubr.f32.mxu1 %v12927_v25  ;;  %10643 = vmatpush3.bf16.msra.mxu1 %v10640_v16  ;;  %v13734_v25 = vld [vmem:[#allocation16_spill] sm:$0xff]  ;;  %v10656_v57 = vpack.c.bf16 %v6596_v46, %v6595_v35  ;;  %v7563_v16 = vld [vmem:[%s13542_s5 + $0x30] sm:$0xff] }
 0x46e   : > { %10645 = vmatprep.subr.bf16.mxu1 %v10644_v49  ;;  %v6169_v46 = vld [vmem:[#allocation3 + $0x80] sm:$0xff] }
 0x470   : > { %9828 = vmatmul.mubr.f32.gmra.mrb[10].mxu1 %v13733_v27  ;;  %v7566_v27 = vld [vmem:[%s13542_s5 + $0x48] sm:$0xff] }
 0x471   : > { %9830 = vmatprep.mubr.f32.mxu1 %v12939_v26  ;;  %10647 = vmatpush3.bf16.msra.mxu1 %v10644_v49  ;;  %v13736_v26 = vld [vmem:[#allocation18_spill] sm:$0xff]  ;;  %v13313_v49 = vpack.c.bf16 %v7564_v40, %v7563_v16  ;;  %v13329_v35 = vpack.c.bf16 %v7566_v27, %v7565_v41  ;;  %v6183_v40 = vld [vmem:[#allocation3 + $0x128] sm:$0xff]  ;;  %v6187_v41 = vld [vmem:[#allocation3 + $0x158] sm:$0xff] }
 0x472   : > { %10649 = vmatprep.subr.bf16.mxu1 %v10648_v39  ;;  %v6182_v16 = vld [vmem:[#allocation3 + $0x120] sm:$0xff]  ;;  %v6188_v27 = vld [vmem:[#allocation3 + $0x168] sm:$0xff] }
 0x473   : > { %10733 = vmatprep.subr.bf16.mxu0 %v13313_v49 }
 0x474   : > { %9831 = vmatmul.mubr.f32.gmra.mrb[12].mxu1 %v12942_v31  ;;  %v13741_v31 = vld [vmem:[#allocation23_spill] sm:$0xff]  ;;  %10735 = vmatpush3.bf16.msra.mxu0 %v13313_v49 }
 0x475   : > { %9833 = vmatprep.mubr.f32.mxu1 %v13734_v25  ;;  %10651 = vmatpush3.bf16.msra.mxu1 %v10648_v39  ;;  %v6604_v39 = vld [vmem:[%s13540_s3 + $0x3c8] sm:$0xff]  ;;  %v6605_v25 = vld [vmem:[%s13540_s3 + $0x3d0] sm:$0xff] }
 0x476   : > { %10653 = vmatprep.subr.bf16.mxu1 %v10652_v30  ;;  %10737 = vmatprep.subr.bf16.mxu0 %v13329_v35 }
 0x478   : > { %9834 = vmatmul.mubr.f32.gmra.mrb[14].mxu1 %v13735_v58  ;;  %v6170_v58 = vld [vmem:[#allocation3 + $0x90] sm:$0xff]  ;;  %10739 = vmatpush3.bf16.msra.mxu0 %v13329_v35 }
 0x479   : > { %9836 = vmatprep.mubr.f32.mxu1 %v13736_v26  ;;  %10655 = vmatpush3.bf16.msra.mxu1 %v10652_v30  ;;  %v10672_v30 = vpack.c.bf16 %v6604_v39, %v6603_v19  ;;  %v7567_v26 = vld [vmem:[%s13542_s5 + $0x50] sm:$0xff] }
 0x47a   : > { %10657 = vmatprep.subr.bf16.mxu1 %v10656_v57  ;;  %v7548_v19 = vld [vmem:[#allocation2 + $0xa9] ss:$2 sm:$0xff] }
 0x47b   : > { %v6185_v39 = vld [vmem:[#allocation3 + $0x140] sm:$0xff] }
 0x47c   : > { %9837 = vmatmul.mubr.f32.gmra.mrb[16].mxu1 %v13737_v42  ;;  %v7568_v42 = vld [vmem:[%s13542_s5 + $0x58] sm:$0xff] }
 0x47d   : > { %9839 = vmatprep.mubr.f32.mxu1 %v13738_v59 }
 0x480   : > { %9840 = vmatmul.mubr.f32.gmra.mrb[18].mxu1 %v13739_v3  ;;  %v13345_v3 = vpack.c.bf16 %v7568_v42, %v7567_v26 }
 0x481   : > { %9842 = vmatprep.mubr.f32.mxu1 %v13740_v4  ;;  %v6171_v4 = vld [vmem:[#allocation3 + $0x98] sm:$0xff] }
 0x482   : > { %10741 = vmatprep.subr.bf16.mxu0 %v13345_v3 }
 0x483   : > { %10743 = vmatpush3.bf16.msra.mxu0 %v13345_v3 }
 0x484   : > { %9843 = vmatmul.mubr.f32.gmra.mrb[20].mxu1 %v13741_v31  ;;  %v6607_v31 = vld [vmem:[%s13540_s3 + $0x3e0] sm:$0xff] }
 0x485   : > { %9845 = vmatprep.mubr.f32.mxu1 %v13742_v47  ;;  %v6608_v47 = vld [vmem:[%s13540_s3 + $0x3e8] sm:$0xff] }
 0x488   : > { %9846 = vmatmul.mubr.f32.gmra.mrb[22].mxu1 %v13743_v52  ;;  %v6172_v52 = vld [vmem:[#allocation3 + $0xa8] sm:$0xff] }
 0x489   : > { %9848 = vmatprep.mubr.f32.mxu1 %v13744_v10  ;;  %v7569_v10 = vld [vmem:[%s13542_s5 + $0x60] sm:$0xff] }
 0x48c   : > { %9849 = vmatmul.mubr.f32.gmra.mrb[24].mxu1 %v13745_v2  ;;  %v7570_v2 = vld [vmem:[%s13542_s5 + $0x68] sm:$0xff] }
 0x48d   : > { %9851 = vmatprep.mubr.f32.mxu1 %v13746_v62  ;;  %v10680_v62 = vpack.c.bf16 %v6608_v47, %v6607_v31  ;;  %v6974_v31 = vld [vmem:[%s13540_s3 + $0x450] sm:$0xff]  ;;  %v6975_v47 = vld [vmem:[%s13540_s3 + $0x458] sm:$0xff] }
 0x490   : > { %9852 = vmatmul.mubr.f32.gmra.mrb[26].mxu1 %v13747_v7  ;;  %v13361_v7 = vpack.c.bf16 %v7570_v2, %v7569_v10  ;;  %v6977_v10 = vld [vmem:[%s13540_s3 + $0x468] sm:$0xff]  ;;  %v6541_v2 = vld [vmem:[#allocation3 + $0xa9] sm:$0xff] }
 0x491   : > { %9854 = vmatprep.mubr.f32.mxu1 %v13748_v23  ;;  %v6173_v23 = vld [vmem:[#allocation3 + $0xb0] sm:$0xff] }
 0x492   : > { %10745 = vmatprep.subr.bf16.mxu0 %v13361_v7 }
 0x493   : > { %10747 = vmatpush3.bf16.msra.mxu0 %v13361_v7 }
 0x494   : > { %9855 = vmatmul.mubr.f32.gmra.mrb[28].mxu1 %v12990_v29  ;;  %v6597_v29 = vld [vmem:[%s13540_s3 + $0x390] sm:$0xff] }
 0x495   : > { %9857 = vmatprep.mubr.f32.mxu1 %v13253_v12  ;;  %v10660_v13 = vpack.c.bf16 %v6598_v14, %v6597_v29  ;;  %v6174_v29 = vld [vmem:[#allocation3 + $0xc0] sm:$0xff] }
 0x496   : > { %v7571_v14 = vld [vmem:[%s13542_s5 + $0x70] sm:$0xff] }
 0x498   : > { %9858 = vmatmul.mubr.f32.gmra.mrb[30].mxu1 %v13264_v56 }
 0x499   : > { %9892 = vmatprep.mubr.f32.mxu1 %v6162_v5  ;;  %v7572_v5 = vld [vmem:[%s13542_s5 + $0x78] sm:$0xff] }
 0x49a   : > { %v13377_v36 = vpack.c.bf16 %v7572_v5, %v7571_v14  ;;  %v6545_v14 = vld [vmem:[#allocation3 + $0xd9] sm:$0xff]  ;;  %v6546_v5 = vld [vmem:[#allocation3 + $0xe1] sm:$0xff] }
 0x49c   : > { %9893 = vmatmul.mubr.f32.vlgmr.msra.gmra.mrb[0].mxu1 %v6163_v8  ;;  %v6964_v8 = vld [vmem:[%s13540_s3 + $0x400] sm:$0xff]  ;;  %10749 = vmatprep.subr.bf16.mxu0 %v13377_v36 }
 0x49d   : > { %9895 = vmatprep.mubr.f32.mxu1 %v6164_v55  ;;  %10659 = vmatpush3.bf16.msra.mxu1 %v10656_v57  ;;  %v6606_v57 = vld [vmem:[%s13540_s3 + $0x3d8] sm:$0xff]  ;;  %v10688_v63 = vpack.c.bf16 %v6965_v32, %v6964_v8  ;;  %v6550_v32 = vld [vmem:[#allocation3 + $0x111] sm:$0xff] }
 0x49e   : > { %10661 = vmatprep.subr.bf16.mxu1 %v10660_v13  ;;  %v10676_v59 = vpack.c.bf16 %v6606_v57, %v6605_v25  ;;  %v7542_v55 = vld [vmem:[#allocation2 + $0x19] ss:$2 sm:$0xff]  ;;  %10751 = vmatpush3.bf16.msra.mxu0 %v13377_v36  ;;  %v6966_v25 = vld [vmem:[%s13540_s3 + $0x410] sm:$0xff] }
 0x49f   : > { %10132 = vmatprep.mubr.f32.mxu0 %v7542_v55  ;;  %v6967_v57 = vld [vmem:[%s13540_s3 + $0x418] sm:$0xff] }
 0x4a0   : > { %9896 = vmatmul.mubr.f32.gmra.mrb[2].mxu1 %v6165_v53  ;;  %v6178_v53 = vld [vmem:[#allocation3 + $0xf0] sm:$0xff]  ;;  %v10692_v26 = vpack.c.bf16 %v6967_v57, %v6966_v25  ;;  %v6909_v25 = vld [vmem:[#allocation3 + $0x9a] sm:$0xff] }
 0x4a1   : > { %9898 = vmatprep.mubr.f32.mxu1 %v6166_v9  ;;  %10663 = vmatpush3.bf16.msra.mxu1 %v10660_v13  ;;  %v6175_v13 = vld [vmem:[#allocation3 + $0xc8] sm:$0xff]  ;;  %v6181_v9 = vld [vmem:[#allocation3 + $0x110] sm:$0xff] }
 0x4a2   : > { %10665 = vmatprep.subr.bf16.mxu1 %v10664_v44  ;;  %v6549_v8 = vld [vmem:[#allocation3 + $0x109] sm:$0xff]  ;;  %v6911_v57 = vld [vmem:[#allocation3 + $0xb2] sm:$0xff] }
 0x4a3   : > { %v6552_v55 = vld [vmem:[#allocation3 + $0x129] sm:$0xff] }
 0x4a4   : > { %9899 = vmatmul.mubr.f32.gmra.mrb[4].mxu1 %v6167_v43  ;;  %v7546_v43 = vld [vmem:[#allocation2 + $0x79] ss:$2 sm:$0xff] }
 0x4a5   : > { %9901 = vmatprep.mubr.f32.mxu1 %v6168_v54  ;;  %10667 = vmatpush3.bf16.msra.mxu1 %v10664_v44  ;;  %v7544_v44 = vld [vmem:[#allocation2 + $0x49] ss:$2 sm:$0xff]  ;;  %v6186_v54 = vld [vmem:[#allocation3 + $0x150] sm:$0xff] }
 0x4a6   : > { %10669 = vmatprep.subr.bf16.mxu1 %v10668_v20  ;;  %10133 = vmatmul.mubr.f32.vlgmr.msra.gmra.mrb[32].mxu0 %v7544_v44  ;;  %v6555_v44 = vld [vmem:[#allocation3 + $0x151] sm:$0xff] }
 0x4a7   : > { %10135 = vmatprep.mubr.f32.mxu0 %v7546_v43  ;;  %v6900_v43 = vld [vmem:[#allocation3 + $0x32] sm:$0xff] }
 0x4a8   : > { %9902 = vmatmul.mubr.f32.gmra.mrb[6].mxu1 %v6169_v46  ;;  %v6192_v46 = vld [vmem:[#allocation3 + $0x198] sm:$0xff] }
 0x4a9   : > { %9904 = vmatprep.mubr.f32.mxu1 %v6170_v58  ;;  %10671 = vmatpush3.bf16.msra.mxu1 %v10668_v20  ;;  %v6184_v20 = vld [vmem:[#allocation3 + $0x138] sm:$0xff] }
 0x4aa   : > { %10673 = vmatprep.subr.bf16.mxu1 %v10672_v30  ;;  %10136 = vmatmul.mubr.f32.gmra.mrb[34].mxu0 %v7548_v19  ;;  %v11357_v58 = vld [vmem:[#allocation2 + $0x8] sm:$0xff] }
 0x4ab   : > { %v6901_v19 = vld [vmem:[#allocation3 + $0x3a] sm:$0xff] }
 0x4ac   : > { %9905 = vmatmul.mubr.f32.gmra.mrb[8].mxu1 %v6171_v4  ;;  %v11367_v4 = vmov -inf  }
 0x4ad   : > { %9907 = vmatprep.mubr.f32.mxu1 %v6172_v52  ;;  %10675 = vmatpush3.bf16.msra.mxu1 %v10672_v30  ;;  %v6189_v30 = vld [vmem:[#allocation3 + $0x170] sm:$0xff]  ;;  %367 = vst [vmem:[#allocation4 + $0x10] sm:$0x1] %v11367_v4  ;;  %365 = vst [vmem:[#allocation4] sm:$0xff] %v11367_v4 }
 0x4ae   : > { %10677 = vmatprep.subr.bf16.mxu1 %v10676_v59  ;;  %369 = vst [vmem:[#allocation4 + $0x18] sm:$0x1] %v11367_v4  ;;  %370 = vst [vmem:[#allocation4 + $0x30] sm:$0x1] %v11367_v4  ;;  %v6539_v52 = vld [vmem:[#allocation3 + $0x91] sm:$0xff] }
 0x4af   : > { %371 = vst [vmem:[#allocation4 + $0x48] sm:$0x1] %v11367_v4  ;;  %372 = vst [vmem:[#allocation4 + $0x60] sm:$0x1] %v11367_v4 }
 0x4b0   : > { %9908 = vmatmul.mubr.f32.gmra.mrb[10].mxu1 %v6173_v23  ;;  %373 = vst [vmem:[#allocation4 + $0x78] sm:$0x1] %v11367_v4  ;;  %374 = vst [vmem:[#allocation4 + $0x90] sm:$0x1] %v11367_v4  ;;  %v6978_v23 = vld [vmem:[%s13540_s3 + $0x470] sm:$0xff] }
 0x4b1   : > { %9910 = vmatprep.mubr.f32.mxu1 %v6174_v29  ;;  %10679 = vmatpush3.bf16.msra.mxu1 %v10676_v59  ;;  %v6971_v59 = vld [vmem:[%s13540_s3 + $0x438] sm:$0xff]  ;;  %375 = vst [vmem:[#allocation4 + $0xa8] sm:$0x1] %v11367_v4  ;;  %376 = vst [vmem:[#allocation4 + $0xc0] sm:$0x1] %v11367_v4 }
 0x4b2   : > { %10681 = vmatprep.subr.bf16.mxu1 %v10680_v62  ;;  %377 = vst [vmem:[#allocation4 + $0xd8] sm:$0x1] %v11367_v4  ;;  %378 = vst [vmem:[#allocation4 + $0xf0] sm:$0x1] %v11367_v4  ;;  %v6544_v29 = vld [vmem:[#allocation3 + $0xc9] sm:$0xff] }
 0x4b3   : > { %379 = vst [vmem:[#allocation4 + $0x108] sm:$0x1] %v11367_v4  ;;  %380 = vst [vmem:[#allocation4 + $0x120] sm:$0x1] %v11367_v4 }
 0x4b4   : > { %9911 = vmatmul.mubr.f32.gmra.mrb[12].mxu1 %v6175_v13  ;;  %381 = vst [vmem:[#allocation4 + $0x138] sm:$0x1] %v11367_v4  ;;  %382 = vst [vmem:[#allocation4 + $0x150] sm:$0x1] %v11367_v4  ;;  %v6548_v13 = vld [vmem:[#allocation3 + $0xf9] sm:$0xff] }
 0x4b5   : > { %9913 = vmatprep.mubr.f32.mxu1 %v6176_v37  ;;  %10683 = vmatpush3.bf16.msra.mxu1 %v10680_v62  ;;  %383 = vst [vmem:[#allocation4 + $0x168] sm:$0x1] %v11367_v4  ;;  %384 = vst [vmem:[#allocation4 + $0x180] sm:$0x1] %v11367_v4  ;;  %v6542_v62 = vld [vmem:[#allocation3 + $0xb1] sm:$0xff]  ;;  %v6551_v37 = vld [vmem:[#allocation3 + $0x121] sm:$0xff] }
 0x4b6   : > { %10685 = vmatprep.subr.bf16.mxu1 %v10684_v45  ;;  %368 = vst [vmem:[#allocation4] sm:$0x1] %v11367_v4  ;;  %v6924_v4 = vld [vmem:[#allocation3 + $0x152] sm:$0xff] }
 0x4b8   : > { %9914 = vmatmul.mubr.f32.gmra.mrb[14].mxu1 %v6177_v61  ;;  %v6554_v61 = vld [vmem:[#allocation3 + $0x141] sm:$0xff] }
 0x4b9   : > { %9916 = vmatprep.mubr.f32.mxu1 %v6178_v53  ;;  %10687 = vmatpush3.bf16.msra.mxu1 %v10684_v45  ;;  %v6547_v45 = vld [vmem:[#allocation3 + $0xf1] sm:$0xff]  ;;  %v6556_v53 = vld [vmem:[#allocation3 + $0x159] sm:$0xff] }
 0x4ba   : > { %10689 = vmatprep.subr.bf16.mxu1 %v10688_v63 }
 0x4bc   : > { %9917 = vmatmul.mubr.f32.gmra.mrb[16].mxu1 %v6179_v17  ;;  %v6557_v17 = vld [vmem:[#allocation3 + $0x169] sm:$0xff] }
 0x4bd   : > { %9919 = vmatprep.mubr.f32.mxu1 %v6180_v18  ;;  %v6558_v18 = vld [vmem:[#allocation3 + $0x171] sm:$0xff] }
 0x4c0   : > { %9920 = vmatmul.mubr.f32.gmra.mrb[18].mxu1 %v6181_v9  ;;  %v6559_v9 = vld [vmem:[#allocation3 + $0x181] sm:$0xff] }
 0x4c1   : > { %9922 = vmatprep.mubr.f32.mxu1 %v6182_v16  ;;  %v6561_v16 = vld [vmem:[#allocation3 + $0x199] sm:$0xff] }
 0x4c4   : > { %9923 = vmatmul.mubr.f32.gmra.mrb[20].mxu1 %v6183_v40  ;;  %v6560_v40 = vld [vmem:[#allocation3 + $0x189] sm:$0xff] }
 0x4c5   : > { %9925 = vmatprep.mubr.f32.mxu1 %v6184_v20  ;;  %v6562_v20 = vld [vmem:[#allocation3 + $0x1a1] sm:$0xff] }
 0x4c8   : > { %9926 = vmatmul.mubr.f32.gmra.mrb[22].mxu1 %v6185_v39  ;;  %v6902_v39 = vld [vmem:[#allocation3 + $0x4a] sm:$0xff] }
 0x4c9   : > { %9928 = vmatprep.mubr.f32.mxu1 %v6186_v54  ;;  %v6903_v54 = vld [vmem:[#allocation3 + $0x52] sm:$0xff] }
 0x4cc   : > { %9929 = vmatmul.mubr.f32.gmra.mrb[24].mxu1 %v6187_v41  ;;  %v6904_v41 = vld [vmem:[#allocation3 + $0x62] sm:$0xff] }
 0x4cd   : > { %9931 = vmatprep.mubr.f32.mxu1 %v6188_v27  ;;  %v6905_v27 = vld [vmem:[#allocation3 + $0x6a] sm:$0xff] }
 0x4d0   : > { %9932 = vmatmul.mubr.f32.gmra.mrb[26].mxu1 %v6189_v30  ;;  %v6906_v30 = vld [vmem:[#allocation3 + $0x7a] sm:$0xff] }
 0x4d1   : > { %9934 = vmatprep.mubr.f32.mxu1 %v13071_v21  ;;  %v6968_v21 = vld [vmem:[%s13540_s3 + $0x420] sm:$0xff] }
 0x4d4   : > { %9935 = vmatmul.mubr.f32.gmra.mrb[28].mxu1 %v13074_v22  ;;  %v6969_v22 = vld [vmem:[%s13540_s3 + $0x428] sm:$0xff] }
 0x4d5   : > { %9937 = vmatprep.mubr.f32.mxu1 %v6192_v46  ;;  %v10696_v42 = vpack.c.bf16 %v6969_v22, %v6968_v21  ;;  %v6907_v46 = vld [vmem:[#allocation3 + $0x82] sm:$0xff]  ;;  %v6917_v21 = vld [vmem:[#allocation3 + $0xfa] sm:$0xff]  ;;  %v6918_v22 = vld [vmem:[#allocation3 + $0x10a] sm:$0xff] }
 0x4d8   : > { %9938 = vmatmul.mubr.f32.gmra.mrb[30].mxu1 %v11357_v58  ;;  %v6913_v58 = vld [vmem:[#allocation3 + $0xca] sm:$0xff] }
 0x4d9   : > { %9972 = vmatprep.mubr.f32.mxu1 %v13089_v11  ;;  %v6970_v11 = vld [vmem:[%s13540_s3 + $0x430] sm:$0xff] }
 0x4dc   : > { %9973 = vmatmul.mubr.f32.vlgmr.msra.gmra.mrb[0].mxu1 %v13092_v51  ;;  %v10700_v51 = vpack.c.bf16 %v6971_v59, %v6970_v11  ;;  %v6921_v11 = vld [vmem:[#allocation3 + $0x12a] sm:$0xff]  ;;  %v6922_v59 = vld [vmem:[#allocation3 + $0x13a] sm:$0xff] }
 0x4dd   : > { %9975 = vmatprep.mubr.f32.mxu1 %v13101_v38  ;;  %10691 = vmatpush3.bf16.msra.mxu1 %v10688_v63  ;;  %v6972_v38 = vld [vmem:[%s13540_s3 + $0x440] sm:$0xff]  ;;  %v6553_v63 = vld [vmem:[#allocation3 + $0x139] sm:$0xff] }
 0x4de   : > { %10693 = vmatprep.subr.bf16.mxu1 %v10692_v26 }
 0x4e0   : > { %9976 = vmatmul.mubr.f32.gmra.mrb[2].mxu1 %v13104_v0  ;;  %v6973_v0 = vld [vmem:[%s13540_s3 + $0x448] sm:$0xff] }
 0x4e1   : > { %9978 = vmatprep.mubr.f32.mxu1 %v13113_v34  ;;  %10695 = vmatpush3.bf16.msra.mxu1 %v10692_v26  ;;  %v10704_v34 = vpack.c.bf16 %v6973_v0, %v6972_v38  ;;  %v6915_v26 = vld [vmem:[#allocation3 + $0xe2] sm:$0xff]  ;;  %v6926_v38 = vld [vmem:[#allocation3 + $0x16a] sm:$0xff]  ;;  %v6930_v0 = vld [vmem:[#allocation3 + $0x19a] sm:$0xff] }
 0x4e2   : > { %10697 = vmatprep.subr.bf16.mxu1 %v10696_v42 }
 0x4e4   : > { %9979 = vmatmul.mubr.f32.gmra.mrb[4].mxu1 %v13116_v15  ;;  %v10708_v15 = vpack.c.bf16 %v6975_v47, %v6974_v31  ;;  %v7550_v31 = vld [vmem:[#allocation2 + $0xd9] ss:$2 sm:$0xff]  ;;  %v7552_v47 = vld [vmem:[#allocation2 + $0x109] ss:$2 sm:$0xff] }
 0x4e5   : > { %9981 = vmatprep.mubr.f32.mxu1 %v13125_v60  ;;  %10699 = vmatpush3.bf16.msra.mxu1 %v10696_v42  ;;  %v6976_v60 = vld [vmem:[%s13540_s3 + $0x460] sm:$0xff]  ;;  %v6920_v42 = vld [vmem:[#allocation3 + $0x122] sm:$0xff] }
 0x4e6   : > { %10701 = vmatprep.subr.bf16.mxu1 %v10700_v51 }
 0x4e8   : > { %9982 = vmatmul.mubr.f32.gmra.mrb[6].mxu1 %v13128_v33  ;;  %v10712_v33 = vpack.c.bf16 %v6977_v10, %v6976_v60 }
 0x4e9   : > { %9984 = vmatprep.mubr.f32.mxu1 %v6539_v52  ;;  %10703 = vmatpush3.bf16.msra.mxu1 %v10700_v51  ;;  %v6925_v51 = vld [vmem:[#allocation3 + $0x15a] sm:$0xff]  ;;  %v7554_v52 = vld [vmem:[#allocation2 + $0x139] ss:$2 sm:$0xff] }
 0x4ea   : > { %10705 = vmatprep.subr.bf16.mxu1 %v10704_v34 }
 0x4ec   : > { %9985 = vmatmul.mubr.f32.gmra.mrb[8].mxu1 %v13138_v28  ;;  %v10716_v28 = vpack.c.bf16 %v6979_v1, %v6978_v23 }
 0x4ed   : > { %9987 = vmatprep.mubr.f32.mxu1 %v6541_v2  ;;  %10707 = vmatpush3.bf16.msra.mxu1 %v10704_v34  ;;  %v6931_v34 = vld [vmem:[#allocation3 + $0x1a2] sm:$0xff] }
 0x4ee   : > { %10709 = vmatprep.subr.bf16.mxu1 %v10708_v15 }
 0x4f0   : > { %9988 = vmatmul.mubr.f32.gmra.mrb[10].mxu1 %v6542_v62 }
 0x4f1   : > { %9990 = vmatprep.mubr.f32.mxu1 %v6543_v50  ;;  %10711 = vmatpush3.bf16.msra.mxu1 %v10708_v15  ;;  %v7556_v15 = vld [vmem:[#allocation2 + $0x169] ss:$2 sm:$0xff] }
 0x4f2   : > { %10713 = vmatprep.subr.bf16.mxu1 %v10712_v33 }
 0x4f4   : > { %9991 = vmatmul.mubr.f32.gmra.mrb[12].mxu1 %v6544_v29 }
 0x4f5   : > { %9993 = vmatprep.mubr.f32.mxu1 %v6545_v14  ;;  %10715 = vmatpush3.bf16.msra.mxu1 %v10712_v33 }
 0x4f6   : > { %10717 = vmatprep.subr.bf16.mxu1 %v10716_v28 }
 0x4f8   : > { %9994 = vmatmul.mubr.f32.gmra.mrb[14].mxu1 %v6546_v5 }
 0x4f9   : > { %9996 = vmatprep.mubr.f32.mxu1 %v6547_v45  ;;  %10719 = vmatpush3.bf16.msra.mxu1 %v10716_v28 }
 0x4fa   : > { %10752 = vmatprep.subr.bf16.mxu1 %v13262_v24 }
 0x4fc   : > { %9997 = vmatmul.mubr.f32.gmra.mrb[16].mxu1 %v6548_v13 }
 0x4fd   : > { %9999 = vmatprep.mubr.f32.mxu1 %v6549_v8  ;;  %v7336_v8 = vld [vmem:[#allocation4 + $0x10] sm:$0x1] }
 0x500   : > { %10000 = vmatmul.mubr.f32.gmra.mrb[18].mxu1 %v6550_v32 }
 0x501   : > { %10002 = vmatprep.mubr.f32.mxu1 %v6551_v37 }
 0x504   : > { %10003 = vmatmul.mubr.f32.gmra.mrb[20].mxu1 %v6552_v55  ;;  %v7334_v55 = vld [vmem:[#allocation4] sm:$0xff] }
 0x505   : > { %10005 = vmatprep.mubr.f32.mxu1 %v6553_v63 }
 0x508   : > { %10006 = vmatmul.mubr.f32.gmra.mrb[22].mxu1 %v6554_v61 }
 0x509   : > { %10008 = vmatprep.mubr.f32.mxu1 %v6555_v44 }
 0x50c   : > { %10009 = vmatmul.mubr.f32.gmra.mrb[24].mxu1 %v6556_v53 }
 0x50d   : > { %10011 = vmatprep.mubr.f32.mxu1 %v6557_v17 }
 0x510   : > { %10012 = vmatmul.mubr.f32.gmra.mrb[26].mxu1 %v6558_v18 }
 0x511   : > { %10014 = vmatprep.mubr.f32.mxu1 %v6559_v9 }
 0x514   : > { %10015 = vmatmul.mubr.f32.gmra.mrb[28].mxu1 %v6560_v40 }
 0x515   : > { %10017 = vmatprep.mubr.f32.mxu1 %v6561_v16 }
 0x518   : > { %10018 = vmatmul.mubr.f32.gmra.mrb[30].mxu1 %v6562_v20 }
 0x519   : > { %10052 = vmatprep.mubr.f32.mxu1 %v6900_v43 }
 0x51c   : > { %10053 = vmatmul.mubr.f32.vlgmr.msra.gmra.mrb[0].mxu1 %v6901_v19 }
 0x51d   : > { %10055 = vmatprep.mubr.f32.mxu1 %v6902_v39  ;;  %10760 = vmatpush3.bf16.msra.mxu1 %v13262_v24  ;;  %v6908_v24 = vld [vmem:[#allocation3 + $0x92] sm:$0xff] }
 0x51e   : > { %10753 = vmatprep.subr.bf16.mxu1 %v13281_v6 }
 0x520   : > { %10056 = vmatmul.mubr.f32.gmra.mrb[2].mxu1 %v6903_v54 }
 0x521   : > { %10058 = vmatprep.mubr.f32.mxu1 %v6904_v41  ;;  %10761 = vmatpush3.bf16.msra.mxu1 %v13281_v6  ;;  %v6910_v6 = vld [vmem:[#allocation3 + $0xaa] sm:$0xff] }
 0x522   : > { %10754 = vmatprep.subr.bf16.mxu1 %v13297_v48 }
 0x524   : > { %10059 = vmatmul.mubr.f32.gmra.mrb[4].mxu1 %v6905_v27 }
 0x525   : > { %10061 = vmatprep.mubr.f32.mxu1 %v6906_v30  ;;  %10762 = vmatpush3.bf16.msra.mxu1 %v13297_v48  ;;  %v6912_v48 = vld [vmem:[#allocation3 + $0xc2] sm:$0xff] }
 0x526   : > { %10755 = vmatprep.subr.bf16.mxu1 %v13313_v49 }
 0x528   : > { %10062 = vmatmul.mubr.f32.gmra.mrb[6].mxu1 %v6907_v46 }
 0x529   : > { %10064 = vmatprep.mubr.f32.mxu1 %v6908_v24  ;;  %10763 = vmatpush3.bf16.msra.mxu1 %v13313_v49  ;;  %v6914_v49 = vld [vmem:[#allocation3 + $0xda] sm:$0xff] }
 0x52a   : > { %10756 = vmatprep.subr.bf16.mxu1 %v13329_v35 }
 0x52c   : > { %10065 = vmatmul.mubr.f32.gmra.mrb[8].mxu1 %v6909_v25 }
 0x52d   : > { %10067 = vmatprep.mubr.f32.mxu1 %v6910_v6  ;;  %10764 = vmatpush3.bf16.msra.mxu1 %v13329_v35  ;;  %v6916_v35 = vld [vmem:[#allocation3 + $0xf2] sm:$0xff] }
 0x52e   : > { %10757 = vmatprep.subr.bf16.mxu1 %v13345_v3 }
 0x530   : > { %10068 = vmatmul.mubr.f32.gmra.mrb[10].mxu1 %v6911_v57 }
 0x531   : > { %10070 = vmatprep.mubr.f32.mxu1 %v6912_v48  ;;  %10765 = vmatpush3.bf16.msra.mxu1 %v13345_v3  ;;  %v6919_v3 = vld [vmem:[#allocation3 + $0x112] sm:$0xff] }
 0x532   : > { %10758 = vmatprep.subr.bf16.mxu1 %v13361_v7 }
 0x534   : > { %10071 = vmatmul.mubr.f32.gmra.mrb[12].mxu1 %v6913_v58 }
 0x535   : > { %10073 = vmatprep.mubr.f32.mxu1 %v6914_v49  ;;  %10766 = vmatpush3.bf16.msra.mxu1 %v13361_v7  ;;  %v6923_v7 = vld [vmem:[#allocation3 + $0x142] sm:$0xff] }
 0x536   : > { %10759 = vmatprep.subr.bf16.mxu1 %v13377_v36 }
 0x538   : > { %10074 = vmatmul.mubr.f32.gmra.mrb[14].mxu1 %v6915_v26 }
 0x539   : > { %10076 = vmatprep.mubr.f32.mxu1 %v6916_v35  ;;  %10767 = vmatpush3.bf16.msra.mxu1 %v13377_v36  ;;  %v6927_v36 = vld [vmem:[#allocation3 + $0x172] sm:$0xff] }
 0x53c   : > { %10077 = vmatmul.mubr.f32.gmra.mrb[16].mxu1 %v6917_v21 }
 0x53d   : > { %10079 = vmatprep.mubr.f32.mxu1 %v6918_v22 }
 0x540   : > { %10080 = vmatmul.mubr.f32.gmra.mrb[18].mxu1 %v6919_v3 }
 0x541   : > { %10082 = vmatprep.mubr.f32.mxu1 %v6920_v42 }
 0x544   : > { %10083 = vmatmul.mubr.f32.gmra.mrb[20].mxu1 %v6921_v11 }
 0x545   : > { %10085 = vmatprep.mubr.f32.mxu1 %v6922_v59 }
 0x548   : > { %10086 = vmatmul.mubr.f32.gmra.mrb[22].mxu1 %v6923_v7  ;;  %v13486_v7 = vld [vmem:[%s13543_s6] ss:$0 sm:$0xff] }
 0x549   : > { %10088 = vmatprep.mubr.f32.mxu1 %v6924_v4 }
 0x54c   : > { %10089 = vmatmul.mubr.f32.gmra.mrb[24].mxu1 %v6925_v51 }
 0x54d   : > { %10091 = vmatprep.mubr.f32.mxu1 %v6926_v38 }
 0x550   : > { %10092 = vmatmul.mubr.f32.gmra.mrb[26].mxu1 %v6927_v36 }
 0x551   : > { %10094 = vmatprep.mubr.f32.mxu1 %v13253_v12 }
 0x554   : > { %10095 = vmatmul.mubr.f32.gmra.mrb[28].mxu1 %v13264_v56  ;;  %v13469_v56 = vld [vmem:[%s13541_s4] ss:$0 sm:$0xff] }
 0x555   : > { %10097 = vmatprep.mubr.f32.mxu1 %v6930_v0 }
 0x558   : > { %10098 = vmatmul.mubr.f32.gmra.mrb[30].mxu1 %v6931_v34 }
 0x559   : > { %10138 = vmatprep.mubr.f32.mxu1 %v7550_v31 }
 0x55c   : > { %10139 = vmatmul.mubr.f32.vlgmr.msra.gmra.mrb[32].mxu1 %v7552_v47 }
 0x55d   : > { %10141 = vmatprep.mubr.f32.mxu1 %v7554_v52 }
 0x560   : > { %10142 = vmatmul.mubr.f32.gmra.mrb[34].mxu1 %v7556_v15 }
 0x579   : > { %v13458_v60 = vpop.f32.mrb[32].mxu0 }
 0x57a   : > { %v13460_v10 = vpop.f32.mrb[33].mxu0 }
 0x57d   : > { %v13462_v2 = vpop.f32.mrb[34].mxu0 }
 0x57e   : > { %v13464_v12 = vpop.f32.mrb[35].mxu0 }
 0x5ef   : > { %v10054_v33 = vpop.f32.mrb[0].mxu1 }
 0x5f0   : > { %v10800_v62 = vadd.f32 %v10054_v33, %v13469_v56  ;;  %v7046_v23 = vpop.f32.mrb[1].mxu1  ;;  %v7647_v33 = vadd.f32 %v13486_v7, %v13460_v10 }
 0x5f1   : > { %v10801_v1 = vadd.f32 %v13469_v56, %v7046_v23 }
 0x5f2   : > { %7303 = vst [vmem:[#allocation4 + $0x21] sm:$0xff] %v10800_v62 }
 0x5f3   : > { %7302 = vst [vmem:[#allocation4 + $0x19] sm:$0xff] %v10801_v1  ;;  %v10057_v50 = vpop.f32.mrb[2].mxu1 }
 0x5f4   : > { %v10802_v28 = vadd.f32 %v10057_v50, %v13469_v56  ;;  %v7056_v29 = vpop.f32.mrb[3].mxu1 }
 0x5f5   : > { %v10803_v14 = vadd.f32 %v13469_v56, %v7056_v29 }
 0x5f6   : > { %7305 = vst [vmem:[#allocation4 + $0x39] sm:$0xff] %v10802_v28 }
 0x5f7   : > { %7304 = vst [vmem:[#allocation4 + $0x31] sm:$0xff] %v10803_v14  ;;  %v10060_v5 = vpop.f32.mrb[4].mxu1 }
 0x5f8   : > { %v10804_v45 = vadd.f32 %v10060_v5, %v13469_v56  ;;  %v7066_v13 = vpop.f32.mrb[5].mxu1 }
 0x5f9   : > { %v7339_v32 = vld [vmem:[#allocation4 + $0x28] sm:$0x1]  ;;  %v10805_v37 = vadd.f32 %v13469_v56, %v7066_v13 }
 0x5fa   : > { %v7337_v63 = vld [vmem:[#allocation4 + $0x18] sm:$0xff]  ;;  %v7338_v61 = vld [vmem:[#allocation4 + $0x20] sm:$0xff]  ;;  %7307 = vst [vmem:[#allocation4 + $0x51] sm:$0xff] %v10804_v45  ;;  %v7408_v53 = vmax.f32 %v7336_v8, %v7339_v32 }
 0x5fb   : > { %7306 = vst [vmem:[#allocation4 + $0x49] sm:$0xff] %v10805_v37  ;;  %v10063_v44 = vpop.f32.mrb[6].mxu1  ;;  %v7406_v9 = vmax.f32 %v7334_v55, %v7337_v63 }
 0x5fc   : > { %v10806_v17 = vadd.f32 %v10063_v44, %v13469_v56  ;;  %v7076_v18 = vpop.f32.mrb[7].mxu1 }
 0x5fd   : > { %v7384_v16 = vld [vmem:[#allocation4 + $0x40] sm:$0x1]  ;;  %v10807_v40 = vadd.f32 %v13469_v56, %v7076_v18 }
 0x5fe   : > { %v7432_v20 = vmax.f32 %v7408_v53, %v7384_v16  ;;  %v7340_v43 = vld [vmem:[#allocation4 + $0x30] sm:$0xff]  ;;  %v7341_v19 = vld [vmem:[#allocation4 + $0x38] sm:$0xff]  ;;  %7309 = vst [vmem:[#allocation4 + $0x69] sm:$0xff] %v10806_v17  ;;  %v7342_v57 = vld [vmem:[#allocation4 + $0x40] sm:$0x1] }
 0x5ff   : > { %v7430_v39 = vmax.f32 %v7406_v9, %v7340_v43  ;;  %v7431_v54 = vmax.f32 %v7338_v61, %v7341_v19  ;;  %7308 = vst [vmem:[#allocation4 + $0x61] sm:$0xff] %v10807_v40  ;;  %v10066_v41 = vpop.f32.mrb[8].mxu1 }
 0x600   : > { %7456 = vst [vmem:[#allocation5 + $0x10] sm:$0x1] %v7432_v20  ;;  %v10808_v27 = vadd.f32 %v10066_v41, %v13469_v56  ;;  %v7086_v30 = vpop.f32.mrb[9].mxu1 }
 0x601   : > { %7454 = vst [vmem:[#allocation5] sm:$0xff] %v7430_v39  ;;  %7455 = vst [vmem:[#allocation5 + $0x8] sm:$0xff] %v7431_v54  ;;  %v7345_v46 = vld [vmem:[#allocation4 + $0x58] sm:$0x1]  ;;  %v10809_v24 = vadd.f32 %v13469_v56, %v7086_v30 }
 0x602   : > { %v7343_v25 = vld [vmem:[#allocation4 + $0x48] sm:$0xff]  ;;  %v7344_v6 = vld [vmem:[#allocation4 + $0x50] sm:$0xff]  ;;  %7311 = vst [vmem:[#allocation4 + $0x81] sm:$0xff] %v10808_v27  ;;  %v7411_v58 = vmax.f32 %v7342_v57, %v7345_v46 }
 0x603   : > { %7310 = vst [vmem:[#allocation4 + $0x79] sm:$0xff] %v10809_v24  ;;  %v10069_v48 = vpop.f32.mrb[10].mxu1  ;;  %v7409_v35 = vmax.f32 %v7340_v43, %v7343_v25  ;;  %v7410_v21 = vmax.f32 %v7341_v19, %v7344_v6  ;;  %v7652_v43 = vadd.f32 %v13458_v60, %v13486_v7 }
 0x604   : > { %v10810_v49 = vadd.f32 %v10069_v48, %v13469_v56  ;;  %v7096_v26 = vpop.f32.mrb[11].mxu1 }
 0x605   : > { %v7387_v22 = vld [vmem:[#allocation4 + $0x70] sm:$0x1]  ;;  %v10811_v3 = vadd.f32 %v13469_v56, %v7096_v26 }
 0x606   : > { %v7435_v42 = vmax.f32 %v7411_v58, %v7387_v22  ;;  %v7346_v11 = vld [vmem:[#allocation4 + $0x60] sm:$0xff]  ;;  %v7347_v59 = vld [vmem:[#allocation4 + $0x68] sm:$0xff]  ;;  %7313 = vst [vmem:[#allocation4 + $0x99] sm:$0xff] %v10810_v49  ;;  %v7348_v50 = vld [vmem:[#allocation4 + $0x70] sm:$0x1] }
 0x607   : > { %v7433_v4 = vmax.f32 %v7409_v35, %v7346_v11  ;;  %v7434_v51 = vmax.f32 %v7410_v21, %v7347_v59  ;;  %7312 = vst [vmem:[#allocation4 + $0x91] sm:$0xff] %v10811_v3  ;;  %v10072_v38 = vpop.f32.mrb[12].mxu1 }
 0x608   : > { %7459 = vst [vmem:[#allocation5 + $0x28] sm:$0x1] %v7435_v42  ;;  %v10812_v36 = vadd.f32 %v10072_v38, %v13469_v56  ;;  %v7106_v0 = vpop.f32.mrb[13].mxu1  ;;  %v7478_v34 = vld [vmem:[#allocation5] ss:$2 sm:$0xff] }
 0x609   : > { %v7494_v31 = vld [vmem:[#allocation5 + $0x1] ss:$2 sm:$0xff]  ;;  %7457 = vst [vmem:[#allocation5 + $0x18] sm:$0xff] %v7433_v4  ;;  %7458 = vst [vmem:[#allocation5 + $0x20] sm:$0xff] %v7434_v51  ;;  %v7351_v47 = vld [vmem:[#allocation4 + $0x88] sm:$0x1]  ;;  %v10813_v52 = vadd.f32 %v13469_v56, %v7106_v0 }
 0x60a   : > { %v7525_v15 = vmax.f32 %v7478_v34, %v7494_v31  ;;  %v7349_v62 = vld [vmem:[#allocation4 + $0x78] sm:$0xff]  ;;  %v7350_v23 = vld [vmem:[#allocation4 + $0x80] sm:$0xff]  ;;  %7315 = vst [vmem:[#allocation4 + $0xb1] sm:$0xff] %v10812_v36  ;;  %v7414_v14 = vmax.f32 %v7348_v50, %v7351_v47  ;;  %v7657_v31 = vadd.f32 %v13486_v7, %v13464_v12 }
 0x60b   : > { %v7510_v1 = vld [vmem:[#allocation5 + $0x2] ss:$2 sm:$0xff]  ;;  %7314 = vst [vmem:[#allocation4 + $0xa9] sm:$0xff] %v10813_v52  ;;  %v10075_v29 = vpop.f32.mrb[14].mxu1  ;;  %v7412_v13 = vmax.f32 %v7346_v11, %v7349_v62  ;;  %v7413_v10 = vmax.f32 %v7347_v59, %v7350_v23 }
 0x60c   : > { %v7533_v28 = vmax.f32 %v7525_v15, %v7510_v1  ;;  %v10814_v5 = vadd.f32 %v10075_v29, %v13469_v56  ;;  %v7116_v45 = vpop.f32.mrb[15].mxu1 }
 0x60d   : > { %v7390_v8 = vld [vmem:[#allocation4 + $0xa0] sm:$0x1]  ;;  %v10815_v37 = vadd.f32 %v13469_v56, %v7116_v45 }
 0x60e   : > { %v7685_v32 = vadd.f32 %v7647_v33, %v7533_v28  ;;  %v7438_v55 = vmax.f32 %v7414_v14, %v7390_v8  ;;  %v7352_v63 = vld [vmem:[#allocation4 + $0x90] sm:$0xff]  ;;  %v7353_v61 = vld [vmem:[#allocation4 + $0x98] sm:$0xff]  ;;  %7317 = vst [vmem:[#allocation4 + $0xc9] sm:$0xff] %v10814_v5  ;;  %v7354_v30 = vld [vmem:[#allocation4 + $0xa0] sm:$0x1] }
 0x60f   : > { %v7436_v44 = vmax.f32 %v7412_v13, %v7352_v63  ;;  %v7437_v53 = vmax.f32 %v7413_v10, %v7353_v61  ;;  %7316 = vst [vmem:[#allocation4 + $0xc1] sm:$0xff] %v10815_v37  ;;  %v10078_v17 = vpop.f32.mrb[16].mxu1 }
 0x610   : > { %7693 = vst [vmem:[%s13496_s19] sm:$0xff] %v7685_v32  ;;  %7462 = vst [vmem:[#allocation5 + $0x40] sm:$0x1] %v7438_v55  ;;  %v7480_v18 = vld [vmem:[#allocation5 + $0x18] ss:$2 sm:$0xff]  ;;  %v7496_v9 = vld [vmem:[#allocation5 + $0x19] ss:$2 sm:$0xff]  ;;  %v10816_v16 = vadd.f32 %v10078_v17, %v13469_v56 }
 0x611   : > { %7460 = vst [vmem:[#allocation5 + $0x30] sm:$0xff] %v7436_v44  ;;  %7461 = vst [vmem:[#allocation5 + $0x38] sm:$0xff] %v7437_v53  ;;  %v7357_v40 = vld [vmem:[#allocation4 + $0xb8] sm:$0x1]  ;;  %v7526_v20 = vmax.f32 %v7480_v18, %v7496_v9  ;;  %v7126_v19 = vpop.f32.mrb[17].mxu1  ;;  %v7662_v18 = vadd.f32 %v13462_v2, %v13486_v7 }
 0x612   : > { %v7355_v39 = vld [vmem:[#allocation4 + $0xa8] sm:$0xff]  ;;  %v7356_v54 = vld [vmem:[#allocation4 + $0xb0] sm:$0xff]  ;;  %7319 = vst [vmem:[#allocation4 + $0xe1] sm:$0xff] %v10816_v16  ;;  %v10817_v27 = vadd.f32 %v13469_v56, %v7126_v19  ;;  %v7417_v25 = vmax.f32 %v7354_v30, %v7357_v40 }
 0x613   : > { %v7512_v41 = vld [vmem:[#allocation5 + $0x1a] ss:$2 sm:$0xff]  ;;  %v10081_v24 = vpop.f32.mrb[18].mxu1  ;;  %v7415_v48 = vmax.f32 %v7352_v63, %v7355_v39  ;;  %v7416_v58 = vmax.f32 %v7353_v61, %v7356_v54 }
 0x614   : > { %v7534_v46 = vmax.f32 %v7526_v20, %v7512_v41  ;;  %7318 = vst [vmem:[#allocation4 + $0xd9] sm:$0xff] %v10817_v27  ;;  %v10818_v6 = vadd.f32 %v10081_v24, %v13469_v56  ;;  %v7136_v57 = vpop.f32.mrb[19].mxu1 }
 0x615   : > { %v7393_v60 = vld [vmem:[#allocation4 + $0xd0] sm:$0x1]  ;;  %v10819_v26 = vadd.f32 %v13469_v56, %v7136_v57 }
 0x616   : > { %v7686_v49 = vadd.f32 %v7652_v43, %v7534_v46  ;;  %v7441_v35 = vmax.f32 %v7417_v25, %v7393_v60  ;;  %v7358_v21 = vld [vmem:[#allocation4 + $0xc0] sm:$0xff]  ;;  %v7359_v22 = vld [vmem:[#allocation4 + $0xc8] sm:$0xff]  ;;  %7321 = vst [vmem:[#allocation4 + $0xf9] sm:$0xff] %v10818_v6  ;;  %v7360_v52 = vld [vmem:[#allocation4 + $0xd0] sm:$0x1] }
 0x617   : > { %v7439_v3 = vmax.f32 %v7415_v48, %v7358_v21  ;;  %v7440_v42 = vmax.f32 %v7416_v58, %v7359_v22  ;;  %7320 = vst [vmem:[#allocation4 + $0xf1] sm:$0xff] %v10819_v26  ;;  %v10084_v11 = vpop.f32.mrb[20].mxu1 }
 0x618   : > { %7694 = vst [vmem:[%s13496_s19 + $0x8] sm:$0xff] %v7686_v49  ;;  %7465 = vst [vmem:[#allocation5 + $0x58] sm:$0x1] %v7441_v35  ;;  %v10820_v59 = vadd.f32 %v10084_v11, %v13469_v56  ;;  %v7146_v4 = vpop.f32.mrb[21].mxu1  ;;  %v7482_v51 = vld [vmem:[#allocation5 + $0x30] ss:$2 sm:$0xff] }
 0x619   : > { %v7498_v38 = vld [vmem:[#allocation5 + $0x31] ss:$2 sm:$0xff]  ;;  %7463 = vst [vmem:[#allocation5 + $0x48] sm:$0xff] %v7439_v3  ;;  %7464 = vst [vmem:[#allocation5 + $0x50] sm:$0xff] %v7440_v42  ;;  %v7363_v36 = vld [vmem:[#allocation4 + $0xe8] sm:$0x1]  ;;  %v10821_v0 = vadd.f32 %v13469_v56, %v7146_v4 }
 0x61a   : > { %v7527_v34 = vmax.f32 %v7482_v51, %v7498_v38  ;;  %7323 = vst [vmem:[#allocation4 + $0x111] sm:$0xff] %v10820_v59  ;;  %v7514_v47 = vld [vmem:[#allocation5 + $0x32] ss:$2 sm:$0xff]  ;;  %v7420_v1 = vmax.f32 %v7360_v52, %v7363_v36 }
 0x61b   : > { %v7361_v15 = vld [vmem:[#allocation4 + $0xd8] sm:$0xff]  ;;  %v7362_v33 = vld [vmem:[#allocation4 + $0xe0] sm:$0xff]  ;;  %7322 = vst [vmem:[#allocation4 + $0x109] sm:$0xff] %v10821_v0  ;;  %v10087_v23 = vpop.f32.mrb[22].mxu1 }
 0x61c   : > { %v7535_v62 = vmax.f32 %v7527_v34, %v7514_v47  ;;  %v10822_v50 = vadd.f32 %v10087_v23, %v13469_v56  ;;  %v7156_v28 = vpop.f32.mrb[23].mxu1  ;;  %v7418_v29 = vmax.f32 %v7358_v21, %v7361_v15  ;;  %v7419_v14 = vmax.f32 %v7359_v22, %v7362_v33 }
 0x61d   : > { %v7396_v5 = vld [vmem:[#allocation4 + $0x100] sm:$0x1]  ;;  %v10823_v13 = vadd.f32 %v13469_v56, %v7156_v28 }
 0x61e   : > { %v7687_v45 = vadd.f32 %v7657_v31, %v7535_v62  ;;  %v7444_v12 = vmax.f32 %v7420_v1, %v7396_v5  ;;  %v7364_v10 = vld [vmem:[#allocation4 + $0xf0] sm:$0xff]  ;;  %v7365_v8 = vld [vmem:[#allocation4 + $0xf8] sm:$0xff]  ;;  %7325 = vst [vmem:[#allocation4 + $0x129] sm:$0xff] %v10822_v50  ;;  %v7366_v19 = vld [vmem:[#allocation4 + $0x100] sm:$0x1] }
 0x61f   : > { %v7442_v32 = vmax.f32 %v7418_v29, %v7364_v10  ;;  %v7443_v37 = vmax.f32 %v7419_v14, %v7365_v8  ;;  %7324 = vst [vmem:[#allocation4 + $0x121] sm:$0xff] %v10823_v13  ;;  %v10090_v55 = vpop.f32.mrb[24].mxu1 }
 0x620   : > { %7695 = vst [vmem:[%s13496_s19 + $0x10] sm:$0xff] %v7687_v45  ;;  %7468 = vst [vmem:[#allocation5 + $0x70] sm:$0x1] %v7444_v12  ;;  %v7484_v63 = vld [vmem:[#allocation5 + $0x48] ss:$2 sm:$0xff]  ;;  %v10824_v44 = vadd.f32 %v10090_v55, %v13469_v56  ;;  %v7166_v9 = vpop.f32.mrb[25].mxu1 }
 0x621   : > { %v7500_v61 = vld [vmem:[#allocation5 + $0x49] ss:$2 sm:$0xff]  ;;  %7466 = vst [vmem:[#allocation5 + $0x60] sm:$0xff] %v7442_v32  ;;  %7467 = vst [vmem:[#allocation5 + $0x68] sm:$0xff] %v7443_v37  ;;  %v7369_v53 = vld [vmem:[#allocation4 + $0x118] sm:$0x1]  ;;  %v10825_v43 = vadd.f32 %v13469_v56, %v7166_v9 }
 0x622   : > { %v7528_v17 = vmax.f32 %v7484_v63, %v7500_v61  ;;  %v7367_v16 = vld [vmem:[#allocation4 + $0x108] sm:$0xff]  ;;  %v7368_v40 = vld [vmem:[#allocation4 + $0x110] sm:$0xff]  ;;  %7327 = vst [vmem:[#allocation4 + $0x141] sm:$0xff] %v10824_v44  ;;  %v7423_v41 = vmax.f32 %v7366_v19, %v7369_v53 }
 0x623   : > { %v7516_v20 = vld [vmem:[#allocation5 + $0x4a] ss:$2 sm:$0xff]  ;;  %v10093_v54 = vpop.f32.mrb[26].mxu1  ;;  %7326 = vst [vmem:[#allocation4 + $0x139] sm:$0xff] %v10825_v43  ;;  %v7421_v46 = vmax.f32 %v7364_v10, %v7367_v16  ;;  %v7422_v24 = vmax.f32 %v7365_v8, %v7368_v40 }
 0x624   : > { %v7536_v39 = vmax.f32 %v7528_v17, %v7516_v20  ;;  %v10826_v27 = vadd.f32 %v10093_v54, %v13469_v56  ;;  %v7176_v30 = vpop.f32.mrb[27].mxu1 }
 0x625   : > { %v7399_v2 = vld [vmem:[#allocation4 + $0x130] sm:$0x1]  ;;  %v10827_v6 = vadd.f32 %v13469_v56, %v7176_v30 }
 0x626   : > { %v7688_v25 = vadd.f32 %v7662_v18, %v7536_v39  ;;  %v7447_v57 = vmax.f32 %v7423_v41, %v7399_v2  ;;  %v7370_v48 = vld [vmem:[#allocation4 + $0x120] sm:$0xff]  ;;  %v7371_v58 = vld [vmem:[#allocation4 + $0x128] sm:$0xff]  ;;  %7329 = vst [vmem:[#allocation4 + $0x159] sm:$0xff] %v10826_v27  ;;  %v7372_v42 = vld [vmem:[#allocation4 + $0x130] sm:$0x1] }
 0x627   : > { %v7445_v49 = vmax.f32 %v7421_v46, %v7370_v48  ;;  %v7446_v60 = vmax.f32 %v7422_v24, %v7371_v58  ;;  %7328 = vst [vmem:[#allocation4 + $0x151] sm:$0xff] %v10827_v6  ;;  %v10096_v26 = vpop.f32.mrb[28].mxu1 }
 0x628   : > { %7696 = vst [vmem:[%s13496_s19 + $0x18] sm:$0xff] %v7688_v25  ;;  %7471 = vst [vmem:[#allocation5 + $0x88] sm:$0x1] %v7447_v57  ;;  %v10828_v35 = vadd.f32 %v10096_v26, %v13469_v56  ;;  %v7186_v21 = vpop.f32.mrb[29].mxu1  ;;  %v7486_v11 = vld [vmem:[#allocation5 + $0x60] ss:$2 sm:$0xff] }
 0x629   : > { %7469 = vst [vmem:[#allocation5 + $0x78] sm:$0xff] %v7445_v49  ;;  %7470 = vst [vmem:[#allocation5 + $0x80] sm:$0xff] %v7446_v60  ;;  %v7375_v22 = vld [vmem:[#allocation4 + $0x148] sm:$0x1]  ;;  %v10829_v3 = vadd.f32 %v13469_v56, %v7186_v21  ;;  %v7502_v38 = vld [vmem:[#allocation5 + $0x61] ss:$2 sm:$0xff] }
 0x62a   : > { %7331 = vst [vmem:[#allocation4 + $0x171] sm:$0xff] %v10828_v35  ;;  %v7373_v59 = vld [vmem:[#allocation4 + $0x138] sm:$0xff]  ;;  %v7374_v4 = vld [vmem:[#allocation4 + $0x140] sm:$0xff]  ;;  %v7426_v36 = vmax.f32 %v7372_v42, %v7375_v22  ;;  %v7529_v1 = vmax.f32 %v7486_v11, %v7502_v38 }
 0x62b   : > { %7330 = vst [vmem:[#allocation4 + $0x169] sm:$0xff] %v10829_v3  ;;  %v10099_v51 = vpop.f32.mrb[30].mxu1  ;;  %v7424_v31 = vmax.f32 %v7370_v48, %v7373_v59  ;;  %v7425_v47 = vmax.f32 %v7371_v58, %v7374_v4  ;;  %v7518_v10 = vld [vmem:[#allocation5 + $0x62] ss:$2 sm:$0xff] }
 0x62c   : > { %v10830_v0 = vadd.f32 %v10099_v51, %v13469_v56  ;;  %v7196_v34 = vpop.f32.mrb[31].mxu1  ;;  %v7537_v55 = vmax.f32 %v7529_v1, %v7518_v10 }
 0x62d   : > { %v7402_v52 = vld [vmem:[#allocation4 + $0x160] sm:$0x1]  ;;  %v10831_v15 = vadd.f32 %v13469_v56, %v7196_v34 }
 0x62e   : > { %v7450_v33 = vmax.f32 %v7426_v36, %v7402_v52  ;;  %v7376_v62 = vld [vmem:[#allocation4 + $0x150] sm:$0xff]  ;;  %v7377_v23 = vld [vmem:[#allocation4 + $0x158] sm:$0xff]  ;;  %7333 = vst [vmem:[#allocation4 + $0x189] sm:$0xff] %v10830_v0  ;;  %v7378_v61 = vld [vmem:[#allocation4 + $0x160] sm:$0x1] }
 0x62f   : > { %v7448_v50 = vmax.f32 %v7424_v31, %v7376_v62  ;;  %v7449_v28 = vmax.f32 %v7425_v47, %v7377_v23  ;;  %7332 = vst [vmem:[#allocation4 + $0x181] sm:$0xff] %v10831_v15  ;;  %v10140_v29 = vpop.f32.mrb[32].mxu1 }
 0x630   : > { %7474 = vst [vmem:[#allocation5 + $0xa0] sm:$0x1] %v7450_v33  ;;  %v7488_v14 = vld [vmem:[#allocation5 + $0x78] ss:$2 sm:$0xff]  ;;  %v7504_v5 = vld [vmem:[#allocation5 + $0x79] ss:$2 sm:$0xff]  ;;  %v7672_v12 = vadd.f32 %v10140_v29, %v13486_v7 }
 0x631   : > { %7472 = vst [vmem:[#allocation5 + $0x90] sm:$0xff] %v7448_v50  ;;  %7473 = vst [vmem:[#allocation5 + $0x98] sm:$0xff] %v7449_v28  ;;  %v7381_v45 = vld [vmem:[#allocation4 + $0x178] sm:$0x1]  ;;  %v7530_v13 = vmax.f32 %v7488_v14, %v7504_v5  ;;  %v7666_v56 = vpop.f32.mrb[33].mxu1 }
 0x632   : > { %v7379_v8 = vld [vmem:[#allocation4 + $0x168] sm:$0xff]  ;;  %v7380_v32 = vld [vmem:[#allocation4 + $0x170] sm:$0xff]  ;;  %v7667_v63 = vadd.f32 %v13486_v7, %v7666_v56  ;;  %v7429_v17 = vmax.f32 %v7378_v61, %v7381_v45 }
 0x633   : > { %v7520_v37 = vld [vmem:[#allocation5 + $0x7a] ss:$2 sm:$0xff]  ;;  %v10143_v53 = vpop.f32.mrb[34].mxu1  ;;  %v7427_v16 = vmax.f32 %v7376_v62, %v7379_v8  ;;  %v7428_v40 = vmax.f32 %v7377_v23, %v7380_v32 }
 0x634   : > { %v7538_v44 = vmax.f32 %v7530_v13, %v7520_v37  ;;  %v7689_v18 = vadd.f32 %v7667_v63, %v7537_v55  ;;  %v7676_v9 = vpop.f32.mrb[35].mxu1  ;;  %v7682_v60 = vadd.f32 %v10143_v53, %v13486_v7 }
 0x635   : > { %v7405_v20 = vld [vmem:[#allocation4 + $0x190] sm:$0x1]  ;;  %v7677_v25 = vadd.f32 %v13486_v7, %v7676_v9 }
 0x636   : > { %v7690_v43 = vadd.f32 %v7672_v12, %v7538_v44  ;;  %v7453_v19 = vmax.f32 %v7429_v17, %v7405_v20  ;;  %v7403_v39 = vld [vmem:[#allocation4 + $0x180] sm:$0xff]  ;;  %v7404_v54 = vld [vmem:[#allocation4 + $0x188] sm:$0xff]  ;;  %7697 = vst [vmem:[%s13496_s19 + $0x20] sm:$0xff] %v7689_v18 }
 0x637   : > { %v7451_v41 = vmax.f32 %v7427_v16, %v7403_v39  ;;  %v7452_v27 = vmax.f32 %v7428_v40, %v7404_v54 }
 0x638   : > { %7698 = vst [vmem:[%s13496_s19 + $0x28] sm:$0xff] %v7690_v43  ;;  %7477 = vst [vmem:[#allocation5 + $0xb8] sm:$0x1] %v7453_v19  ;;  %v7490_v30 = vld [vmem:[#allocation5 + $0x90] ss:$2 sm:$0xff] }
 0x639   : > { %v7506_v46 = vld [vmem:[#allocation5 + $0x91] ss:$2 sm:$0xff]  ;;  %7475 = vst [vmem:[#allocation5 + $0xa8] sm:$0xff] %v7451_v41  ;;  %7476 = vst [vmem:[#allocation5 + $0xb0] sm:$0xff] %v7452_v27  ;;  %v7522_v2 = vld [vmem:[#allocation5 + $0x92] ss:$2 sm:$0xff] }
 0x63a   : > { %v7531_v24 = vmax.f32 %v7490_v30, %v7506_v46 }
 0x63c   : > { %v7539_v6 = vmax.f32 %v7531_v24, %v7522_v2 }
 0x63e   : > { %v7691_v57 = vadd.f32 %v7677_v25, %v7539_v6 }
 0x640   : > { %7699 = vst [vmem:[%s13496_s19 + $0x30] sm:$0xff] %v7691_v57  ;;  %v7492_v48 = vld [vmem:[#allocation5 + $0xa8] ss:$2 sm:$0xff]  ;;  %v7508_v58 = vld [vmem:[#allocation5 + $0xa9] ss:$2 sm:$0xff] }
 0x641   : > { %v7532_v49 = vmax.f32 %v7492_v48, %v7508_v58  ;;  %v7524_v26 = vld [vmem:[#allocation5 + $0xaa] ss:$2 sm:$0xff] }
 0x643   : > { %v7540_v35 = vmax.f32 %v7532_v49, %v7524_v26 }
 0x645   : > { %v7692_v21 = vadd.f32 %v7682_v60, %v7540_v35 }
 0x647   : > { %7700 = vst [vmem:[%s13496_s19 + $0x38] sm:$0xff] %v7692_v21 }
 0x648 PF: > { %s17_s24 = sadd.s32 1, %s11364_s24  }
 0x649   : > { %p14_p4 = scmp.ge.s32.totalorder %s17_s24, 4  }
 0x64b   :  { %16 = sbr.rel (!%p14_p4) target bundleno = 1 (0x1), region = 116 }

</bundles_post_ra>
